<compile_context>
chip_gen: v6e
topology: v6e:2x2x1
jax: 0.10.0
libtpu: 0.0.40
codegen_flags: <defaults>
</compile_context>

<pallas_src>
import functools

import jax
import jax.numpy as jnp
from jax.experimental import pallas as pl
from jax.experimental.pallas import tpu as pltpu


def _layer_norm(x, w, b, eps=1e-5):
    # x: (R, D) f32, w/b: (1, D) f32.  One-pass variance: mean(x^2) - mean^2.
    mean = jnp.mean(x, axis=-1, keepdims=True)
    mean_sq = jnp.mean(x * x, axis=-1, keepdims=True)
    var = jnp.maximum(mean_sq - mean * mean, 0.0)
    return (x - mean) * jax.lax.rsqrt(var + eps) * w + b


def clip_encoder_layer_kernel(
    x_ref,
    ln1_w, ln1_b,
    wq, bq, wk, bk, wv, bv, wo, bo,
    ln2_w, ln2_b,
    fc1_w, fc1_b, fc2_w, fc2_b,
    o_ref,
    ctx_scratch,
    *, num_heads, head_dim, q_block, compute_dtype, approx_recip,
):
    TB, S, D = x_ref.shape
    H, hd = num_heads, head_dim
    Hhd = H * hd
    cdt = compute_dtype
    R = TB * S
    n_q_tiles = S // q_block

    x = x_ref[...].reshape(R, D).astype(jnp.float32)   # (R, D), rows = batch*seq
    residual = x

    # ---- LayerNorm 1 (f32 stats) ----
    h = _layer_norm(x, ln1_w[...], ln1_b[...])
    h_c = h.astype(cdt)

    # ---- QKV projections: one full-width matmul each over all TB*S rows ----
    # (1/sqrt(head_dim) already folded into wq / bq on the host.)
    q = jnp.dot(h_c, wq[...], preferred_element_type=jnp.float32) + bq[...]
    k = jnp.dot(h_c, wk[...], preferred_element_type=jnp.float32) + bk[...]
    v = jnp.dot(h_c, wv[...], preferred_element_type=jnp.float32) + bv[...]

    # ---- attention: per sequence, tiled over query rows; heads batched in each einsum ----
    for b in range(TB):
        r0 = b * S
        kb = k[r0:r0 + S].reshape(S, H, hd).transpose(1, 0, 2).astype(cdt)   # (H, S, hd)
        vb = v[r0:r0 + S].reshape(S, H, hd).transpose(1, 0, 2).astype(cdt)   # (H, S, hd)
        qb = q[r0:r0 + S].reshape(S, H, hd).transpose(1, 0, 2)               # (H, S, hd) f32
        for t in range(n_q_tiles):
            qt = qb[:, t * q_block:(t + 1) * q_block, :].astype(cdt)         # (H, TQ, hd)
            s_log = jnp.einsum("hqd,hkd->hqk", qt, kb,
                               preferred_element_type=jnp.float32)           # (H, TQ, S) f32
            s_log = s_log - jnp.max(s_log, axis=-1, keepdims=True)
            p = jnp.exp(s_log)
            denom = jnp.sum(p, axis=-1, keepdims=True)
            if approx_recip:
                p = p * pl.reciprocal(denom, approx=True)                    # EUP slot
            else:
                p = p / denom
            ctx_t = jnp.einsum("hqk,hkd->hqd", p.astype(cdt), vb,
                               preferred_element_type=jnp.float32)           # (H, TQ, hd)
            ctx_2d = ctx_t.transpose(1, 0, 2).reshape(q_block, Hhd)
            ctx_scratch[pl.ds(r0 + t * q_block, q_block), :] = ctx_2d

    # ---- single fused output projection over all rows ----
    attn_out = jnp.dot(ctx_scratch[...].astype(cdt), wo[...],
                       preferred_element_type=jnp.float32) + bo[...]

    h = residual + attn_out
    residual = h

    # ---- LayerNorm 2 + MLP (quickGELU) ----
    h = _layer_norm(h, ln2_w[...], ln2_b[...])
    h = jnp.dot(h.astype(cdt), fc1_w[...], preferred_element_type=jnp.float32) + fc1_b[...]
    h = h * jax.nn.sigmoid(1.702 * h)                   # quickGELU (EUP sigmoid, f32)
    h = jnp.dot(h.astype(cdt), fc2_w[...], preferred_element_type=jnp.float32) + fc2_b[...]

    o_ref[...] = (residual + h).reshape(TB, S, D).astype(o_ref.dtype)


def _pick_batch_block(B, S, target_rows=256, min_grid=2):
    """Batch-block size: >= ~256 rows/step if possible, keep >=2 grid steps, divide B."""
    tb = max(1, min(B, target_rows // max(S, 1)))
    while tb > 1 and B // tb < min(min_grid, B):
        tb -= 1
    while B % tb:
        tb -= 1
    return tb


def clip_encoder_layer(x, params, *, num_heads, head_dim,
                       compute_dtype=jnp.bfloat16, q_block=None,
                       approx_softmax_recip=True):
    """params use the PyTorch convention: W[out, in], biases (1, out), LN weights (1, D)."""
    B, S, D = x.shape
    H, hd = num_heads, head_dim
    Hhd = H * hd
    I = params["fc1_w"].shape[0]
    f32 = jnp.float32
    cdt = compute_dtype
    scale = 1.0 / (head_dim ** 0.5)

    TB = _pick_batch_block(B, S)
    TQ = q_block if (q_block is not None and S % q_block == 0) else S

    # Pre-transpose Linear weights to [in, out] on the host (no in-kernel weight transposes),
    # fold the attention scale into wq/bq, and cast matmul weights to the compute dtype.
    param_list = [
        params["ln1_w"].astype(f32), params["ln1_b"].astype(f32),
        (params["wq"].T * scale).astype(cdt), (params["bq"] * scale).astype(f32),
        params["wk"].T.astype(cdt), params["bk"].astype(f32),
        params["wv"].T.astype(cdt), params["bv"].astype(f32),
        params["wo"].T.astype(cdt), params["bo"].astype(f32),
        params["ln2_w"].astype(f32), params["ln2_b"].astype(f32),
        params["fc1_w"].T.astype(cdt), params["fc1_b"].astype(f32),
        params["fc2_w"].T.astype(cdt), params["fc2_b"].astype(f32),
    ]

    def weight_spec(a):
        nd = a.ndim
        # Block index is constant across the grid -> single-buffer (saves resident VMEM).
        return pl.BlockSpec(a.shape, lambda i, _nd=nd: (0,) * _nd,
                            pipeline_mode=pl.Buffered(1))

    in_specs = [pl.BlockSpec((TB, S, D), lambda i: (i, 0, 0))]
    in_specs += [weight_spec(p) for p in param_list]
    out_spec = pl.BlockSpec((TB, S, D), lambda i: (i, 0, 0))

    # ---- VMEM budget: single-buffered weights + double-buffered activation blocks
    # + in-kernel intermediates (q/k/v, (H,TQ,S) logits/probs, ctx scratch, MLP hidden). ----
    weight_bytes = sum(int(p.size) * p.dtype.itemsize for p in param_list)
    block_bytes = 2 * 2 * TB * S * D * x.dtype.itemsize          # in + out, double-buffered
    inter_bytes = (
        TB * S * (6 * D + 5 * Hhd + 3 * I) * 4                    # residuals/LN/q/k/v/MLP hidden
        + 3 * H * TQ * S * 4                                      # logits / probs tiles (f32)
        + 2 * H * S * hd * 2                                      # kb / vb compute-dtype copies
        + TB * S * Hhd * 4                                        # ctx scratch
    )
    try:
        vmem_cap = int(pltpu.get_tpu_info().vmem_capacity_bytes)
    except Exception:
        vmem_cap = 64 << 20                                       # conservative (v7x)
    need = weight_bytes + block_bytes + inter_bytes + (6 << 20)   # + Mosaic internal scratch
    vmem_limit = int(min(vmem_cap - (8 << 20), max(need, 8 << 20)))

    # ---- advisory cost estimate for XLA's scheduler ----
    flops = 8 * B * S * D * Hhd + 4 * B * S * D * I + 4 * B * H * S * S * hd
    cost = pl.CostEstimate(
        flops=int(flops),
        transcendentals=int(B * H * S * S + B * S * I),
        bytes_accessed=int(weight_bytes + 2 * B * S * D * x.dtype.itemsize),
    )

    kernel = functools.partial(
        clip_encoder_layer_kernel,
        num_heads=num_heads, head_dim=head_dim, q_block=TQ,
        compute_dtype=cdt, approx_recip=approx_softmax_recip,
    )
    return pl.pallas_call(
        kernel,
        out_shape=jax.ShapeDtypeStruct((B, S, D), x.dtype),
        grid=(B // TB,),
        in_specs=in_specs,
        out_specs=out_spec,
        scratch_shapes=[pltpu.VMEM((TB * S, Hhd), jnp.float32)],
        compiler_params=pltpu.CompilerParams(
            dimension_semantics=("parallel",),
            vmem_limit_bytes=vmem_limit,
        ),
        cost_estimate=cost,
    )(x, *param_list)


def reference_jax(x, p, *, num_heads, head_dim):
    """Pure-JAX f32 reference of the same forward pass."""
    def ln(x, w, b):
        m = x.mean(-1, keepdims=True)
        v = ((x - m) ** 2).mean(-1, keepdims=True)
        return (x - m) / jnp.sqrt(v + 1e-5) * w + b

    B, S, D = x.shape
    res = x
    h = ln(x, p["ln1_w"], p["ln1_b"])
    q = h @ p["wq"].T + p["bq"]
    k = h @ p["wk"].T + p["bk"]
    v = h @ p["wv"].T + p["bv"]
    q = q.reshape(B, S, num_heads, head_dim).transpose(0, 2, 1, 3)
    k = k.reshape(B, S, num_heads, head_dim).transpose(0, 2, 1, 3)
    v = v.reshape(B, S, num_heads, head_dim).transpose(0, 2, 1, 3)
    s = jnp.einsum("bhqd,bhkd->bhqk", q, k) / (head_dim ** 0.5)
    a = jax.nn.softmax(s, axis=-1)
    o = jnp.einsum("bhqk,bhkd->bhqd", a, v)
    o = o.transpose(0, 2, 1, 3).reshape(B, S, num_heads * head_dim)
    o = o @ p["wo"].T + p["bo"]
    h = res + o
    res = h
    h = ln(h, p["ln2_w"], p["ln2_b"])
    h = h @ p["fc1_w"].T + p["fc1_b"]
    h = h * jax.nn.sigmoid(1.702 * h)
    h = h @ p["fc2_w"].T + p["fc2_b"]
    return res + h


if __name__ == "__main__":
    # Small but lane-dense shapes (D and intermediate multiples of 128); B=4 so that the
    # batch-blocking (TB=2, grid of 2 steps) and the query tiling (q_block=8 -> 2 tiles)
    # code paths are both exercised.
    B, S = 4, 16
    embed_dim = 128
    intermediate_size = 256
    num_heads = 2
    head_dim = 64
    dim_inner = num_heads * head_dim

    key = jax.random.PRNGKey(0)
    keys = jax.random.split(key, 16)

    def w(k, shape, scale=0.05):
        return (scale * jax.random.normal(k, shape)).astype(jnp.float32)

    params = {
        "ln1_w": jnp.ones((1, embed_dim), jnp.float32),
        "ln1_b": jnp.zeros((1, embed_dim), jnp.float32),
        "wq": w(keys[0], (dim_inner, embed_dim)),
        "bq": w(keys[1], (1, dim_inner)),
        "wk": w(keys[2], (dim_inner, embed_dim)),
        "bk": w(keys[3], (1, dim_inner)),
        "wv": w(keys[4], (dim_inner, embed_dim)),
        "bv": w(keys[5], (1, dim_inner)),
        "wo": w(keys[6], (embed_dim, dim_inner)),
        "bo": w(keys[7], (1, embed_dim)),
        "ln2_w": jnp.ones((1, embed_dim), jnp.float32),
        "ln2_b": jnp.zeros((1, embed_dim), jnp.float32),
        "fc1_w": w(keys[8], (intermediate_size, embed_dim)),
        "fc1_b": w(keys[9], (1, intermediate_size)),
        "fc2_w": w(keys[10], (embed_dim, intermediate_size)),
        "fc2_b": w(keys[11], (1, embed_dim)),
    }

    x = jax.random.normal(keys[12], (B, S, embed_dim), dtype=jnp.float32)

    ref = reference_jax(x, params, num_heads=num_heads, head_dim=head_dim)

    # f32 compute path with exact softmax reciprocal: tight parity check.
    out_f32 = clip_encoder_layer(x, params, num_heads=num_heads, head_dim=head_dim,
                                 compute_dtype=jnp.float32, q_block=8,
                                 approx_softmax_recip=False)
    out_f32 = jax.block_until_ready(out_f32)
    assert out_f32.shape == (B, S, embed_dim)
    assert jnp.allclose(out_f32, ref, atol=2e-3, rtol=2e-3), "f32 kernel mismatch vs reference"

    # bf16 compute path (default / performance configuration): looser check
    # (bf16 weight quantization + approximate softmax reciprocal).
    out_bf16 = clip_encoder_layer(x, params, num_heads=num_heads, head_dim=head_dim, q_block=8)
    out_bf16 = jax.block_until_ready(out_bf16)
    assert out_bf16.shape == (B, S, embed_dim)
    assert jnp.allclose(out_bf16, ref, atol=5e-2, rtol=5e-2), "bf16 kernel mismatch vs reference"

    print("KERNEL_OK")
</pallas_src>

<mosaic_0001>
module attributes {stable_mosaic.version = 11 : i64} {
  func.func @clip_encoder_layer_kernel(%arg0: i32, %arg1: memref<2x16x128xf32, #tpu.memory_space<vmem>>, %arg2: memref<1x128xf32, #tpu.memory_space<vmem>>, %arg3: memref<1x128xf32, #tpu.memory_space<vmem>>, %arg4: memref<128x128xf32, #tpu.memory_space<vmem>>, %arg5: memref<1x128xf32, #tpu.memory_space<vmem>>, %arg6: memref<128x128xf32, #tpu.memory_space<vmem>>, %arg7: memref<1x128xf32, #tpu.memory_space<vmem>>, %arg8: memref<128x128xf32, #tpu.memory_space<vmem>>, %arg9: memref<1x128xf32, #tpu.memory_space<vmem>>, %arg10: memref<128x128xf32, #tpu.memory_space<vmem>>, %arg11: memref<1x128xf32, #tpu.memory_space<vmem>>, %arg12: memref<1x128xf32, #tpu.memory_space<vmem>>, %arg13: memref<1x128xf32, #tpu.memory_space<vmem>>, %arg14: memref<128x256xf32, #tpu.memory_space<vmem>>, %arg15: memref<1x256xf32, #tpu.memory_space<vmem>>, %arg16: memref<256x128xf32, #tpu.memory_space<vmem>>, %arg17: memref<1x128xf32, #tpu.memory_space<vmem>>, %arg18: memref<2x16x128xf32, #tpu.memory_space<vmem>>, %arg19: memref<32x128xf32, #tpu.memory_space<vmem>>) attributes {dimension_semantics = [#tpu.dimension_semantics<parallel>], iteration_bounds = array<i64: 2>, scalar_prefetch = 0 : i64, scratch_operands = 1 : i64, tpu.core_type = #tpu.core_type<tc>, window_params = [{transform_indices = @transform_0, window_bounds = array<i64: 2, 16, 128>}, {pipeline_mode = #tpu.pipeline_mode<synchronous>, transform_indices = @transform_1, window_bounds = array<i64: 1, 128>}, {pipeline_mode = #tpu.pipeline_mode<synchronous>, transform_indices = @transform_2, window_bounds = array<i64: 1, 128>}, {pipeline_mode = #tpu.pipeline_mode<synchronous>, transform_indices = @transform_3, window_bounds = array<i64: 128, 128>}, {pipeline_mode = #tpu.pipeline_mode<synchronous>, transform_indices = @transform_4, window_bounds = array<i64: 1, 128>}, {pipeline_mode = #tpu.pipeline_mode<synchronous>, transform_indices = @transform_5, window_bounds = array<i64: 128, 128>}, {pipeline_mode = #tpu.pipeline_mode<synchronous>, transform_indices = @transform_6, window_bounds = array<i64: 1, 128>}, {pipeline_mode = #tpu.pipeline_mode<synchronous>, transform_indices = @transform_7, window_bounds = array<i64: 128, 128>}, {pipeline_mode = #tpu.pipeline_mode<synchronous>, transform_indices = @transform_8, window_bounds = array<i64: 1, 128>}, {pipeline_mode = #tpu.pipeline_mode<synchronous>, transform_indices = @transform_9, window_bounds = array<i64: 128, 128>}, {pipeline_mode = #tpu.pipeline_mode<synchronous>, transform_indices = @transform_10, window_bounds = array<i64: 1, 128>}, {pipeline_mode = #tpu.pipeline_mode<synchronous>, transform_indices = @transform_11, window_bounds = array<i64: 1, 128>}, {pipeline_mode = #tpu.pipeline_mode<synchronous>, transform_indices = @transform_12, window_bounds = array<i64: 1, 128>}, {pipeline_mode = #tpu.pipeline_mode<synchronous>, transform_indices = @transform_13, window_bounds = array<i64: 128, 256>}, {pipeline_mode = #tpu.pipeline_mode<synchronous>, transform_indices = @transform_14, window_bounds = array<i64: 1, 256>}, {pipeline_mode = #tpu.pipeline_mode<synchronous>, transform_indices = @transform_15, window_bounds = array<i64: 256, 128>}, {pipeline_mode = #tpu.pipeline_mode<synchronous>, transform_indices = @transform_16, window_bounds = array<i64: 1, 128>}, {transform_indices = @transform_17, window_bounds = array<i64: 2, 16, 128>}]} {
    %c0 = arith.constant 0 : index
    %c0_0 = arith.constant 0 : index
    %c0_1 = arith.constant 0 : index
    %0 = vector.load %arg1[%c0, %c0_0, %c0_1] : memref<2x16x128xf32, #tpu.memory_space<vmem>>, vector<2x16x128xf32>
    %1 = vector.shape_cast %0 : vector<2x16x128xf32> to vector<32x128xf32>
    %c0_2 = arith.constant 0 : index
    %c0_3 = arith.constant 0 : index
    %2 = vector.load %arg2[%c0_2, %c0_3] : memref<1x128xf32, #tpu.memory_space<vmem>>, vector<1x128xf32>
    %c0_4 = arith.constant 0 : index
    %c0_5 = arith.constant 0 : index
    %3 = vector.load %arg3[%c0_4, %c0_5] : memref<1x128xf32, #tpu.memory_space<vmem>>, vector<1x128xf32>
    %cst = arith.constant dense<0.000000e+00> : vector<32xf32>
    %4 = vector.multi_reduction <add>, %1, %cst [1] : vector<32x128xf32> to vector<32xf32>
    %5 = vector.shape_cast %4 : vector<32xf32> to vector<32x1xf32>
    %cst_6 = arith.constant 1.280000e+02 : f32
    %6 = vector.broadcast %cst_6 : f32 to vector<32x1xf32>
    %7 = arith.divf %5, %6 : vector<32x1xf32>
    %8 = arith.mulf %1, %1 : vector<32x128xf32>
    %cst_7 = arith.constant dense<0.000000e+00> : vector<32xf32>
    %9 = vector.multi_reduction <add>, %8, %cst_7 [1] : vector<32x128xf32> to vector<32xf32>
    %10 = vector.shape_cast %9 : vector<32xf32> to vector<32x1xf32>
    %cst_8 = arith.constant 1.280000e+02 : f32
    %11 = vector.broadcast %cst_8 : f32 to vector<32x1xf32>
    %12 = arith.divf %10, %11 : vector<32x1xf32>
    %13 = arith.mulf %7, %7 : vector<32x1xf32>
    %14 = arith.subf %12, %13 : vector<32x1xf32>
    %cst_9 = arith.constant 0.000000e+00 : f32
    %15 = vector.broadcast %cst_9 : f32 to vector<32x1xf32>
    %16 = arith.maximumf %14, %15 : vector<32x1xf32>
    %17 = vector.broadcast %7 : vector<32x1xf32> to vector<32x128xf32>
    %18 = arith.subf %1, %17 : vector<32x128xf32>
    %cst_10 = arith.constant 9.99999974E-6 : f32
    %19 = vector.broadcast %cst_10 : f32 to vector<32x1xf32>
    %20 = arith.addf %16, %19 : vector<32x1xf32>
    %21 = math.rsqrt %20 : vector<32x1xf32>
    %22 = vector.broadcast %21 : vector<32x1xf32> to vector<32x128xf32>
    %23 = arith.mulf %18, %22 : vector<32x128xf32>
    %24 = vector.broadcast %2 : vector<1x128xf32> to vector<32x128xf32>
    %25 = arith.mulf %23, %24 : vector<32x128xf32>
    %26 = vector.broadcast %3 : vector<1x128xf32> to vector<32x128xf32>
    %27 = arith.addf %25, %26 : vector<32x128xf32>
    %c0_11 = arith.constant 0 : index
    %c0_12 = arith.constant 0 : index
    %28 = vector.load %arg4[%c0_11, %c0_12] : memref<128x128xf32, #tpu.memory_space<vmem>>, vector<128x128xf32>
    %cst_13 = arith.constant dense<0.000000e+00> : vector<32x128xf32>
    %29 = tpu.matmul %27, %28, %cst_13 {dimension_numbers = #tpu.dot_dimension_numbers<[1], [0], [0], [1], [0, 0, 1, 1], [], []>} : vector<32x128xf32>, vector<128x128xf32>, vector<32x128xf32> -> vector<32x128xf32>
    %c0_14 = arith.constant 0 : index
    %c0_15 = arith.constant 0 : index
    %30 = vector.load %arg5[%c0_14, %c0_15] : memref<1x128xf32, #tpu.memory_space<vmem>>, vector<1x128xf32>
    %31 = vector.broadcast %30 : vector<1x128xf32> to vector<32x128xf32>
    %32 = arith.addf %29, %31 : vector<32x128xf32>
    %c0_16 = arith.constant 0 : index
    %c0_17 = arith.constant 0 : index
    %33 = vector.load %arg6[%c0_16, %c0_17] : memref<128x128xf32, #tpu.memory_space<vmem>>, vector<128x128xf32>
    %cst_18 = arith.constant dense<0.000000e+00> : vector<32x128xf32>
    %34 = tpu.matmul %27, %33, %cst_18 {dimension_numbers = #tpu.dot_dimension_numbers<[1], [0], [0], [1], [0, 0, 1, 1], [], []>} : vector<32x128xf32>, vector<128x128xf32>, vector<32x128xf32> -> vector<32x128xf32>
    %c0_19 = arith.constant 0 : index
    %c0_20 = arith.constant 0 : index
    %35 = vector.load %arg7[%c0_19, %c0_20] : memref<1x128xf32, #tpu.memory_space<vmem>>, vector<1x128xf32>
    %36 = vector.broadcast %35 : vector<1x128xf32> to vector<32x128xf32>
    %37 = arith.addf %34, %36 : vector<32x128xf32>
    %c0_21 = arith.constant 0 : index
    %c0_22 = arith.constant 0 : index
    %38 = vector.load %arg8[%c0_21, %c0_22] : memref<128x128xf32, #tpu.memory_space<vmem>>, vector<128x128xf32>
    %cst_23 = arith.constant dense<0.000000e+00> : vector<32x128xf32>
    %39 = tpu.matmul %27, %38, %cst_23 {dimension_numbers = #tpu.dot_dimension_numbers<[1], [0], [0], [1], [0, 0, 1, 1], [], []>} : vector<32x128xf32>, vector<128x128xf32>, vector<32x128xf32> -> vector<32x128xf32>
    %c0_24 = arith.constant 0 : index
    %c0_25 = arith.constant 0 : index
    %40 = vector.load %arg9[%c0_24, %c0_25] : memref<1x128xf32, #tpu.memory_space<vmem>>, vector<1x128xf32>
    %41 = vector.broadcast %40 : vector<1x128xf32> to vector<32x128xf32>
    %42 = arith.addf %39, %41 : vector<32x128xf32>
    %43 = vector.extract_strided_slice %37 {offsets = [0, 0], sizes = [16, 128], strides = [1, 1]} : vector<32x128xf32> to vector<16x128xf32>
    %44 = vector.shape_cast %43 : vector<16x128xf32> to vector<16x2x64xf32>
    %45 = tpu.transpose %44, [1, 0, 2] : vector<16x2x64xf32> -> vector<2x16x64xf32>
    %46 = vector.extract_strided_slice %42 {offsets = [0, 0], sizes = [16, 128], strides = [1, 1]} : vector<32x128xf32> to vector<16x128xf32>
    %47 = vector.shape_cast %46 : vector<16x128xf32> to vector<16x2x64xf32>
    %48 = tpu.transpose %47, [1, 0, 2] : vector<16x2x64xf32> -> vector<2x16x64xf32>
    %49 = vector.extract_strided_slice %32 {offsets = [0, 0], sizes = [16, 128], strides = [1, 1]} : vector<32x128xf32> to vector<16x128xf32>
    %50 = vector.shape_cast %49 : vector<16x128xf32> to vector<16x2x64xf32>
    %51 = tpu.transpose %50, [1, 0, 2] : vector<16x2x64xf32> -> vector<2x16x64xf32>
    %52 = vector.extract_strided_slice %51 {offsets = [0, 0, 0], sizes = [2, 8, 64], strides = [1, 1, 1]} : vector<2x16x64xf32> to vector<2x8x64xf32>
    "tpu.trace_start"() <{level = 10 : i32, message = "hqd,hkd->hqk"}> : () -> ()
    %cst_26 = arith.constant dense<0.000000e+00> : vector<2x8x16xf32>
    %53 = tpu.matmul %52, %45, %cst_26 {dimension_numbers = #tpu.dot_dimension_numbers<[2], [2], [1], [1], [0, 0, 0, 1, 1, 1], [0], [0]>} : vector<2x8x64xf32>, vector<2x16x64xf32>, vector<2x8x16xf32> -> vector<2x8x16xf32>
    "tpu.trace_stop"() : () -> ()
    %cst_27 = arith.constant dense<0xFF800000> : vector<2x8xf32>
    %54 = vector.multi_reduction <maximumf>, %53, %cst_27 [2] : vector<2x8x16xf32> to vector<2x8xf32>
    %55 = vector.shape_cast %54 : vector<2x8xf32> to vector<2x8x1xf32>
    %56 = vector.broadcast %55 : vector<2x8x1xf32> to vector<2x8x16xf32>
    %57 = arith.subf %53, %56 : vector<2x8x16xf32>
    %58 = math.exp %57 : vector<2x8x16xf32>
    %cst_28 = arith.constant dense<0.000000e+00> : vector<2x8xf32>
    %59 = vector.multi_reduction <add>, %58, %cst_28 [2] : vector<2x8x16xf32> to vector<2x8xf32>
    %60 = vector.shape_cast %59 : vector<2x8xf32> to vector<2x8x1xf32>
    %61 = vector.broadcast %60 : vector<2x8x1xf32> to vector<2x8x16xf32>
    %62 = arith.divf %58, %61 : vector<2x8x16xf32>
    "tpu.trace_start"() <{level = 10 : i32, message = "hqk,hkd->hqd"}> : () -> ()
    %cst_29 = arith.constant dense<0.000000e+00> : vector<2x8x64xf32>
    %63 = tpu.matmul %62, %48, %cst_29 {dimension_numbers = #tpu.dot_dimension_numbers<[2], [1], [1], [2], [0, 0, 0, 1, 1, 2], [0], [0]>} : vector<2x8x16xf32>, vector<2x16x64xf32>, vector<2x8x64xf32> -> vector<2x8x64xf32>
    "tpu.trace_stop"() : () -> ()
    %64 = tpu.transpose %63, [1, 0, 2] : vector<2x8x64xf32> -> vector<8x2x64xf32>
    %65 = vector.shape_cast %64 : vector<8x2x64xf32> to vector<8x128xf32>
    %c0_30 = arith.constant 0 : index
    %c0_31 = arith.constant 0 : index
    %66 = vector.load %arg19[%c0_30, %c0_31] : memref<32x128xf32, #tpu.memory_space<vmem>>, vector<8x128xf32>
    tpu.vector_store %arg19[%c0_30, %c0_31], %65 {strides = array<i32>} : memref<32x128xf32, #tpu.memory_space<vmem>>, vector<8x128xf32>,
    %67 = vector.extract_strided_slice %51 {offsets = [0, 8, 0], sizes = [2, 8, 64], strides = [1, 1, 1]} : vector<2x16x64xf32> to vector<2x8x64xf32>
    "tpu.trace_start"() <{level = 10 : i32, message = "hqd,hkd->hqk"}> : () -> ()
    %cst_32 = arith.constant dense<0.000000e+00> : vector<2x8x16xf32>
    %68 = tpu.matmul %67, %45, %cst_32 {dimension_numbers = #tpu.dot_dimension_numbers<[2], [2], [1], [1], [0, 0, 0, 1, 1, 1], [0], [0]>} : vector<2x8x64xf32>, vector<2x16x64xf32>, vector<2x8x16xf32> -> vector<2x8x16xf32>
    "tpu.trace_stop"() : () -> ()
    %cst_33 = arith.constant dense<0xFF800000> : vector<2x8xf32>
    %69 = vector.multi_reduction <maximumf>, %68, %cst_33 [2] : vector<2x8x16xf32> to vector<2x8xf32>
    %70 = vector.shape_cast %69 : vector<2x8xf32> to vector<2x8x1xf32>
    %71 = vector.broadcast %70 : vector<2x8x1xf32> to vector<2x8x16xf32>
    %72 = arith.subf %68, %71 : vector<2x8x16xf32>
    %73 = math.exp %72 : vector<2x8x16xf32>
    %cst_34 = arith.constant dense<0.000000e+00> : vector<2x8xf32>
    %74 = vector.multi_reduction <add>, %73, %cst_34 [2] : vector<2x8x16xf32> to vector<2x8xf32>
    %75 = vector.shape_cast %74 : vector<2x8xf32> to vector<2x8x1xf32>
    %76 = vector.broadcast %75 : vector<2x8x1xf32> to vector<2x8x16xf32>
    %77 = arith.divf %73, %76 : vector<2x8x16xf32>
    "tpu.trace_start"() <{level = 10 : i32, message = "hqk,hkd->hqd"}> : () -> ()
    %cst_35 = arith.constant dense<0.000000e+00> : vector<2x8x64xf32>
    %78 = tpu.matmul %77, %48, %cst_35 {dimension_numbers = #tpu.dot_dimension_numbers<[2], [1], [1], [2], [0, 0, 0, 1, 1, 2], [0], [0]>} : vector<2x8x16xf32>, vector<2x16x64xf32>, vector<2x8x64xf32> -> vector<2x8x64xf32>
    "tpu.trace_stop"() : () -> ()
    %79 = tpu.transpose %78, [1, 0, 2] : vector<2x8x64xf32> -> vector<8x2x64xf32>
    %80 = vector.shape_cast %79 : vector<8x2x64xf32> to vector<8x128xf32>
    %c8 = arith.constant 8 : index
    %c0_36 = arith.constant 0 : index
    %81 = vector.load %arg19[%c8, %c0_36] : memref<32x128xf32, #tpu.memory_space<vmem>>, vector<8x128xf32>
    tpu.vector_store %arg19[%c8, %c0_36], %80 {strides = array<i32>} : memref<32x128xf32, #tpu.memory_space<vmem>>, vector<8x128xf32>,
    %82 = vector.extract_strided_slice %37 {offsets = [16, 0], sizes = [16, 128], strides = [1, 1]} : vector<32x128xf32> to vector<16x128xf32>
    %83 = vector.shape_cast %82 : vector<16x128xf32> to vector<16x2x64xf32>
    %84 = tpu.transpose %83, [1, 0, 2] : vector<16x2x64xf32> -> vector<2x16x64xf32>
    %85 = vector.extract_strided_slice %42 {offsets = [16, 0], sizes = [16, 128], strides = [1, 1]} : vector<32x128xf32> to vector<16x128xf32>
    %86 = vector.shape_cast %85 : vector<16x128xf32> to vector<16x2x64xf32>
    %87 = tpu.transpose %86, [1, 0, 2] : vector<16x2x64xf32> -> vector<2x16x64xf32>
    %88 = vector.extract_strided_slice %32 {offsets = [16, 0], sizes = [16, 128], strides = [1, 1]} : vector<32x128xf32> to vector<16x128xf32>
    %89 = vector.shape_cast %88 : vector<16x128xf32> to vector<16x2x64xf32>
    %90 = tpu.transpose %89, [1, 0, 2] : vector<16x2x64xf32> -> vector<2x16x64xf32>
    %91 = vector.extract_strided_slice %90 {offsets = [0, 0, 0], sizes = [2, 8, 64], strides = [1, 1, 1]} : vector<2x16x64xf32> to vector<2x8x64xf32>
    "tpu.trace_start"() <{level = 10 : i32, message = "hqd,hkd->hqk"}> : () -> ()
    %cst_37 = arith.constant dense<0.000000e+00> : vector<2x8x16xf32>
    %92 = tpu.matmul %91, %84, %cst_37 {dimension_numbers = #tpu.dot_dimension_numbers<[2], [2], [1], [1], [0, 0, 0, 1, 1, 1], [0], [0]>} : vector<2x8x64xf32>, vector<2x16x64xf32>, vector<2x8x16xf32> -> vector<2x8x16xf32>
    "tpu.trace_stop"() : () -> ()
    %cst_38 = arith.constant dense<0xFF800000> : vector<2x8xf32>
    %93 = vector.multi_reduction <maximumf>, %92, %cst_38 [2] : vector<2x8x16xf32> to vector<2x8xf32>
    %94 = vector.shape_cast %93 : vector<2x8xf32> to vector<2x8x1xf32>
    %95 = vector.broadcast %94 : vector<2x8x1xf32> to vector<2x8x16xf32>
    %96 = arith.subf %92, %95 : vector<2x8x16xf32>
    %97 = math.exp %96 : vector<2x8x16xf32>
    %cst_39 = arith.constant dense<0.000000e+00> : vector<2x8xf32>
    %98 = vector.multi_reduction <add>, %97, %cst_39 [2] : vector<2x8x16xf32> to vector<2x8xf32>
    %99 = vector.shape_cast %98 : vector<2x8xf32> to vector<2x8x1xf32>
    %100 = vector.broadcast %99 : vector<2x8x1xf32> to vector<2x8x16xf32>
    %101 = arith.divf %97, %100 : vector<2x8x16xf32>
    "tpu.trace_start"() <{level = 10 : i32, message = "hqk,hkd->hqd"}> : () -> ()
    %cst_40 = arith.constant dense<0.000000e+00> : vector<2x8x64xf32>
    %102 = tpu.matmul %101, %87, %cst_40 {dimension_numbers = #tpu.dot_dimension_numbers<[2], [1], [1], [2], [0, 0, 0, 1, 1, 2], [0], [0]>} : vector<2x8x16xf32>, vector<2x16x64xf32>, vector<2x8x64xf32> -> vector<2x8x64xf32>
    "tpu.trace_stop"() : () -> ()
    %103 = tpu.transpose %102, [1, 0, 2] : vector<2x8x64xf32> -> vector<8x2x64xf32>
    %104 = vector.shape_cast %103 : vector<8x2x64xf32> to vector<8x128xf32>
    %c16 = arith.constant 16 : index
    %c0_41 = arith.constant 0 : index
    %105 = vector.load %arg19[%c16, %c0_41] : memref<32x128xf32, #tpu.memory_space<vmem>>, vector<8x128xf32>
    tpu.vector_store %arg19[%c16, %c0_41], %104 {strides = array<i32>} : memref<32x128xf32, #tpu.memory_space<vmem>>, vector<8x128xf32>,
    %106 = vector.extract_strided_slice %90 {offsets = [0, 8, 0], sizes = [2, 8, 64], strides = [1, 1, 1]} : vector<2x16x64xf32> to vector<2x8x64xf32>
    "tpu.trace_start"() <{level = 10 : i32, message = "hqd,hkd->hqk"}> : () -> ()
    %cst_42 = arith.constant dense<0.000000e+00> : vector<2x8x16xf32>
    %107 = tpu.matmul %106, %84, %cst_42 {dimension_numbers = #tpu.dot_dimension_numbers<[2], [2], [1], [1], [0, 0, 0, 1, 1, 1], [0], [0]>} : vector<2x8x64xf32>, vector<2x16x64xf32>, vector<2x8x16xf32> -> vector<2x8x16xf32>
    "tpu.trace_stop"() : () -> ()
    %cst_43 = arith.constant dense<0xFF800000> : vector<2x8xf32>
    %108 = vector.multi_reduction <maximumf>, %107, %cst_43 [2] : vector<2x8x16xf32> to vector<2x8xf32>
    %109 = vector.shape_cast %108 : vector<2x8xf32> to vector<2x8x1xf32>
    %110 = vector.broadcast %109 : vector<2x8x1xf32> to vector<2x8x16xf32>
    %111 = arith.subf %107, %110 : vector<2x8x16xf32>
    %112 = math.exp %111 : vector<2x8x16xf32>
    %cst_44 = arith.constant dense<0.000000e+00> : vector<2x8xf32>
    %113 = vector.multi_reduction <add>, %112, %cst_44 [2] : vector<2x8x16xf32> to vector<2x8xf32>
    %114 = vector.shape_cast %113 : vector<2x8xf32> to vector<2x8x1xf32>
    %115 = vector.broadcast %114 : vector<2x8x1xf32> to vector<2x8x16xf32>
    %116 = arith.divf %112, %115 : vector<2x8x16xf32>
    "tpu.trace_start"() <{level = 10 : i32, message = "hqk,hkd->hqd"}> : () -> ()
    %cst_45 = arith.constant dense<0.000000e+00> : vector<2x8x64xf32>
    %117 = tpu.matmul %116, %87, %cst_45 {dimension_numbers = #tpu.dot_dimension_numbers<[2], [1], [1], [2], [0, 0, 0, 1, 1, 2], [0], [0]>} : vector<2x8x16xf32>, vector<2x16x64xf32>, vector<2x8x64xf32> -> vector<2x8x64xf32>
    "tpu.trace_stop"() : () -> ()
    %118 = tpu.transpose %117, [1, 0, 2] : vector<2x8x64xf32> -> vector<8x2x64xf32>
    %119 = vector.shape_cast %118 : vector<8x2x64xf32> to vector<8x128xf32>
    %c24 = arith.constant 24 : index
    %c0_46 = arith.constant 0 : index
    %120 = vector.load %arg19[%c24, %c0_46] : memref<32x128xf32, #tpu.memory_space<vmem>>, vector<8x128xf32>
    tpu.vector_store %arg19[%c24, %c0_46], %119 {strides = array<i32>} : memref<32x128xf32, #tpu.memory_space<vmem>>, vector<8x128xf32>,
    %c0_47 = arith.constant 0 : index
    %c0_48 = arith.constant 0 : index
    %121 = vector.load %arg19[%c0_47, %c0_48] : memref<32x128xf32, #tpu.memory_space<vmem>>, vector<32x128xf32>
    %c0_49 = arith.constant 0 : index
    %c0_50 = arith.constant 0 : index
    %122 = vector.load %arg10[%c0_49, %c0_50] : memref<128x128xf32, #tpu.memory_space<vmem>>, vector<128x128xf32>
    %cst_51 = arith.constant dense<0.000000e+00> : vector<32x128xf32>
    %123 = tpu.matmul %121, %122, %cst_51 {dimension_numbers = #tpu.dot_dimension_numbers<[1], [0], [0], [1], [0, 0, 1, 1], [], []>} : vector<32x128xf32>, vector<128x128xf32>, vector<32x128xf32> -> vector<32x128xf32>
    %c0_52 = arith.constant 0 : index
    %c0_53 = arith.constant 0 : index
    %124 = vector.load %arg11[%c0_52, %c0_53] : memref<1x128xf32, #tpu.memory_space<vmem>>, vector<1x128xf32>
    %125 = vector.broadcast %124 : vector<1x128xf32> to vector<32x128xf32>
    %126 = arith.addf %123, %125 : vector<32x128xf32>
    %127 = arith.addf %1, %126 : vector<32x128xf32>
    %c0_54 = arith.constant 0 : index
    %c0_55 = arith.constant 0 : index
    %128 = vector.load %arg12[%c0_54, %c0_55] : memref<1x128xf32, #tpu.memory_space<vmem>>, vector<1x128xf32>
    %c0_56 = arith.constant 0 : index
    %c0_57 = arith.constant 0 : index
    %129 = vector.load %arg13[%c0_56, %c0_57] : memref<1x128xf32, #tpu.memory_space<vmem>>, vector<1x128xf32>
    %cst_58 = arith.constant dense<0.000000e+00> : vector<32xf32>
    %130 = vector.multi_reduction <add>, %127, %cst_58 [1] : vector<32x128xf32> to vector<32xf32>
    %131 = vector.shape_cast %130 : vector<32xf32> to vector<32x1xf32>
    %cst_59 = arith.constant 1.280000e+02 : f32
    %132 = vector.broadcast %cst_59 : f32 to vector<32x1xf32>
    %133 = arith.divf %131, %132 : vector<32x1xf32>
    %134 = arith.mulf %127, %127 : vector<32x128xf32>
    %cst_60 = arith.constant dense<0.000000e+00> : vector<32xf32>
    %135 = vector.multi_reduction <add>, %134, %cst_60 [1] : vector<32x128xf32> to vector<32xf32>
    %136 = vector.shape_cast %135 : vector<32xf32> to vector<32x1xf32>
    %cst_61 = arith.constant 1.280000e+02 : f32
    %137 = vector.broadcast %cst_61 : f32 to vector<32x1xf32>
    %138 = arith.divf %136, %137 : vector<32x1xf32>
    %139 = arith.mulf %133, %133 : vector<32x1xf32>
    %140 = arith.subf %138, %139 : vector<32x1xf32>
    %cst_62 = arith.constant 0.000000e+00 : f32
    %141 = vector.broadcast %cst_62 : f32 to vector<32x1xf32>
    %142 = arith.maximumf %140, %141 : vector<32x1xf32>
    %143 = vector.broadcast %133 : vector<32x1xf32> to vector<32x128xf32>
    %144 = arith.subf %127, %143 : vector<32x128xf32>
    %cst_63 = arith.constant 9.99999974E-6 : f32
    %145 = vector.broadcast %cst_63 : f32 to vector<32x1xf32>
    %146 = arith.addf %142, %145 : vector<32x1xf32>
    %147 = math.rsqrt %146 : vector<32x1xf32>
    %148 = vector.broadcast %147 : vector<32x1xf32> to vector<32x128xf32>
    %149 = arith.mulf %144, %148 : vector<32x128xf32>
    %150 = vector.broadcast %128 : vector<1x128xf32> to vector<32x128xf32>
    %151 = arith.mulf %149, %150 : vector<32x128xf32>
    %152 = vector.broadcast %129 : vector<1x128xf32> to vector<32x128xf32>
    %153 = arith.addf %151, %152 : vector<32x128xf32>
    %c0_64 = arith.constant 0 : index
    %c0_65 = arith.constant 0 : index
    %154 = vector.load %arg14[%c0_64, %c0_65] : memref<128x256xf32, #tpu.memory_space<vmem>>, vector<128x256xf32>
    %cst_66 = arith.constant dense<0.000000e+00> : vector<32x256xf32>
    %155 = tpu.matmul %153, %154, %cst_66 {dimension_numbers = #tpu.dot_dimension_numbers<[1], [0], [0], [1], [0, 0, 1, 1], [], []>} : vector<32x128xf32>, vector<128x256xf32>, vector<32x256xf32> -> vector<32x256xf32>
    %c0_67 = arith.constant 0 : index
    %c0_68 = arith.constant 0 : index
    %156 = vector.load %arg15[%c0_67, %c0_68] : memref<1x256xf32, #tpu.memory_space<vmem>>, vector<1x256xf32>
    %157 = vector.broadcast %156 : vector<1x256xf32> to vector<32x256xf32>
    %158 = arith.addf %155, %157 : vector<32x256xf32>
    %cst_69 = arith.constant 1.702000e+00 : f32
    %159 = vector.broadcast %cst_69 : f32 to vector<32x256xf32>
    %160 = arith.mulf %159, %158 : vector<32x256xf32>
    %161 = arith.negf %160 : vector<32x256xf32>
    %162 = math.exp %161 : vector<32x256xf32>
    %cst_70 = arith.constant 1.000000e+00 : f32
    %163 = vector.broadcast %cst_70 : f32 to vector<32x256xf32>
    %164 = arith.addf %163, %162 : vector<32x256xf32>
    %165 = arith.divf %163, %164 : vector<32x256xf32>
    %166 = arith.mulf %158, %165 : vector<32x256xf32>
    %c0_71 = arith.constant 0 : index
    %c0_72 = arith.constant 0 : index
    %167 = vector.load %arg16[%c0_71, %c0_72] : memref<256x128xf32, #tpu.memory_space<vmem>>, vector<256x128xf32>
    %cst_73 = arith.constant dense<0.000000e+00> : vector<32x128xf32>
    %168 = tpu.matmul %166, %167, %cst_73 {dimension_numbers = #tpu.dot_dimension_numbers<[1], [0], [0], [1], [0, 0, 1, 1], [], []>} : vector<32x256xf32>, vector<256x128xf32>, vector<32x128xf32> -> vector<32x128xf32>
    %c0_74 = arith.constant 0 : index
    %c0_75 = arith.constant 0 : index
    %169 = vector.load %arg17[%c0_74, %c0_75] : memref<1x128xf32, #tpu.memory_space<vmem>>, vector<1x128xf32>
    %170 = vector.broadcast %169 : vector<1x128xf32> to vector<32x128xf32>
    %171 = arith.addf %168, %170 : vector<32x128xf32>
    %172 = arith.addf %127, %171 : vector<32x128xf32>
    %173 = vector.shape_cast %172 : vector<32x128xf32> to vector<2x16x128xf32>
    %c0_76 = arith.constant 0 : index
    %c0_77 = arith.constant 0 : index
    %c0_78 = arith.constant 0 : index
    %174 = vector.load %arg18[%c0_76, %c0_77, %c0_78] : memref<2x16x128xf32, #tpu.memory_space<vmem>>, vector<2x16x128xf32>
    tpu.vector_store %arg18[%c0_76, %c0_77, %c0_78], %173 {strides = array<i32>} : memref<2x16x128xf32, #tpu.memory_space<vmem>>, vector<2x16x128xf32>,
    return
  }
  func.func @transform_0(%arg0: i32) -> (i32, i32, i32) {
    %c0_i32 = arith.constant 0 : i32
    %c0_i32_0 = arith.constant 0 : i32
    %c0_i32_1 = arith.constant 0 : i32
    return %arg0, %c0_i32, %c0_i32_0 : i32, i32, i32
  }
  func.func @transform_1(%arg0: i32) -> (i32, i32) {
    %c0_i32 = arith.constant 0 : i32
    %c0_i32_0 = arith.constant 0 : i32
    %c0_i32_1 = arith.constant 0 : i32
    return %c0_i32, %c0_i32_0 : i32, i32
  }
  func.func @transform_2(%arg0: i32) -> (i32, i32) {
    %c0_i32 = arith.constant 0 : i32
    %c0_i32_0 = arith.constant 0 : i32
    %c0_i32_1 = arith.constant 0 : i32
    return %c0_i32, %c0_i32_0 : i32, i32
  }
  func.func @transform_3(%arg0: i32) -> (i32, i32) {
    %c0_i32 = arith.constant 0 : i32
    %c0_i32_0 = arith.constant 0 : i32
    %c0_i32_1 = arith.constant 0 : i32
    return %c0_i32, %c0_i32_0 : i32, i32
  }
  func.func @transform_4(%arg0: i32) -> (i32, i32) {
    %c0_i32 = arith.constant 0 : i32
    %c0_i32_0 = arith.constant 0 : i32
    %c0_i32_1 = arith.constant 0 : i32
    return %c0_i32, %c0_i32_0 : i32, i32
  }
  func.func @transform_5(%arg0: i32) -> (i32, i32) {
    %c0_i32 = arith.constant 0 : i32
    %c0_i32_0 = arith.constant 0 : i32
    %c0_i32_1 = arith.constant 0 : i32
    return %c0_i32, %c0_i32_0 : i32, i32
  }
  func.func @transform_6(%arg0: i32) -> (i32, i32) {
    %c0_i32 = arith.constant 0 : i32
    %c0_i32_0 = arith.constant 0 : i32
    %c0_i32_1 = arith.constant 0 : i32
    return %c0_i32, %c0_i32_0 : i32, i32
  }
  func.func @transform_7(%arg0: i32) -> (i32, i32) {
    %c0_i32 = arith.constant 0 : i32
    %c0_i32_0 = arith.constant 0 : i32
    %c0_i32_1 = arith.constant 0 : i32
    return %c0_i32, %c0_i32_0 : i32, i32
  }
  func.func @transform_8(%arg0: i32) -> (i32, i32) {
    %c0_i32 = arith.constant 0 : i32
    %c0_i32_0 = arith.constant 0 : i32
    %c0_i32_1 = arith.constant 0 : i32
    return %c0_i32, %c0_i32_0 : i32, i32
  }
  func.func @transform_9(%arg0: i32) -> (i32, i32) {
    %c0_i32 = arith.constant 0 : i32
    %c0_i32_0 = arith.constant 0 : i32
    %c0_i32_1 = arith.constant 0 : i32
    return %c0_i32, %c0_i32_0 : i32, i32
  }
  func.func @transform_10(%arg0: i32) -> (i32, i32) {
    %c0_i32 = arith.constant 0 : i32
    %c0_i32_0 = arith.constant 0 : i32
    %c0_i32_1 = arith.constant 0 : i32
    return %c0_i32, %c0_i32_0 : i32, i32
  }
  func.func @transform_11(%arg0: i32) -> (i32, i32) {
    %c0_i32 = arith.constant 0 : i32
    %c0_i32_0 = arith.constant 0 : i32
    %c0_i32_1 = arith.constant 0 : i32
    return %c0_i32, %c0_i32_0 : i32, i32
  }
  func.func @transform_12(%arg0: i32) -> (i32, i32) {
    %c0_i32 = arith.constant 0 : i32
    %c0_i32_0 = arith.constant 0 : i32
    %c0_i32_1 = arith.constant 0 : i32
    return %c0_i32, %c0_i32_0 : i32, i32
  }
  func.func @transform_13(%arg0: i32) -> (i32, i32) {
    %c0_i32 = arith.constant 0 : i32
    %c0_i32_0 = arith.constant 0 : i32
    %c0_i32_1 = arith.constant 0 : i32
    return %c0_i32, %c0_i32_0 : i32, i32
  }
  func.func @transform_14(%arg0: i32) -> (i32, i32) {
    %c0_i32 = arith.constant 0 : i32
    %c0_i32_0 = arith.constant 0 : i32
    %c0_i32_1 = arith.constant 0 : i32
    return %c0_i32, %c0_i32_0 : i32, i32
  }
  func.func @transform_15(%arg0: i32) -> (i32, i32) {
    %c0_i32 = arith.constant 0 : i32
    %c0_i32_0 = arith.constant 0 : i32
    %c0_i32_1 = arith.constant 0 : i32
    return %c0_i32, %c0_i32_0 : i32, i32
  }
  func.func @transform_16(%arg0: i32) -> (i32, i32) {
    %c0_i32 = arith.constant 0 : i32
    %c0_i32_0 = arith.constant 0 : i32
    %c0_i32_1 = arith.constant 0 : i32
    return %c0_i32, %c0_i32_0 : i32, i32
  }
  func.func @transform_17(%arg0: i32) -> (i32, i32, i32) {
    %c0_i32 = arith.constant 0 : i32
    %c0_i32_0 = arith.constant 0 : i32
    %c0_i32_1 = arith.constant 0 : i32
    return %arg0, %c0_i32, %c0_i32_0 : i32, i32, i32
  }
}

</mosaic_0001>

<bundles_post_ra>
// kernel: tpu_custom_call.1
= control target key start
LH: loop header
LB: loop body
LE: loop exit
PB: predicated region body
PF: predicated region fallthrough
CT: control target
= control target key end

     0   :  { %s7123_s0 = inlined_call_operand.hbm [shape: f32[4,16,128], index: 0, kind: input, shape index: {}]   ;;  %s7124_s1 = inlined_call_operand.vmem [shape: f32[1,128], index: 1, kind: input, shape index: {}]   ;;  %s7125_s2 = inlined_call_operand.hbm [shape: f32[1,128], index: 2, kind: input, shape index: {}]   ;;  %s7126_s3 = inlined_call_operand.hbm [shape: f32[128,128], index: 3, kind: input, shape index: {}]   ;;  %s7127_s4 = inlined_call_operand.vmem [shape: f32[1,128], index: 4, kind: input, shape index: {}]   ;;  %s7128_s5 = inlined_call_operand.hbm [shape: f32[128,128], index: 5, kind: input, shape index: {}]   ;;  %s7129_s6 = inlined_call_operand.vmem [shape: f32[1,128], index: 6, kind: input, shape index: {}]   ;;  %s7130_s7 = inlined_call_operand.hbm [shape: f32[128,128], index: 7, kind: input, shape index: {}]   ;;  %s7131_s8 = inlined_call_operand.vmem [shape: f32[1,128], index: 8, kind: input, shape index: {}]   ;;  %s7132_s9 = inlined_call_operand.hbm [shape: f32[128,128], index: 9, kind: input, shape index: {}]   ;;  %s7133_s10 = inlined_call_operand.vmem [shape: f32[1,128], index: 10, kind: input, shape index: {}]   ;;  %s7134_s11 = inlined_call_operand.vmem [shape: f32[1,128], index: 11, kind: input, shape index: {}]   ;;  %s7135_s12 = inlined_call_operand.vmem [shape: f32[1,128], index: 12, kind: input, shape index: {}]   ;;  %s7136_s13 = inlined_call_operand.hbm [shape: f32[128,256], index: 13, kind: input, shape index: {}]   ;;  %s7137_s14 = inlined_call_operand.vmem [shape: f32[1,256], index: 14, kind: input, shape index: {}]   ;;  %s7138_s15 = inlined_call_operand.hbm [shape: f32[256,128], index: 15, kind: input, shape index: {}]   ;;  %s7139_s16 = inlined_call_operand.vmem [shape: f32[1,128], index: 16, kind: input, shape index: {}]   ;;  %s7140_s17 = inlined_call_operand.hbm [shape: f32[4,16,128], index: 17, kind: output, shape index: {}]  }
   0x1   :  { %7153 = sst [smem:[#allocation27_spill]] %s7123_s0 }
   0x2   :  { %7154 = sst [smem:[#allocation28_spill]] %s7124_s1 }
   0x3   :  { %7155 = sst [smem:[#allocation29_spill]] %s7125_s2 }
   0x4   :  { %7156 = sst [smem:[#allocation30_spill]] %s7126_s3 }
   0x5   :  { %7157 = sst [smem:[#allocation31_spill]] %s7128_s5 }
   0x6   :  { %7158 = sst [smem:[#allocation32_spill]] %s7130_s7 }
   0x7   :  { %7159 = sst [smem:[#allocation33_spill]] %s7132_s9 }
   0x8   :  { %7160 = sst [smem:[#allocation34_spill]] %s7136_s13 }
   0x9   :  { %7161 = sst [smem:[#allocation35_spill]] %s7138_s15 }
   0xa   :  { %7162 = sst [smem:[#allocation36_spill]] %s7140_s17 }
   0xb   :  { %22 = vsyncpa [#allocation4], 0 }
   0xc   :  { %24 = vsyncpa [#allocation4 + $0x1], 0 }
   0xd   :  { %25 = vsyncpa [#allocation7], 0 }
   0xe   :  { %26 = vsyncpa [#allocation10], 0 }
   0xf   :  { %27 = vsyncpa [#allocation13], 0 }
  0x10   :  { %28 = vsyncpa [#allocation16], 0 }
  0x11   :  { %29 = vsyncpa [#allocation5], 0 }
  0x12   :  { %31 = vsyncpa [#allocation5 + $0x1], 0  ;;  %s6140_s24 = smov 0   ;;  %s6142_s25 = smov 0  }
  0x13   :  { %s6144_s26 = smov 0   ;;  %s6146_s27 = smov 0  }
  0x14 LB: > { %7163 = sst [smem:[#allocation24_spill]] %s6024_s26  ;;  %s6030_s28 = smov [#allocation6]   ;;  %s6028_s27 = sphi %s6146_s27, %s7198_s27   ;;  %s6024_s26 = sphi %s6144_s26, %s7200_s26   ;;  %s6020_s25 = sphi %s6142_s25, %s7202_s25   ;;  %s6016_s24 = sphi %s6140_s24, %s7201_s24  }
  0x15   : > { %s446_s29 = sshll.u32 %s6030_s28, 4  ;;  %s6161_s0 = sadd.s32 4294967295, %s6028_s27   ;;  %s447_s29 = int_to_ptr.vmem [resolvable:$true] %s446_s29 }
  0x16   : > { %p4966_p0 = scmp.ge.s32.totalorder %s6028_s27, 1  ;;  %p7146_p1 = scmp.eq.s32.totalorder %s6161_s0, 0 }
  0x17   : > { %p430_p2 = scmp.lt.s32.totalorder %s6028_s27, 3  ;;  %s6031_s18 = smov [#allocation9]  }
  0x18   : > { %s472_s19 = sshll.u32 %s6031_s18, 4  ;;  %s6032_s20 = smov [#allocation12]   ;;  %s6179_s19 = int_to_ptr.vmem [resolvable:$true] %s472_s19 }
  0x19   : > { %p6166_p3 = pnand %p4966_p0, %p430_p2  ;;  %s504_s21 = sshll.u32 %s6032_s20, 4  ;;  %s6181_s21 = int_to_ptr.vmem [resolvable:$true] %s504_s21 }
  0x1a   : > { %s5749_s23 = scalar_lea.vmem %s447_s29, 16  ;;  %s5756_s28 = scalar_lea.vmem %s447_s29, 32 }
  0x1b   : > { %s7164_s30 = scalar_select %p6166_p3, 1, 0 }
  0x1c   : > { %p5548_p5 = pneg %p6166_p3  ;;  %p5750_p8 = scmp.ne.s32.totalorder %s447_s29, %s5749_s23 }
  0x1d   : > { %p5757_p11 = scmp.lt.s32.totalorder %s447_s29, %s447_s29  ;;  %p5758_p12 = scmp.lt.s32.totalorder %s5756_s28, %s5749_s23 }
  0x1e   : > { %p6175_p6 = pnand %p5548_p5, %p7146_p1 }
  0x1f   : > { %p5759_p13 = por %p5758_p12, %p5757_p11 }
  0x20   : > { %p6185_p7 = pneg %p6175_p6 }
  0x22   : > { %p5752_p9 = pnand %p5750_p8, %p6185_p7 }
  0x24   : > { %p5753_p10 = pneg %p5752_p9 }
  0x26   : > { %p5760_p0 = pnand %p5759_p13, %p5753_p10 }
  0x28   : > { %5763 = shalt.err (!%p5760_p0)
}
  0x29   : > { %s7167_s2 = sld [smem:[#allocation29_spill]]  ;;  %s5775_s17 = scalar_lea.vmem %s6179_s19, 2048 }
  0x2a   : > { %p5776_p2 = scmp.ne.s32.totalorder %s6179_s19, %s5775_s17  ;;  %p5783_p9 = scmp.lt.s32.totalorder %s6179_s19, %s6179_s19 }
  0x2b   : > { %p5784_p11 = scmp.lt.s32.totalorder %s5775_s17, %s5775_s17 }
  0x2c   : > { %p5778_p5 = pnand %p5776_p2, %p6185_p7 }
  0x2d   : > { %p5785_p10 = por %p5784_p11, %p5783_p9 }
  0x2e   : > { %p5779_p8 = pneg %p5778_p5 }
  0x2f   : > { %5551 = dma.hbm_to_vmem [thread:$0]  (!%p6175_p6), %s7167_s2, 16, %s447_s29, [#allocation7]  }
  0x30   : > { %p5786_p12 = pnand %p5785_p10, %p5779_p8 }
  0x32   : > { %5789 = shalt.err (!%p5786_p12)
}
  0x33   : > { %s7143_s23 = smov 128   ;;  %s7145_s28 = smov 8  }
  0x34   : > { %s7168_s5 = sld [smem:[#allocation31_spill]]  ;;  %s5801_s17 = scalar_lea.vmem %s6181_s21, 2048 }
  0x35   : > { %p5802_p13 = scmp.ne.s32.totalorder %s6181_s21, %s5801_s17  ;;  %p5809_p5 = scmp.lt.s32.totalorder %s6181_s21, %s6181_s21 }
  0x36   : > { %p5810_p8 = scmp.lt.s32.totalorder %s5801_s17, %s5801_s17 }
  0x37   : > { %p5804_p0 = pnand %p5802_p13, %p6185_p7 }
  0x38   : > { %p5811_p9 = por %p5810_p8, %p5809_p5 }
  0x39   : > { %p5805_p2 = pneg %p5804_p0 }
  0x3a   : > { %5557 = dma.hbm_to_vmem [thread:$0]  (!%p6175_p6), %s7168_s5, 2048, %s6179_s19, [#allocation10], %s7143_s23, %s7143_s23, %s7145_s28  }
  0x3b   : > { %p5812_p11 = pnand %p5811_p9, %p5805_p2 }
  0x3d   : > { %5815 = shalt.err (!%p5812_p11)
}
  0x3e   : > { %s7169_s9 = sld [smem:[#allocation33_spill]]  ;;  %s6035_s19 = smov [#allocation8]  }
  0x3f   : > { %s456_s18 = sshll.u32 %s6035_s19, 4  ;;  %s6036_s2 = smov [#allocation11]   ;;  %s457_s18 = int_to_ptr.vmem [resolvable:$true] %s456_s18 }
  0x40   : > { %s488_s5 = sshll.u32 %s6036_s2, 4  ;;  %s5827_s17 = scalar_lea.vmem %s457_s18, 2048  ;;  %s489_s5 = int_to_ptr.vmem [resolvable:$true] %s488_s5 }
  0x41   : > { %p5828_p10 = scmp.ne.s32.totalorder %s457_s18, %s5827_s17  ;;  %p5835_p0 = scmp.lt.s32.totalorder %s457_s18, %s457_s18 }
  0x42   : > { %p5836_p2 = scmp.lt.s32.totalorder %s5827_s17, %s5827_s17 }
  0x43   : > { %p5830_p12 = pnand %p5828_p10, %p6185_p7 }
  0x44   : > { %5563 = dma.hbm_to_vmem [thread:$0]  (!%p6175_p6), %s7169_s9, 2048, %s6181_s21, [#allocation13], %s7143_s23, %s7143_s23, %s7145_s28  }
  0x45   : > { %p5831_p13 = pneg %p5830_p12  ;;  %p5837_p5 = por %p5836_p2, %p5835_p0 }
  0x47   : > { %p5838_p8 = pnand %p5837_p5, %p5831_p13 }
  0x49   : > { %5841 = shalt.err (!%p5838_p8)
}
  0x4a   : > { %s7170_s3 = sld [smem:[#allocation30_spill]]  ;;  %s5853_s2 = scalar_lea.vmem %s489_s5, 2048 }
  0x4b   : > { %p5854_p9 = scmp.ne.s32.totalorder %s489_s5, %s5853_s2  ;;  %p5861_p12 = scmp.lt.s32.totalorder %s489_s5, %s489_s5 }
  0x4c   : > { %p5862_p0 = scmp.lt.s32.totalorder %s5853_s2, %s5853_s2 }
  0x4d   : > { %p5856_p11 = pnand %p5854_p9, %p6185_p7 }
  0x4e   : > { %p5863_p13 = por %p5862_p0, %p5861_p12 }
  0x4f   : > { %p5857_p10 = pneg %p5856_p11 }
  0x50   : > { %5554 = dma.hbm_to_vmem [thread:$0]  (!%p6175_p6), %s7170_s3, 2048, %s457_s18, [#allocation7], %s7143_s23, %s7143_s23, %s7145_s28  }
  0x51   : > { %p5864_p2 = pnand %p5863_p13, %p5857_p10 }
  0x53   : > { %5867 = shalt.err (!%p5864_p2)
}
  0x54   : > { %s7171_s7 = sld [smem:[#allocation32_spill]]  ;;  %s6037_s18 = smov [#allocation14]  }
  0x55   : > { %s526_s17 = sshll.u32 %s6037_s18, 4  ;;  %s527_s17 = int_to_ptr.vmem [resolvable:$true] %s526_s17 }
  0x56   : > { %s5879_s21 = scalar_lea.vmem %s527_s17, 4096  ;;  %p5887_p11 = scmp.lt.s32.totalorder %s527_s17, %s527_s17 }
  0x57   : > { %p5880_p5 = scmp.ne.s32.totalorder %s527_s17, %s5879_s21  ;;  %p5888_p10 = scmp.lt.s32.totalorder %s5879_s21, %s5879_s21 }
  0x59   : > { %p5882_p8 = pnand %p5880_p5, %p6185_p7  ;;  %p5889_p12 = por %p5888_p10, %p5887_p11 }
  0x5a   : > { %5560 = dma.hbm_to_vmem [thread:$0]  (!%p6175_p6), %s7171_s7, 2048, %s489_s5, [#allocation10], %s7143_s23, %s7143_s23, %s7145_s28  }
  0x5b   : > { %p5883_p9 = pneg %p5882_p8 }
  0x5d   : > { %p5890_p0 = pnand %p5889_p12, %p5883_p9 }
  0x5f   : > { %5893 = shalt.err (!%p5890_p0)
}
  0x60   : > { %s6038_s20 = smov 256   ;;  %s6039_s2 = smov 16  }
  0x61   : > { %s7172_s13 = sld [smem:[#allocation34_spill]]  ;;  %s6040_s19 = smov [#allocation15]  }
  0x62   : > { %s542_s18 = sshll.u32 %s6040_s19, 4  ;;  %s543_s18 = int_to_ptr.vmem [resolvable:$true] %s542_s18 }
  0x63   : > { %s5905_s23 = scalar_lea.vmem %s543_s18, 4096  ;;  %p5913_p8 = scmp.lt.s32.totalorder %s543_s18, %s543_s18 }
  0x64   : > { %p5906_p13 = scmp.ne.s32.totalorder %s543_s18, %s5905_s23  ;;  %p5914_p9 = scmp.lt.s32.totalorder %s5905_s23, %s5905_s23 }
  0x66   : > { %p5908_p2 = pnand %p5906_p13, %p6185_p7  ;;  %p5915_p11 = por %p5914_p9, %p5913_p8 }
  0x67   : > { %5566 = dma.hbm_to_vmem [thread:$0]  (!%p6175_p6), %s7172_s13, 4096, %s527_s17, [#allocation13], %s6038_s20, %s6038_s20, %s6039_s2  }
  0x68   : > { %p5909_p5 = pneg %p5908_p2 }
  0x6a   : > { %p5916_p10 = pnand %p5915_p11, %p5909_p5 }
  0x6c   : > { %5919 = shalt.err (!%p5916_p10)
}
  0x6d   : > { %s7173_s21 = smov 128   ;;  %s7174_s15 = sld [smem:[#allocation35_spill]] }
  0x6e   : > { %s4965_s1 = sadd.s32 4294967294, %s6028_s27   ;;  %s6265_s22 = sadd.s32 1, %s6028_s27  }
  0x6f   : > { %7175 = sst [smem:[#allocation25_spill]] %s6265_s22  ;;  %s44_s23 = sadd.s32 1, %s6024_s26 }
  0x70   : > { %s41_s20 = ssub.s32 %s6028_s27, %s6265_s22  ;;  %p51_p7 = scmp.ne.s32.totalorder %s6024_s26, %s6020_s25 }
  0x71   : > { %p42_p12 = scmp.eq.s32.totalorder %s41_s20, 0  ;;  %p52_p0 = scmp.eq.s32.totalorder %s6028_s27, 0 }
  0x72   : > { %p57_p13 = scmp.ne.s32.totalorder %s6020_s25, %s6016_s24  ;;  %p417_p2 = scmp.eq.s32.totalorder %s6161_s0, 1 }
  0x73   : > { %5569 = dma.hbm_to_vmem [thread:$0]  (!%p6175_p6), %s7174_s15, 4096, %s543_s18, [#allocation16], %s7173_s21, %s7173_s21, %s7145_s28  }
  0x74   : > { %s6277_s2 = scalar_select %p42_p12, %s6024_s26, %s44_s23  }
  0x75   : > { %p53_p5 = por %p52_p0, %p51_p7  ;;  %p6281_p8 = por %p7146_p1, %p57_p13 }
  0x76   : > { %7176 = sst [smem:[#allocation26_spill]] %s6277_s2  ;;  %p6285_p6 = por %p417_p2, %p51_p7 }
  0x77   : > { %s7177_s5 = scalar_select %p6281_p8, 1, 0 }
  0x78   : > { %s7178_s19 = scalar_select %p6285_p6, 1, 0 }
  0x79   : > { %p423_p9 = scmp.eq.s32.totalorder %s4965_s1, 1  ;;  %p5585_p11 = scmp.lt.s32.totalorder %s6028_s27, 2 }
  0x7a   : > { %s559_s18 = sand.u32 1, %s6024_s26   ;;  %s5077_s23 = sshll.u32 %s6028_s27, 9 }
  0x7b   : > { %p6291_p10 = por %p423_p9, %p57_p13  ;;  %s4975_s17 = sshll.u32 %s559_s18, 5 }
  0x7c   : > { %s7180_s3 = sld [smem:[#allocation27_spill]]  ;;  %s563_s9 = scalar_lea.vmem [#allocation3], %s4975_s17 }
  0x7d   : > { %s7179_s29 = scalar_select %p6291_p10, 1, 0 }
  0x7e   : > { %s571_s13 = sshll.u32 %s563_s9, 4  ;;  %p6301_p7 = pnand %p5585_p11, %p53_p5  ;;  %s6305_s13 = int_to_ptr.vmem [resolvable:$true] %s571_s13 }
  0x7f   : > { %s6307_s15 = scalar_lea.sflag [#allocation4], %s559_s18 }
  0x80   : > { %p5922_p0 = pneg %p6301_p7 }
  0x82   : > { %s6299_s7 = scalar_lea.hbm %s7180_s3, %s5077_s23  ;;  %s5925_s17 = scalar_lea.hbm %s7180_s3, 1024 }
  0x83   : > { %s5920_s2 = scalar_lea.hbm %s6299_s7, 512  ;;  %p5926_p5 = scmp.lt.s32.totalorder %s6299_s7, %s7180_s3 }
  0x84   : > { %p5921_p12 = scmp.ne.s32.totalorder %s6299_s7, %s5920_s2  ;;  %p5927_p9 = scmp.lt.s32.totalorder %s5925_s17, %s5920_s2 }
  0x86   : > { %p5923_p13 = pnand %p5922_p0, %p5921_p12  ;;  %p5928_p11 = por %p5927_p9, %p5926_p5 }
  0x88   : > { %p5924_p2 = pneg %p5923_p13 }
  0x8a   : > { %p5929_p4 = pnand %p5928_p11, %p5924_p2 }
  0x8c   : > { %5932 = shalt.err (!%p5929_p4)
}
  0x8d   : > { %s5933_s18 = scalar_lea.vmem %s6305_s13, 512  ;;  %s6041_s26 = smov [#allocation3]  }
  0x8e   : > { %p5934_p1 = scmp.ne.s32.totalorder %s6305_s13, %s5933_s18  ;;  %s5938_s22 = sshll.u32 %s6041_s26, 4  ;;  %s5939_s22 = int_to_ptr.vmem [resolvable:$false] %s5938_s22 }
  0x8f   : > { %s5940_s28 = scalar_lea.vmem %s5939_s22, 1024  ;;  %p5941_p13 = scmp.lt.s32.totalorder %s6305_s13, %s5939_s22 }
  0x90   : > { %p5936_p10 = pnand %p5934_p1, %p5922_p0  ;;  %p5942_p6 = scmp.lt.s32.totalorder %s5940_s28, %s5933_s18 }
  0x92   : > { %p5937_p12 = pneg %p5936_p10  ;;  %p5943_p8 = por %p5942_p6, %p5941_p13 }
  0x94   : > { %p5944_p3 = pnand %p5943_p8, %p5937_p12 }
  0x96   : > { %5947 = shalt.err (!%p5944_p3)
}
  0x97   : > { %s7182_s2 = smov 8   ;;  %p7183_p1 = scmp.ne.s32.totalorder %s7164_s30, 0 }
  0x98   : > { %5573 = dma.hbm_to_vmem [thread:$0]  (!%p6301_p7), %s6299_s7, 512, %s6305_s13, %s6307_s15, %s7173_s21, %s7173_s21, %s7182_s2  }
  0x99   : > { %583 = sbr.rel (%p7183_p1) target bundleno = 3925 (0xf55), region = 88  ;;  %s6334_s26 = sand.u32 (!%p7183_p1), 1, %s6020_s25  }
  0x9a   : > { %s4980_s22 = sshll.u32 (!%p7183_p1), %s6334_s26, 5  ;;  %s586_s23 = scalar_lea.sflag (!%p7183_p1), [#allocation4], %s6334_s26 }
  0x9b   : > { %s6340_s1 = scalar_lea.vmem (!%p7183_p1), [#allocation3], %s4980_s22  ;;  %p7184_p3 = scmp.ne.s32.totalorder (!%p7183_p1), %s7177_s5, 0 }
  0x9e   : > { %5991 = dma.done.wait (%p7184_p3), %s586_s23, 512  }
  0x9f   : > { %5993 = vsyncadd (%p7184_p3), %s586_s23, 4294966784  ;;  %p7185_p4 = scmp.eq.s32.totalorder %s6161_s0, 0 }
  0xa1   : > { %5995 = dma.done.wait (%p7185_p4), [#allocation7], 2064   ;;  %p7186_p8 = pmov %p7185_p4 }
  0xa2   : > { %p7187_p6 = pmov %p7185_p4 }
  0xa3   : > { %5997 = vsyncadd (%p7186_p8), [#allocation7], 4294965232 }
  0xa4   : > { %5999 = dma.done.wait (%p7187_p6), [#allocation10], 4096   ;;  %p7188_p10 = pmov %p7185_p4 }
  0xa5   : > { %p7189_p7 = pmov %p7185_p4 }
  0xa6   : > { %6001 = vsyncadd (%p7188_p10), [#allocation10], 4294963200 }
  0xa7   : > { %6003 = dma.done.wait (%p7189_p7), [#allocation13], 6144   ;;  %p7190_p0 = pmov %p7185_p4 }
  0xa9   : > { %6005 = vsyncadd (%p7190_p0), [#allocation13], 4294961152  ;;  %p7191_p2 = pmov %p7190_p0 }
  0xaa   : > { %p7192_p5 = pmov %p7190_p0 }
  0xab   : > { %6007 = dma.done.wait (%p7191_p2), [#allocation16], 4096  }
  0xac   : > { %6009 = vsyncadd (%p7192_p5), [#allocation16], 4294963200  ;;  %v6363_v0 = vld [vmem:[%s6340_s1] sm:$0xff]  ;;  %v6366_v1 = vld [vmem:[%s6340_s1 + $0x8] sm:$0xff]  ;;  %s7193_s15 = sld [smem:[#allocation28_spill]]  ;;  %s6043_s9 = smov 64  }
  0xad   : > { %676 = vadd.xlane.f32.xlu0 %v6363_v0  ;;  %v689_v2 = vmul.f32 %v6363_v0, %v6363_v0  ;;  %v690_v3 = vmul.f32 %v6366_v1, %v6366_v1  ;;  %v6375_v4 = vld [vmem:[%s6340_s1 + $0x10] sm:$0xff]  ;;  %v6378_v5 = vld [vmem:[%s6340_s1 + $0x18] sm:$0xff]  ;;  %v765_v14 = vld [vmem:[#allocation8 + $0x60] sm:$0xff]  ;;  %vm6044_vm0 = vmmov 0   ;;  %vm1797_vm1 = vcmask 523264   ;;  %s7057_s17 = scalar_lea.vmem [#allocation17], %s4980_s22 }
  0xae   : > { %v691_v6 = vmul.f32 %v6375_v4, %v6375_v4  ;;  %v692_v7 = vmul.f32 %v6378_v5, %v6378_v5  ;;  %v768_v8 = vld [vmem:[#allocation8 + $0x78] sm:$0xff]  ;;  %v767_v10 = vld [vmem:[#allocation8 + $0x70] sm:$0xff]  ;;  %v766_v12 = vld [vmem:[#allocation8 + $0x68] sm:$0xff]  ;;  %vm1956_vm2 = vcmask 130048   ;;  %s4825_s22 = sshll.u32 %s7057_s17, 4  ;;  %s7194_s28 = sld [smem:[#allocation36_spill]]  ;;  %s7071_s22 = int_to_ptr.vmem [resolvable:$true] %s4825_s22 }
  0xaf   : > { %693 = vadd.xlane.f32.xlu1 %v689_v2  ;;  %5252 = vmatprep.subr.mxu0 %v768_v8  ;;  %v876_v9 = vld [vmem:[#allocation9 + $0x78] sm:$0xff]  ;;  %v875_v11 = vld [vmem:[#allocation9 + $0x70] sm:$0xff]  ;;  %v874_v13 = vld [vmem:[#allocation9 + $0x68] sm:$0xff]  ;;  %s4811_s23 = scalar_lea.sflag [#allocation5], %s6334_s26  ;;  %s5948_s7 = scalar_lea.vmem %s7071_s22, 512 }
  0xb0   : > { %5253 = vmatpush3.msra.mxu0 %v768_v8  ;;  %5290 = vmatprep.subr.mxu1 %v876_v9  ;;  %v873_v15 = vld [vmem:[#allocation9 + $0x60] sm:$0xff]  ;;  %v764_v16 = vld [vmem:[#allocation8 + $0x58] sm:$0xff]  ;;  %v763_v18 = vld [vmem:[#allocation8 + $0x50] sm:$0xff]  ;;  %p5949_p9 = scmp.ne.s32.totalorder %s7071_s22, %s5948_s7  ;;  %p7195_p11 = scmp.ne.s32.totalorder %s7178_s19, 0 }
  0xb1   : > { %678 = vadd.xlane.f32.xlu0 %v6366_v1  ;;  %5254 = vmatprep.subr.mxu0 %v767_v10  ;;  %v872_v17 = vld [vmem:[#allocation9 + $0x58] sm:$0xff]  ;;  %v871_v19 = vld [vmem:[#allocation9 + $0x50] sm:$0xff]  ;;  %v762_v20 = vld [vmem:[#allocation8 + $0x48] sm:$0xff] }
  0xb2   : > { %5291 = vmatpush3.msra.mxu1 %v876_v9  ;;  %5255 = vmatpush3.msra.mxu0 %v767_v10  ;;  %v870_v21 = vld [vmem:[#allocation9 + $0x48] sm:$0xff]  ;;  %v761_v22 = vld [vmem:[#allocation8 + $0x40] sm:$0xff]  ;;  %v760_v24 = vld [vmem:[#allocation8 + $0x38] sm:$0xff]  ;;  %p5950_p12 = pnand %p5949_p9, %p7195_p11 }
  0xb3   : > { %695 = vadd.xlane.f32.xlu1 %v690_v3  ;;  %5292 = vmatprep.subr.mxu1 %v875_v11  ;;  %v869_v23 = vld [vmem:[#allocation9 + $0x40] sm:$0xff]  ;;  %v868_v25 = vld [vmem:[#allocation9 + $0x38] sm:$0xff]  ;;  %v759_v26 = vld [vmem:[#allocation8 + $0x30] sm:$0xff] }
  0xb4   : > { %5256 = vmatprep.subr.mxu0 %v766_v12  ;;  %5293 = vmatpush3.msra.mxu1 %v875_v11  ;;  %v867_v27 = vld [vmem:[#allocation9 + $0x30] sm:$0xff]  ;;  %v758_v28 = vld [vmem:[#allocation8 + $0x28] sm:$0xff]  ;;  %v757_v30 = vld [vmem:[#allocation8 + $0x20] sm:$0xff]  ;;  %p5951_p13 = pneg %p5950_p12 }
  0xb5   : > { %680 = vadd.xlane.f32.xlu0 %v6375_v4  ;;  %5257 = vmatpush3.msra.mxu0 %v766_v12  ;;  %v866_v29 = vld [vmem:[#allocation9 + $0x28] sm:$0xff]  ;;  %v865_v31 = vld [vmem:[#allocation9 + $0x20] sm:$0xff]  ;;  %v756_v32 = vld [vmem:[#allocation8 + $0x18] sm:$0xff] }
  0xb6   : > { %5294 = vmatprep.subr.mxu1 %v874_v13  ;;  %5258 = vmatprep.subr.mxu0 %v765_v14  ;;  %v864_v33 = vld [vmem:[#allocation9 + $0x18] sm:$0xff]  ;;  %v755_v34 = vld [vmem:[#allocation8 + $0x10] sm:$0xff]  ;;  %v754_v36 = vld [vmem:[#allocation8 + $0x8] sm:$0xff] }
  0xb7   : > { %682 = vadd.xlane.f32.xlu1 %v6378_v5  ;;  %5295 = vmatpush3.msra.mxu1 %v874_v13  ;;  %v863_v35 = vld [vmem:[#allocation9 + $0x10] sm:$0xff]  ;;  %v862_v37 = vld [vmem:[#allocation9 + $0x8] sm:$0xff]  ;;  %v753_v38 = vld [vmem:[#allocation8] sm:$0xff] }
  0xb8   : > { %5259 = vmatpush3.msra.mxu0 %v765_v14  ;;  %5296 = vmatprep.subr.mxu1 %v873_v15  ;;  %v861_v39 = vld [vmem:[#allocation9] sm:$0xff]  ;;  %v6386_v40 = vld [vmem:[#allocation11 + $0x78] sm:$0xff] }
  0xb9   : > { %697 = vadd.xlane.f32.xlu0 %v691_v6  ;;  %5260 = vmatprep.subr.mxu0 %v764_v16 }
  0xba   : > { %5297 = vmatpush3.msra.mxu1 %v873_v15  ;;  %5261 = vmatpush3.msra.mxu0 %v764_v16  ;;  %v4989_v15 = vld [vmem:[%s7193_s15] ss:$0 sm:$0xff] }
  0xbb   : > { %699 = vadd.xlane.f32.xlu1 %v692_v7  ;;  %5298 = vmatprep.subr.mxu1 %v872_v17 }
  0xbc   : > { %5262 = vmatprep.subr.mxu0 %v763_v18  ;;  %5299 = vmatpush3.msra.mxu1 %v872_v17  ;;  %v4990_v17 = vld [vmem:[#allocation6] ss:$0 sm:$0xff] }
  0xbd   : > { %5263 = vmatpush3.msra.mxu0 %v763_v18  ;;  %5300 = vmatprep.subr.mxu1 %v871_v19 }
  0xbe   : > { %5264 = vmatprep.subr.mxu0 %v762_v20  ;;  %5301 = vmatpush3.msra.mxu1 %v871_v19 }
  0xbf   : > { %5265 = vmatpush3.msra.mxu0 %v762_v20  ;;  %5302 = vmatprep.subr.mxu1 %v870_v21 }
  0xc0   : > { %5266 = vmatprep.subr.mxu0 %v761_v22  ;;  %5303 = vmatpush3.msra.mxu1 %v870_v21 }
  0xc1   : > { %5267 = vmatpush3.msra.mxu0 %v761_v22  ;;  %5304 = vmatprep.subr.mxu1 %v869_v23 }
  0xc2   : > { %5268 = vmatprep.subr.mxu0 %v760_v24  ;;  %5305 = vmatpush3.msra.mxu1 %v869_v23 }
  0xc3   : > { %5269 = vmatpush3.msra.mxu0 %v760_v24  ;;  %5306 = vmatprep.subr.mxu1 %v868_v25 }
  0xc4   : > { %5270 = vmatprep.subr.mxu0 %v759_v26  ;;  %5307 = vmatpush3.msra.mxu1 %v868_v25 }
  0xc5   : > { %5271 = vmatpush3.msra.mxu0 %v759_v26  ;;  %5308 = vmatprep.subr.mxu1 %v867_v27 }
  0xc6   : > { %5272 = vmatprep.subr.mxu0 %v758_v28  ;;  %5309 = vmatpush3.msra.mxu1 %v867_v27  ;;  %v983_v27 = vld [vmem:[#allocation11 + $0x70] sm:$0xff] }
  0xc7   : > { %5273 = vmatpush3.msra.mxu0 %v758_v28  ;;  %5310 = vmatprep.subr.mxu1 %v866_v29 }
  0xc8   : > { %5274 = vmatprep.subr.mxu0 %v757_v30  ;;  %5311 = vmatpush3.msra.mxu1 %v866_v29 }
  0xc9   : > { %5275 = vmatpush3.msra.mxu0 %v757_v30  ;;  %5312 = vmatprep.subr.mxu1 %v865_v31 }
  0xca   : > { %5276 = vmatprep.subr.mxu0 %v756_v32  ;;  %5313 = vmatpush3.msra.mxu1 %v865_v31 }
  0xcb   : > { %5277 = vmatpush3.msra.mxu0 %v756_v32  ;;  %5314 = vmatprep.subr.mxu1 %v864_v33 }
  0xcc   : > { %5278 = vmatprep.subr.mxu0 %v755_v34  ;;  %5315 = vmatpush3.msra.mxu1 %v864_v33 }
  0xcd   : > { %5279 = vmatpush3.msra.mxu0 %v755_v34  ;;  %5316 = vmatprep.subr.mxu1 %v863_v35 }
  0xce   : > { %5280 = vmatprep.subr.mxu0 %v754_v36  ;;  %5317 = vmatpush3.msra.mxu1 %v863_v35  ;;  %v979_v35 = vld [vmem:[#allocation11 + $0x50] sm:$0xff] }
  0xcf   : > { %5281 = vmatpush3.msra.mxu0 %v754_v36  ;;  %5318 = vmatprep.subr.mxu1 %v862_v37  ;;  %v978_v36 = vld [vmem:[#allocation11 + $0x48] sm:$0xff] }
  0xd0   : > { %5282 = vmatprep.subr.mxu0 %v753_v38  ;;  %5319 = vmatpush3.msra.mxu1 %v862_v37  ;;  %v977_v37 = vld [vmem:[#allocation11 + $0x40] sm:$0xff] }
  0xd1   : > { %5283 = vmatpush3.msra.mxu0 %v753_v38  ;;  %5320 = vmatprep.subr.mxu1 %v861_v39  ;;  %v976_v38 = vld [vmem:[#allocation11 + $0x38] sm:$0xff] }
  0xd2   : > { %5321 = vmatpush3.msra.mxu1 %v861_v39  ;;  %5328 = vmatprep.subr.mxu0 %v6386_v40  ;;  %v975_v39 = vld [vmem:[#allocation11 + $0x30] sm:$0xff] }
 0x136   : > { %v677_v41 = vpop.xlane.xlu0 %676 }
 0x137   : > { %v685_v42 = vmul.f32 0.0078125, %v677_v41  ;;  %v973_v41 = vld [vmem:[#allocation11 + $0x20] sm:$0xff] }
 0x138   : > { %v694_v43 = vpop.xlane.xlu1 %693 }
 0x139   : > { %v705_v44 = vmul.f32 %v685_v42, %v685_v42  ;;  %v701_v45 = vmul.f32 0.0078125, %v694_v43  ;;  %v717_v13 = vsub.f32 %v6363_v0, %v685_v42  ;;  %v972_v42 = vld [vmem:[#allocation11 + $0x18] sm:$0xff]  ;;  %v971_v43 = vld [vmem:[#allocation11 + $0x10] sm:$0xff] }
 0x13a   : > { %v679_v46 = vpop.xlane.xlu0 %678 }
 0x13b   : > { %v709_v47 = vsub.f32 %v701_v45, %v705_v44  ;;  %v686_v48 = vmul.f32 0.0078125, %v679_v46  ;;  %v970_v44 = vld [vmem:[#allocation11 + $0x8] sm:$0xff]  ;;  %v969_v45 = vld [vmem:[#allocation11] sm:$0xff]  ;;  %v6042_v46 = vmov 0.0  }
 0x13c   : > { %v696_v49 = vpop.xlane.xlu1 %695  ;;  %5366 = vmatprep.subr.mxu1 %v6042_v46 }
 0x13d   : > { %v713_v50 = vmax.f32 %v709_v47, 0.0  ;;  %v706_v51 = vmul.f32 %v686_v48, %v686_v48  ;;  %v702_v52 = vmul.f32 0.0078125, %v696_v49  ;;  %v718_v18 = vsub.f32 %v6366_v1, %v686_v48  ;;  %v982_v1 = vld [vmem:[#allocation11 + $0x68] sm:$0xff]  ;;  %v4991_v47 = vld [vmem:[%s7127_s4] ss:$0 sm:$0xff] }
 0x13e   : > { %v681_v53 = vpop.xlane.xlu0 %680  ;;  %v6405_v48 = vld [vmem:[%s7129_s6] ss:$0 sm:$0xff] }
 0x13f   : > { %v721_v54 = vadd.f32 1e-05, %v713_v50  ;;  %v710_v55 = vsub.f32 %v702_v52, %v706_v51  ;;  %v687_v56 = vmul.f32 0.0078125, %v681_v53 }
 0x140   : > { %v683_v57 = vpop.xlane.xlu1 %682 }
 0x141   : > { %5654 = vrsqrt.f32 %v721_v54  ;;  %v714_v58 = vmax.f32 %v710_v55, 0.0  ;;  %v707_v59 = vmul.f32 %v687_v56, %v687_v56  ;;  %v688_v60 = vmul.f32 0.0078125, %v683_v57 }
 0x142   : > { %v698_v61 = vpop.xlane.xlu0 %697  ;;  %v719_v23 = vsub.f32 %v6375_v4, %v687_v56  ;;  %v981_v4 = vld [vmem:[#allocation11 + $0x60] sm:$0xff] }
 0x143   : > { %v722_v62 = vadd.f32 1e-05, %v714_v58  ;;  %v703_v63 = vmul.f32 0.0078125, %v698_v61  ;;  %v708_v2 = vmul.f32 %v688_v60, %v688_v60  ;;  %v720_v0 = vsub.f32 %v6378_v5, %v688_v60  ;;  %v980_v5 = vld [vmem:[#allocation11 + $0x58] sm:$0xff] }
 0x144   : > { %v700_v3 = vpop.xlane.xlu1 %699 }
 0x145   : > { %5656 = vrsqrt.f32 %v722_v62  ;;  %v711_v6 = vsub.f32 %v703_v63, %v707_v59  ;;  %v704_v7 = vmul.f32 0.0078125, %v700_v3  ;;  %v6432_v3 = vld [vmem:[%s7131_s8] ss:$0 sm:$0xff] }
 0x147   : > { %v715_v8 = vmax.f32 %v711_v6, 0.0  ;;  %v712_v9 = vsub.f32 %v704_v7, %v708_v2 }
 0x149   : > { %v723_v10 = vadd.f32 1e-05, %v715_v8  ;;  %v716_v11 = vmax.f32 %v712_v9, 0.0  ;;  %v6045_v8 = vmov 1983009808  }
 0x14a   : > { %v1087_v9 = vunpack.c.l.s4 %v6045_v8 }
 0x14b   : > { %5658 = vrsqrt.f32 %v723_v10  ;;  %v724_v12 = vadd.f32 1e-05, %v716_v11  ;;  %v1089_v10 = vlaneseq }
 0x14c   : > { %v1088_v11 = vunpack.c.0.s8 %v1087_v9 }
 0x14d   : > { %5660 = vrsqrt.f32 %v724_v12  ;;  %v6437_v12 = vshrl.u32 %v1089_v10, 7 }
 0x14e   : > { %v5655_v14 = vpop.eup %5654 }
 0x14f   : > { %v729_v16 = vmul.f32 %v5655_v14, %v717_v13  ;;  %v6046_v13 = vmov 1934713408  }
 0x150   : > { %v1118_v14 = vunpack.c.l.s4 %v6046_v13 }
 0x151   : > { %v739_v19 = vmul.f32 %v4989_v15, %v729_v16 }
 0x152   : > { %v5657_v20 = vpop.eup %5656  ;;  %v1119_v16 = vunpack.c.0.s8 %v1118_v14 }
 0x153   : > { %v749_v21 = vadd.f32 %v4990_v17, %v739_v19  ;;  %v730_v22 = vmul.f32 %v5657_v20, %v718_v18 }
 0x154   : > { %v6445_v20 = vsub.s32 %v1119_v16, %v6437_v12 }
 0x155   : > { %5284 = vmatprep.mubr.f32.mxu0 %v749_v21  ;;  %5322 = vmatprep.mubr.f32.mxu1 %v749_v21  ;;  %v740_v24 = vmul.f32 %v4989_v15, %v730_v22 }
 0x157   : > { %v750_v25 = vadd.f32 %v4990_v17, %v740_v24 }
 0x158   : > { %v5659_v26 = vpop.eup %5658 }
 0x159   : > { %5285 = vmatmul.mubr.f32.vlgmr.msra.gmra.mxu0 %v750_v25  ;;  %5323 = vmatmul.mubr.f32.vlgmr.msra.gmra.mxu1 %v750_v25  ;;  %v731_v28 = vmul.f32 %v5659_v26, %v719_v23 }
 0x15a   : > { %v5661_v29 = vpop.eup %5660  ;;  %5329 = vmatpush3.msra.mxu0 %v6386_v40  ;;  %v974_v40 = vld [vmem:[#allocation11 + $0x28] sm:$0xff] }
 0x15b   : > { %5330 = vmatprep.subr.mxu0 %v983_v27  ;;  %v741_v30 = vmul.f32 %v4989_v15, %v731_v28  ;;  %v732_v31 = vmul.f32 %v5661_v29, %v720_v0 }
 0x15c   : > { %5331 = vmatpush3.msra.mxu0 %v983_v27 }
 0x15d   : > { %5332 = vmatprep.subr.mxu0 %v982_v1  ;;  %v751_v32 = vadd.f32 %v4990_v17, %v741_v30  ;;  %v742_v33 = vmul.f32 %v4989_v15, %v732_v31  ;;  %v6440_v15 = vsub.s32 %v1088_v11, %v6437_v12 }
 0x15e   : > { %5333 = vmatpush3.msra.mxu0 %v982_v1 }
 0x15f   : > { %5334 = vmatprep.subr.mxu0 %v981_v4  ;;  %5287 = vmatprep.mubr.f32.mxu0 %v751_v32  ;;  %v752_v34 = vadd.f32 %v4990_v17, %v742_v33 }
 0x160   : > { %5335 = vmatpush3.msra.mxu0 %v981_v4  ;;  %5325 = vmatprep.mubr.f32.mxu1 %v751_v32 }
 0x161   : > { %5336 = vmatprep.subr.mxu0 %v980_v5  ;;  %5288 = vmatmul.mubr.f32.gmra.mxu0 %v752_v34 }
 0x162   : > { %5337 = vmatpush3.msra.mxu0 %v980_v5  ;;  %5360 = vmatprep.mubr.f32.mxu0 %v749_v21 }
 0x163   : > { %5338 = vmatprep.subr.mxu0 %v979_v35  ;;  %5326 = vmatmul.mubr.f32.gmra.mxu1 %v752_v34 }
 0x164   : > { %5339 = vmatpush3.msra.mxu0 %v979_v35  ;;  %5370 = vmatprep.mubr.msk.f32.mxu1 %vm6044_vm0, %v6042_v46 }
 0x165   : > { %5340 = vmatprep.subr.mxu0 %v978_v36 }
 0x166   : > { %5341 = vmatpush3.msra.mxu0 %v978_v36 }
 0x167   : > { %5342 = vmatprep.subr.mxu0 %v977_v37 }
 0x168   : > { %5343 = vmatpush3.msra.mxu0 %v977_v37 }
 0x169   : > { %5344 = vmatprep.subr.mxu0 %v976_v38 }
 0x16a   : > { %5345 = vmatpush3.msra.mxu0 %v976_v38 }
 0x16b   : > { %5346 = vmatprep.subr.mxu0 %v975_v39 }
 0x16c   : > { %5347 = vmatpush3.msra.mxu0 %v975_v39 }
 0x16d   : > { %5348 = vmatprep.subr.mxu0 %v974_v40 }
 0x16e   : > { %5349 = vmatpush3.msra.mxu0 %v974_v40 }
 0x16f   : > { %5350 = vmatprep.subr.mxu0 %v973_v41 }
 0x170   : > { %5351 = vmatpush3.msra.mxu0 %v973_v41 }
 0x171   : > { %5352 = vmatprep.subr.mxu0 %v972_v42 }
 0x172   : > { %5353 = vmatpush3.msra.mxu0 %v972_v42 }
 0x173   : > { %5354 = vmatprep.subr.mxu0 %v971_v43 }
 0x174   : > { %5355 = vmatpush3.msra.mxu0 %v971_v43 }
 0x175   : > { %5356 = vmatprep.subr.mxu0 %v970_v44 }
 0x176   : > { %5357 = vmatpush3.msra.mxu0 %v970_v44 }
 0x177   : > { %5358 = vmatprep.subr.mxu0 %v969_v45 }
 0x178   : > { %5359 = vmatpush3.msra.mxu0 %v969_v45 }
 0x179   : > { %5361 = vmatmul.mubr.f32.vlgmr.msra.gmra.mxu0 %v750_v25  ;;  %5422 = vmatprep.subr.mxu0 %v6042_v46 }
 0x17a   : > { %5363 = vmatprep.mubr.f32.mxu0 %v751_v32 }
 0x17d   : > { %5364 = vmatmul.mubr.f32.gmra.mxu0 %v752_v34 }
 0x17e   : > { %5426 = vmatprep.mubr.msk.f32.mxu0 %vm6044_vm0, %v6042_v46 }
 0x219   : > { %v5286_v49 = vpop.f32.mrf.mxu0  ;;  %v5324_v50 = vpop.f32.mrf.mxu1 }
 0x21a   : > { %v6407_v51 = vadd.f32 %v5286_v49, %v4991_v47  ;;  %v956_v52 = vadd.f32 %v5324_v50, %v6405_v48 }
 0x21b   : > { %v950_v53 = vpop.f32.mrf.mxu1  ;;  %v842_v55 = vpop.f32.mrf.mxu0 }
 0x21c   : > { %1081 = vrot.lane.b32.xlu0 %v956_v52, %s6043_s9  ;;  %v951_v54 = vadd.f32 %v6405_v48, %v950_v53  ;;  %v843_v56 = vadd.f32 %v4991_v47, %v842_v55  ;;  %v1151_v17 = vcombine.high %v956_v52, %v6042_v46  ;;  %v1158_v19 = vrot.slane %v956_v52, %v6440_v15 }
 0x21e   : > { %1079 = vrot.lane.b32.xlu1 %v951_v54, %s6043_s9  ;;  %v1165_v23 = vrot.slane %v1151_v17, %v6440_v15  ;;  %v1085_v24 = vcombine.high %v951_v54, %v6042_v46  ;;  %v1565_v0 = vcombine.high %v843_v56, %v6042_v46  ;;  %v1572_v29 = vrot.slane %v843_v56, %v6440_v15 }
 0x21f   : > { %v1092_v1 = vrot.slane %v951_v54, %v6440_v15 }
 0x220   : > { %v1099_v34 = vrot.slane %v1085_v24, %v6440_v15  ;;  %v1579_v14 = vrot.slane %v1565_v0, %v6440_v15 }
 0x221   : > { %v5289_v57 = vpop.f32.mrf.mxu0 }
 0x222   : > { %v6413_v58 = vadd.f32 %v5289_v57, %v4991_v47  ;;  %1559 = vrot.lane.b32.xlu1 %v843_v56, %s6043_s9 }
 0x223   : > { %v852_v59 = vpop.f32.mrf.mxu0  ;;  %v5327_v61 = vpop.f32.mrf.mxu1 }
 0x224   : > { %v6416_v60 = vadd.f32 %v4991_v47, %v852_v59  ;;  %v6423_v62 = vadd.f32 %v5327_v61, %v6405_v48 }
 0x239   : > { %v6425_v63 = vpop.f32.mrf.mxu0 }
 0x23b   : > { %v6427_v2 = vpop.f32.mrf.mxu0 }
 0x23d   : > { %v5365_v6 = vpop.f32.mrf.mxu0 }
 0x23e   : > { %v6435_v7 = vadd.f32 %v5365_v6, %v6432_v3 }
 0x28e   : > { %v1082_v18 = vpop.permute.xlu0 %1081 }
 0x28f   : > { %v1166_v21 = vcombine.high %v1082_v18, %v6042_v46  ;;  %v1173_v22 = vrot.slane %v1082_v18, %v6440_v15 }
 0x290   : > { %v1080_v28 = vpop.permute.xlu1 %1079 }
 0x291   : > { %v1180_v25 = vrot.slane %v1166_v21, %v6440_v15  ;;  %v1181_v26 = vcombine.low %v1158_v19, %v1173_v22  ;;  %v1182_v27 = vcombine.high %v1158_v19, %v1173_v22  ;;  %v1100_v30 = vcombine.high %v1080_v28, %v6042_v46 }
 0x292   : > { %v1107_v31 = vrot.slane %v1080_v28, %v6440_v15 }
 0x293   : > { %v1189_v4 = vrot.slane %v1181_v26, %v6445_v20  ;;  %v1196_v32 = vrot.slane %v1182_v27, %v6445_v20  ;;  %v1197_v33 = vcombine.low %v1165_v23, %v1180_v25  ;;  %v1198_v5 = vcombine.high %v1165_v23, %v1180_v25 }
 0x294   : > { %v1114_v35 = vrot.slane %v1100_v30, %v6440_v15  ;;  %v1115_v36 = vcombine.low %v1092_v1, %v1107_v31  ;;  %v1116_v37 = vcombine.high %v1092_v1, %v1107_v31  ;;  %v1560_v47 = vpop.permute.xlu1 %1559 }
 0x295   : > { %v1205_v38 = vrot.slane %v1197_v33, %v6445_v20  ;;  %v1212_v39 = vrot.slane %v1198_v5, %v6445_v20  ;;  %v1267_v40 = vcombine.low %v1189_v4, %v1196_v32  ;;  %v4996_v41 = vcombine.high %v1189_v4, %v1196_v32 }
 0x296   : > { %v1123_v42 = vrot.slane %v1115_v36, %v6445_v20  ;;  %v1130_v43 = vrot.slane %v1116_v37, %v6445_v20  ;;  %v1131_v44 = vcombine.low %v1099_v34, %v1114_v35  ;;  %v1132_v45 = vcombine.high %v1099_v34, %v1114_v35 }
 0x297   : > { %v1274_v49 = vrot.slane %v1267_v40, %v6440_v15  ;;  %v1282_v50 = vrot.slane %v4996_v41, %v6440_v15  ;;  %v1283_v52 = vcombine.low %v1205_v38, %v1212_v39  ;;  %v4997_v53 = vcombine.high %v1205_v38, %v1212_v39 }
 0x298   : > { %v1139_v54 = vrot.slane %v1131_v44, %v6445_v20  ;;  %v1146_v55 = vrot.slane %v1132_v45, %v6445_v20  ;;  %v1217_v56 = vcombine.low %v1123_v42, %v1130_v43  ;;  %v4994_v57 = vcombine.high %v1123_v42, %v1130_v43 }
 0x299   : > { %v1290_v59 = vrot.slane %v1283_v52, %v6440_v15  ;;  %v1298_v61 = vrot.slane %v4997_v53, %v6440_v15  ;;  %v1299_v6 = vcombine.low %v1274_v49, %v1282_v50  ;;  %v1580_v8 = vcombine.high %v1560_v47, %v6042_v46  ;;  %v6519_v53 = vpop.f32.mrf.mxu1 }
 0x29a   : > { %v1224_v9 = vrot.slane %v1217_v56, %v6440_v15  ;;  %v1232_v10 = vrot.slane %v4994_v57, %v6440_v15  ;;  %v1233_v11 = vcombine.low %v1139_v54, %v1146_v55  ;;  %v4995_v13 = vcombine.high %v1139_v54, %v1146_v55 }
 0x29b   : > { %v1307_v16 = vcombine.low %v1290_v59, %v1298_v61  ;;  %v1587_v17 = vrot.slane %v1560_v47, %v6440_v15  ;;  %v1594_v18 = vrot.slane %v1580_v8, %v6440_v15  ;;  %v1306_v26 = vrot.slane %v1299_v6, %v6445_v20 }
 0x29c   : > { %v1240_v19 = vrot.slane %v1233_v11, %v6440_v15  ;;  %v1248_v21 = vrot.slane %v4995_v13, %v6440_v15  ;;  %v1249_v27 = vcombine.low %v1224_v9, %v1232_v10  ;;  %v1064_v6 = vadd.f32 %v6425_v63, %v6432_v3 }
 0x29d   : > { %v1595_v22 = vcombine.low %v1572_v29, %v1587_v17  ;;  %v1596_v23 = vcombine.high %v1572_v29, %v1587_v17  ;;  %v1611_v24 = vcombine.low %v1579_v14, %v1594_v18  ;;  %v1612_v25 = vcombine.high %v1579_v14, %v1594_v18 }
 0x29e   : > { %v1257_v28 = vcombine.low %v1240_v19, %v1248_v21  ;;  %v1314_v0 = vrot.slane %v1307_v16, %v6445_v20  ;;  %v1256_v36 = vrot.slane %v1249_v27, %v6445_v20  ;;  %v1391_v10 = vcombine.high %v1064_v6, %v6042_v46 }
 0x29f   : > { %v1603_v1 = vrot.slane %v1595_v22, %v6445_v20  ;;  %v1610_v30 = vrot.slane %v1596_v23, %v6445_v20  ;;  %v1619_v31 = vrot.slane %v1611_v24, %v6445_v20  ;;  %v1626_v4 = vrot.slane %v1612_v25, %v6445_v20 }
 0x2a0   : > { %v6485_v32 = vcombine.low %v1306_v26, %v1314_v0  ;;  %v1264_v29 = vrot.slane %v1257_v28, %v6445_v20  ;;  %v6503_v49 = vcombine.high %v1306_v26, %v1314_v0  ;;  %v1398_v14 = vrot.slane %v1064_v6, %v6440_v15 }
 0x2a1   : > { %v1697_v33 = vcombine.low %v1603_v1, %v1610_v30  ;;  %v5002_v5 = vcombine.high %v1603_v1, %v1610_v30  ;;  %v1713_v34 = vcombine.low %v1619_v31, %v1626_v4  ;;  %v5003_v35 = vcombine.high %v1619_v31, %v1626_v4 }
 0x2a2   : > { %5367 = vmatpush3.xpose.msk.msra.mxu1 %vm1797_vm1, %v6485_v32  ;;  %v6496_v41 = vcombine.low %v1256_v36, %v1264_v29  ;;  %v6511_v50 = vcombine.high %v1256_v36, %v1264_v29  ;;  %v1405_v63 = vrot.slane %v1391_v10, %v6440_v15 }
 0x2a3   : > { %v1704_v37 = vrot.slane %v1697_v33, %v6440_v15  ;;  %v1712_v38 = vrot.slane %v5002_v5, %v6440_v15  ;;  %v1720_v39 = vrot.slane %v1713_v34, %v6440_v15  ;;  %v1728_v40 = vrot.slane %v5003_v35, %v6440_v15  ;;  %5368 = vmatprep.subr.mxu1 %v6042_v46 }
 0x2a5   : > { %v1729_v42 = vcombine.low %v1704_v37, %v1712_v38  ;;  %v1737_v43 = vcombine.low %v1720_v39, %v1728_v40 }
 0x2a6   : > { %5369 = vmatpush3.xpose.msk.msra.mxu1 %vm1797_vm1, %v6496_v41 }
 0x2a7   : > { %v1736_v44 = vrot.slane %v1729_v42, %v6445_v20  ;;  %v1744_v45 = vrot.slane %v1737_v43, %v6445_v20  ;;  %5373 = vmatprep.subr.mxu1 %v6042_v46 }
 0x2a9   : > { %v1745_v47 = vcombine.low %v1736_v44, %v1744_v45  ;;  %v1746_v52 = vcombine.high %v1736_v44, %v1744_v45 }
 0x2ab   : > { %5371 = vmatmul.mubr.msk.f32.vlgmr.msra.gmra.mxu1 %vm1797_vm1, %v1745_v47 }
 0x2ac   : > { %5374 = vmatpush3.xpose.msk.msra.mxu1 %vm1797_vm1, %v6503_v49  ;;  %5377 = vmatprep.mubr.msk.f32.mxu1 %vm6044_vm0, %v6042_v46 }
 0x2ad   : > { %5375 = vmatprep.subr.mxu1 %v6042_v46 }
 0x2b0   : > { %5376 = vmatpush3.xpose.msk.msra.mxu1 %vm1797_vm1, %v6511_v50 }
 0x2b1   : > { %5380 = vmatprep.subr.mxu1 %v6042_v46 }
 0x2b3   : > { %5378 = vmatmul.mubr.msk.f32.vlgmr.msra.gmra.mxu1 %vm1797_vm1, %v1746_v52  ;;  %v1059_v52 = vadd.f32 %v6432_v3, %v6427_v2 }
 0x2b4   : > { %5384 = vmatprep.mubr.msk.f32.mxu1 %vm6044_vm0, %v6042_v46 }
 0x36b   : > { %v1873_v54 = vpop.f32.mrf.mxu1 }
 0x36c   : > { %v1957_v55 = vsel %vm1956_vm2, %v1873_v54, -inf }
 0x36d   : > { %1958 = vmax.xlane.f32.xlu1 %v1957_v55  ;;  %v5372_v56 = vpop.f32.mrf.mxu1 }
 0x373   : > { %v1952_v57 = vpop.f32.mrf.mxu1 }
 0x374   : > { %v1960_v59 = vsel %vm1956_vm2, %v1952_v57, -inf }
 0x375   : > { %1961 = vmax.xlane.f32.xlu0 %v1960_v59  ;;  %v5379_v61 = vpop.f32.mrf.mxu1  ;;  %v1325_v59 = vcombine.high %v1059_v52, %v6042_v46 }
 0x376   : > { %v1631_v61 = vcombine.high %v6407_v51, %v6042_v46 }
 0x37e   : > { %1321 = vrot.lane.b32.xlu1 %v1064_v6, %s6043_s9 }
 0x382   : > { %1561 = vrot.lane.b32.xlu1 %v6407_v51, %s6043_s9 }
 0x3f6   : > { %v1959_v8 = vpop.xlane.xlu1 %1958 }
 0x3f7   : > { %v1963_v9 = vsub.f32 %v1873_v54, %v1959_v8  ;;  %v1332_v8 = vrot.slane %v1059_v52, %v6440_v15 }
 0x3f9   : > { %v1965_v11 = vmul.f32 1.442695, %v1963_v9 }
 0x3fa   : > { %v1322_v13 = vpop.permute.xlu1 %1321 }
 0x3fb   : > { %5662 = vpow2.f32 %v1965_v11  ;;  %v1406_v16 = vcombine.high %v1322_v13, %v6042_v46  ;;  %v1413_v17 = vrot.slane %v1322_v13, %v6440_v15  ;;  %v1339_v11 = vrot.slane %v1325_v59, %v6440_v15 }
 0x3fd   : > { %v1420_v18 = vrot.slane %v1406_v16, %v6440_v15  ;;  %v1421_v19 = vcombine.low %v1398_v14, %v1413_v17  ;;  %v1422_v21 = vcombine.high %v1398_v14, %v1413_v17  ;;  %v1645_v17 = vrot.slane %v1631_v61, %v6440_v15 }
 0x3fe   : > { %v1962_v22 = vpop.xlane.xlu0 %1961  ;;  %v1562_v55 = vpop.permute.xlu1 %1561 }
 0x3ff   : > { %v1429_v23 = vrot.slane %v1421_v19, %v6445_v20  ;;  %v1436_v24 = vrot.slane %v1422_v21, %v6445_v20  ;;  %v1437_v25 = vcombine.low %v1405_v63, %v1420_v18  ;;  %v1438_v26 = vcombine.high %v1405_v63, %v1420_v18 }
 0x400   : > { %v1964_v27 = vsub.f32 %v1952_v57, %v1962_v22  ;;  %v1646_v57 = vcombine.high %v1562_v55, %v6042_v46  ;;  %v1653_v63 = vrot.slane %v1562_v55, %v6440_v15 }
 0x401   : > { %v1445_v28 = vrot.slane %v1437_v25, %v6445_v20  ;;  %v1452_v0 = vrot.slane %v1438_v26, %v6445_v20  ;;  %v1507_v1 = vcombine.low %v1429_v23, %v1436_v24  ;;  %v5000_v30 = vcombine.high %v1429_v23, %v1436_v24 }
 0x402   : > { %v1967_v31 = vmul.f32 1.442695, %v1964_v27  ;;  %v1660_v2 = vrot.slane %v1646_v57, %v6440_v15  ;;  %v1638_v23 = vrot.slane %v6407_v51, %v6440_v15 }
 0x403   : > { %v1514_v4 = vrot.slane %v1507_v1, %v6440_v15  ;;  %v1522_v29 = vrot.slane %v5000_v30, %v6440_v15  ;;  %v1523_v33 = vcombine.low %v1445_v28, %v1452_v0  ;;  %v5001_v5 = vcombine.high %v1445_v28, %v1452_v0 }
 0x404   : > { %5664 = vpow2.f32 %v1967_v31  ;;  %v1677_v24 = vcombine.low %v1645_v17, %v1660_v2  ;;  %v1678_v25 = vcombine.high %v1645_v17, %v1660_v2  ;;  %v1661_v1 = vcombine.low %v1638_v23, %v1653_v63 }
 0x405   : > { %v1530_v34 = vrot.slane %v1523_v33, %v6440_v15  ;;  %v1538_v35 = vrot.slane %v5001_v5, %v6440_v15  ;;  %v1539_v36 = vcombine.low %v1514_v4, %v1522_v29  ;;  %v1662_v30 = vcombine.high %v1638_v23, %v1653_v63 }
 0x406   : > { %v1685_v5 = vrot.slane %v1677_v24, %v6445_v20  ;;  %v1692_v51 = vrot.slane %v1678_v25, %v6445_v20 }
 0x407   : > { %v1547_v37 = vcombine.low %v1530_v34, %v1538_v35  ;;  %v1546_v40 = vrot.slane %v1539_v36, %v6445_v20 }
 0x408   : > { %v6542_v38 = vpop.eup %5662 }
 0x409   : > { %v1969_v39 = vsel %vm1956_vm2, %v6542_v38, 0.0  ;;  %v1554_v42 = vrot.slane %v1547_v37, %v6445_v20  ;;  %v1669_v37 = vrot.slane %v1661_v1, %v6445_v20 }
 0x40a   : > { %1970 = vadd.xlane.f32.xlu0 %v1969_v39  ;;  %v1676_v39 = vrot.slane %v1662_v30, %v6445_v20 }
 0x40b   : > { %v6548_v43 = vcombine.low %v1546_v40, %v1554_v42  ;;  %v6550_v44 = vcombine.high %v1546_v40, %v1554_v42  ;;  %v1763_v42 = vcombine.low %v1685_v5, %v1692_v51 }
 0x40c   : > { %v5004_v57 = vcombine.high %v1669_v37, %v1676_v39 }
 0x40d   : > { %5381 = vmatpush3.msra.mxu1 %v6548_v43  ;;  %v1770_v61 = vrot.slane %v1763_v42, %v6440_v15 }
 0x40e   : > { %5382 = vmatprep.subr.mxu1 %v6042_v46  ;;  %v1762_v2 = vrot.slane %v5004_v57, %v6440_v15 }
 0x411   : > { %v6554_v45 = vpop.eup %5664 }
 0x412   : > { %v1972_v47 = vsel %vm1956_vm2, %v6554_v45, 0.0 }
 0x413   : > { %1973 = vadd.xlane.f32.xlu0 %v1972_v47  ;;  %v5005_v47 = vcombine.high %v1685_v5, %v1692_v51 }
 0x429   : > { %1319 = vrot.lane.b32.xlu0 %v1059_v52, %s6043_s9 }
 0x493   : > { %v1971_v54 = vpop.xlane.xlu0 %1970 }
 0x494   : > { %5666 = vrcp.f32 %v1971_v54 }
 0x49c   : > { %v1974_v56 = vpop.xlane.xlu0 %1973 }
 0x49d   : > { %5668 = vrcp.f32 %v1974_v56  ;;  %v1747_v56 = vcombine.low %v1669_v37, %v1676_v39 }
 0x4a0   : > { %v1320_v6 = vpop.permute.xlu0 %1319 }
 0x4a1   : > { %v1340_v9 = vcombine.high %v1320_v6, %v6042_v46  ;;  %v1347_v10 = vrot.slane %v1320_v6, %v6440_v15  ;;  %v5667_v52 = vpop.eup %5666  ;;  %v1778_v6 = vrot.slane %v5005_v47, %v6440_v15 }
 0x4a3   : > { %v1354_v13 = vrot.slane %v1340_v9, %v6440_v15  ;;  %v1355_v14 = vcombine.low %v1332_v8, %v1347_v10  ;;  %v1356_v16 = vcombine.high %v1332_v8, %v1347_v10  ;;  %v1976_v8 = vmul.f32 %v5667_v52, %v6542_v38 }
 0x4a4   : > { %v1754_v10 = vrot.slane %v1747_v56, %v6440_v15 }
 0x4a5   : > { %v1363_v18 = vrot.slane %v1355_v14, %v6445_v20  ;;  %v1370_v19 = vrot.slane %v1356_v16, %v6445_v20  ;;  %v1371_v21 = vcombine.low %v1339_v11, %v1354_v13  ;;  %v1372_v22 = vcombine.high %v1339_v11, %v1354_v13 }
 0x4a6   : > { %v1787_v13 = vcombine.low %v1770_v61, %v1778_v6  ;;  %v1779_v14 = vcombine.low %v1754_v10, %v1762_v2  ;;  %v961_v61 = vadd.f32 %v6405_v48, %v6519_v53 }
 0x4a7   : > { %v1379_v26 = vrot.slane %v1371_v21, %v6445_v20  ;;  %v1386_v27 = vrot.slane %v1372_v22, %v6445_v20  ;;  %v1457_v28 = vcombine.low %v1363_v18, %v1370_v19  ;;  %v4998_v0 = vcombine.high %v1363_v18, %v1370_v19 }
 0x4a8   : > { %v1794_v16 = vrot.slane %v1787_v13, %v6445_v20  ;;  %v1786_v17 = vrot.slane %v1779_v14, %v6445_v20 }
 0x4a9   : > { %v1464_v31 = vrot.slane %v1457_v28, %v6440_v15  ;;  %v1472_v4 = vrot.slane %v4998_v0, %v6440_v15  ;;  %v1473_v29 = vcombine.low %v1379_v26, %v1386_v27  ;;  %v4999_v33 = vcombine.high %v1379_v26, %v1386_v27 }
 0x4aa   : > { %v5669_v9 = vpop.eup %5668 }
 0x4ab   : > { %v1480_v34 = vrot.slane %v1473_v29, %v6440_v15  ;;  %v1488_v35 = vrot.slane %v4999_v33, %v6440_v15  ;;  %v1489_v36 = vcombine.low %v1464_v31, %v1472_v4  ;;  %v1978_v38 = vmul.f32 %v5669_v9, %v6554_v45 }
 0x4ac   : > { %v1795_v45 = vcombine.low %v1786_v17, %v1794_v16 }
 0x4ad   : > { %v1497_v40 = vcombine.low %v1480_v34, %v1488_v35  ;;  %v1496_v54 = vrot.slane %v1489_v36, %v6445_v20 }
 0x4af   : > { %v1504_v55 = vrot.slane %v1497_v40, %v6445_v20 }
 0x4b1   : > { %v1505_v59 = vcombine.low %v1496_v54, %v1504_v55  ;;  %v6597_v11 = vcombine.high %v1496_v54, %v1504_v55 }
 0x4b3   : > { %5383 = vmatpush3.msra.mxu1 %v1505_v59 }
 0x4b4   : > { %5385 = vmatmul.mubr.msk.f32.vlgmr.msra.gmra.mxu1 %vm1956_vm2, %v1976_v8  ;;  %5387 = vmatprep.subr.mxu1 %v6042_v46 }
 0x4b5   : > { %5388 = vmatpush3.msra.mxu1 %v6550_v44  ;;  %5391 = vmatprep.mubr.msk.f32.mxu1 %vm6044_vm0, %v6042_v46 }
 0x4b6   : > { %5389 = vmatprep.subr.mxu1 %v6042_v46 }
 0x4b7   : > { %5390 = vmatpush3.msra.mxu1 %v6597_v11 }
 0x4b8   : > { %5392 = vmatmul.mubr.msk.f32.vlgmr.msra.gmra.mxu1 %vm1956_vm2, %v1978_v38  ;;  %5394 = vmatprep.subr.mxu1 %v6042_v46 }
 0x4b9   : > { %5395 = vmatpush3.xpose.msk.msra.mxu1 %vm1797_vm1, %v6485_v32  ;;  %5398 = vmatprep.mubr.msk.f32.mxu1 %vm6044_vm0, %v6042_v46  ;;  %v1796_v32 = vcombine.high %v1786_v17, %v1794_v16 }
 0x4ba   : > { %5396 = vmatprep.subr.mxu1 %v6042_v46 }
 0x4bd   : > { %5397 = vmatpush3.xpose.msk.msra.mxu1 %vm1797_vm1, %v6496_v41 }
 0x4be   : > { %5401 = vmatprep.subr.mxu1 %v6042_v46 }
 0x4c0   : > { %5399 = vmatmul.mubr.msk.f32.vlgmr.msra.gmra.mxu1 %vm1797_vm1, %v1795_v45  ;;  %v2691_v45 = vcombine.high %v961_v61, %v6042_v46 }
 0x4c1   : > { %5402 = vmatpush3.xpose.msk.msra.mxu1 %vm1797_vm1, %v6503_v49  ;;  %5405 = vmatprep.mubr.msk.f32.mxu1 %vm6044_vm0, %v6042_v46 }
 0x4c2   : > { %5403 = vmatprep.subr.mxu1 %v6042_v46 }
 0x4c5   : > { %5404 = vmatpush3.xpose.msk.msra.mxu1 %vm1797_vm1, %v6511_v50 }
 0x4c6   : > { %5408 = vmatprep.subr.mxu1 %v6042_v46 }
 0x4c8   : > { %5406 = vmatmul.mubr.msk.f32.vlgmr.msra.gmra.mxu1 %vm1797_vm1, %v1796_v32 }
 0x4c9   : > { %5409 = vmatpush3.msra.mxu1 %v6548_v43  ;;  %5412 = vmatprep.mubr.msk.f32.mxu1 %vm6044_vm0, %v6042_v46 }
 0x4ca   : > { %5410 = vmatprep.subr.mxu1 %v6042_v46 }
 0x4cb   : > { %5411 = vmatpush3.msra.mxu1 %v1505_v59 }
 0x4cc   : > { %5415 = vmatprep.subr.mxu1 %v6042_v46 }
 0x574   : > { %v2048_v41 = vpop.f32.mrf.mxu1 }
 0x575   : > { %v2125_v63 = vcombine.high %v2048_v41, %v6042_v46  ;;  %v2132_v18 = vrot.slane %v2048_v41, %v6440_v15  ;;  %v2698_v41 = vrot.slane %v961_v61, %v6440_v15 }
 0x576   : > { %v5386_v49 = vpop.f32.mrf.mxu1 }
 0x577   : > { %v2139_v22 = vrot.slane %v2125_v63, %v6440_v15  ;;  %v2705_v63 = vrot.slane %v2691_v45, %v6440_v15 }
 0x578   : > { %v2121_v50 = vpop.f32.mrf.mxu1 }
 0x579   : > { %v2140_v19 = vcombine.high %v2121_v50, %v6042_v46  ;;  %v2147_v21 = vrot.slane %v2121_v50, %v6440_v15 }
 0x57a   : > { %v5393_v43 = vpop.f32.mrf.mxu1 }
 0x57b   : > { %v2154_v23 = vrot.slane %v2140_v19, %v6440_v15  ;;  %v2155_v24 = vcombine.low %v2132_v18, %v2147_v21  ;;  %v2156_v25 = vcombine.high %v2132_v18, %v2147_v21 }
 0x57d   : > { %v2163_v26 = vrot.slane %v2155_v24, %v6445_v20  ;;  %v2170_v27 = vrot.slane %v2156_v25, %v6445_v20  ;;  %v2171_v28 = vcombine.low %v2139_v22, %v2154_v23  ;;  %v2172_v0 = vcombine.high %v2139_v22, %v2154_v23 }
 0x57e   : > { %v2757_v24 = vcombine.high %v6423_v62, %v6042_v46 }
 0x57f   : > { %v2179_v1 = vrot.slane %v2171_v28, %v6445_v20  ;;  %v2186_v30 = vrot.slane %v2172_v0, %v6445_v20  ;;  %v2191_v31 = vcombine.low %v2163_v26, %v2170_v27  ;;  %v5014_v4 = vcombine.high %v2163_v26, %v2170_v27 }
 0x580   : > { %v2316_v29 = vpop.f32.mrf.mxu1  ;;  %v2764_v28 = vrot.slane %v6423_v62, %v6440_v15 }
 0x581   : > { %v2198_v33 = vrot.slane %v2191_v31, %v6440_v15  ;;  %v2206_v5 = vrot.slane %v5014_v4, %v6440_v15  ;;  %v2207_v51 = vcombine.low %v2179_v1, %v2186_v30  ;;  %v5015_v34 = vcombine.high %v2179_v1, %v2186_v30 }
 0x582   : > { %v2393_v35 = vsel %vm1956_vm2, %v2316_v29, -inf  ;;  %v5400_v36 = vpop.f32.mrf.mxu1  ;;  %v3171_v30 = vcombine.high %v6416_v60, %v6042_v46  ;;  %v2771_v4 = vrot.slane %v2757_v24, %v6440_v15 }
 0x583   : > { %v2214_v37 = vrot.slane %v2207_v51, %v6440_v15  ;;  %v2222_v39 = vrot.slane %v5015_v34, %v6440_v15  ;;  %2394 = vmax.xlane.f32.xlu1 %v2393_v35  ;;  %v2223_v40 = vcombine.low %v2198_v33, %v2206_v5 }
 0x585   : > { %v2231_v42 = vcombine.low %v2214_v37, %v2222_v39  ;;  %v6647_v47 = vrot.slane %v2223_v40, %v6445_v20  ;;  %v3178_v40 = vrot.slane %v6416_v60, %v6440_v15 }
 0x587   : > { %v6650_v52 = vrot.slane %v2231_v42, %v6445_v20  ;;  %v3185_v42 = vrot.slane %v3171_v30, %v6440_v15 }
 0x588   : > { %v2389_v54 = vpop.f32.mrf.mxu1 }
 0x589   : > { %v2396_v55 = vsel %vm1956_vm2, %v2389_v54, -inf  ;;  %v2240_v56 = vcombine.high %v6647_v47, %v6650_v52  ;;  %v2239_v57 = vcombine.low %v6647_v47, %v6650_v52  ;;  %v4300_v47 = vld [vmem:[#allocation12 + $0x48] sm:$0xff]  ;;  %v4299_v52 = vld [vmem:[#allocation12 + $0x40] sm:$0xff] }
 0x58a   : > { %2397 = vmax.xlane.f32.xlu0 %v2396_v55  ;;  %v5407_v59 = vpop.f32.mrf.mxu1 }
 0x594   : > { %2685 = vrot.lane.b32.xlu1 %v961_v61, %s6043_s9 }
 0x60c   : > { %v2395_v6 = vpop.xlane.xlu1 %2394 }
 0x60d   : > { %v2399_v8 = vsub.f32 %v2316_v29, %v2395_v6 }
 0x60f   : > { %v2401_v9 = vmul.f32 1.442695, %v2399_v8 }
 0x610   : > { %v2686_v53 = vpop.permute.xlu1 %2685 }
 0x611   : > { %5670 = vpow2.f32 %v2401_v9  ;;  %v2706_v17 = vcombine.high %v2686_v53, %v6042_v46  ;;  %v2713_v32 = vrot.slane %v2686_v53, %v6440_v15 }
 0x613   : > { %v2398_v10 = vpop.xlane.xlu0 %2397  ;;  %v2720_v49 = vrot.slane %v2706_v17, %v6440_v15  ;;  %v2721_v50 = vcombine.low %v2698_v41, %v2713_v32  ;;  %v2722_v18 = vcombine.high %v2698_v41, %v2713_v32 }
 0x614   : > { %v2400_v2 = vsub.f32 %v2389_v54, %v2398_v10 }
 0x615   : > { %v2737_v19 = vcombine.low %v2705_v63, %v2720_v49  ;;  %v2738_v21 = vcombine.high %v2705_v63, %v2720_v49  ;;  %v2729_v22 = vrot.slane %v2721_v50, %v6445_v20  ;;  %v2736_v23 = vrot.slane %v2722_v18, %v6445_v20 }
 0x616   : > { %v2403_v13 = vmul.f32 1.442695, %v2400_v2 }
 0x617   : > { %v2745_v25 = vrot.slane %v2737_v19, %v6445_v20  ;;  %v2752_v26 = vrot.slane %v2738_v21, %v6445_v20  ;;  %v2823_v31 = vcombine.low %v2729_v22, %v2736_v23  ;;  %v5026_v55 = vcombine.high %v2729_v22, %v2736_v23 }
 0x618   : > { %5672 = vpow2.f32 %v2403_v13 }
 0x619   : > { %v2839_v34 = vcombine.low %v2745_v25, %v2752_v26  ;;  %v5027_v35 = vcombine.high %v2745_v25, %v2752_v26  ;;  %v2830_v54 = vrot.slane %v2823_v31, %v6440_v15  ;;  %v2838_v32 = vrot.slane %v5026_v55, %v6440_v15 }
 0x61b   : > { %v2846_v10 = vrot.slane %v2839_v34, %v6440_v15  ;;  %v2854_v2 = vrot.slane %v5027_v35, %v6440_v15  ;;  %v2855_v30 = vcombine.low %v2830_v54, %v2838_v32  ;;  %v1068_v32 = vpop.f32.mrf.mxu0 }
 0x61d   : > { %v2863_v25 = vcombine.low %v2846_v10, %v2854_v2 }
 0x61e   : > { %v6660_v38 = vpop.eup %5670 }
 0x61f   : > { %v2405_v14 = vsel %vm1956_vm2, %v6660_v38, 0.0  ;;  %v2870_v34 = vrot.slane %v2863_v25, %v6445_v20 }
 0x620   : > { %2406 = vadd.xlane.f32.xlu0 %v2405_v14 }
 0x625   : > { %v6664_v16 = vpop.eup %5672 }
 0x626   : > { %v2408_v48 = vsel %vm1956_vm2, %v6664_v16, 0.0 }
 0x627   : > { %2409 = vadd.xlane.f32.xlu1 %v2408_v48 }
 0x636   : > { %2687 = vrot.lane.b32.xlu0 %v6423_v62, %s6043_s9 }
 0x638   : > { %3165 = vrot.lane.b32.xlu1 %v6416_v60, %s6043_s9 }
 0x6a9   : > { %v2407_v43 = vpop.xlane.xlu0 %2406 }
 0x6aa   : > { %5674 = vrcp.f32 %v2407_v43 }
 0x6ad   : > { %v2688_v27 = vpop.permute.xlu0 %2687 }
 0x6ae   : > { %v2772_v0 = vcombine.high %v2688_v27, %v6042_v46  ;;  %v2779_v1 = vrot.slane %v2688_v27, %v6440_v15 }
 0x6b0   : > { %v2786_v29 = vrot.slane %v2772_v0, %v6440_v15  ;;  %v2787_v33 = vcombine.low %v2764_v28, %v2779_v1  ;;  %v2788_v5 = vcombine.high %v2764_v28, %v2779_v1  ;;  %v2410_v51 = vpop.xlane.xlu1 %2409 }
 0x6b1   : > { %5676 = vrcp.f32 %v2410_v51 }
 0x6b2   : > { %v2795_v62 = vrot.slane %v2787_v33, %v6445_v20  ;;  %v2802_v36 = vrot.slane %v2788_v5, %v6445_v20  ;;  %v2803_v37 = vcombine.low %v2771_v4, %v2786_v29  ;;  %v2804_v39 = vcombine.high %v2771_v4, %v2786_v29 }
 0x6b4   : > { %v2811_v59 = vrot.slane %v2803_v37, %v6445_v20  ;;  %v2818_v61 = vrot.slane %v2804_v39, %v6445_v20  ;;  %v2873_v6 = vcombine.low %v2795_v62, %v2802_v36  ;;  %v5028_v8 = vcombine.high %v2795_v62, %v2802_v36  ;;  %v3166_v9 = vpop.permute.xlu1 %3165 }
 0x6b5   : > { %v3186_v13 = vcombine.high %v3166_v9, %v6042_v46  ;;  %v3193_v60 = vrot.slane %v3166_v9, %v6440_v15  ;;  %v2862_v39 = vrot.slane %v2855_v30, %v6445_v20 }
 0x6b6   : > { %v2880_v14 = vrot.slane %v2873_v6, %v6440_v15  ;;  %v2888_v48 = vrot.slane %v5028_v8, %v6440_v15  ;;  %v2889_v53 = vcombine.low %v2811_v59, %v2818_v61  ;;  %v5029_v17 = vcombine.high %v2811_v59, %v2818_v61 }
 0x6b7   : > { %v5675_v45 = vpop.eup %5674  ;;  %v3200_v41 = vrot.slane %v3186_v13, %v6440_v15  ;;  %v3201_v49 = vcombine.low %v3178_v40, %v3193_v60  ;;  %v3202_v63 = vcombine.high %v3178_v40, %v3193_v60  ;;  %v6750_v55 = vcombine.high %v2862_v39, %v2870_v34 }
 0x6b8   : > { %v2896_v50 = vrot.slane %v2889_v53, %v6440_v15  ;;  %v2904_v18 = vrot.slane %v5029_v17, %v6440_v15  ;;  %v2905_v19 = vcombine.low %v2880_v14, %v2888_v48  ;;  %v2412_v21 = vmul.f32 %v5675_v45, %v6660_v38 }
 0x6b9   : > { %v3209_v43 = vrot.slane %v3201_v49, %v6445_v20  ;;  %v3216_v22 = vrot.slane %v3202_v63, %v6445_v20  ;;  %v3217_v23 = vcombine.low %v3185_v42, %v3200_v41  ;;  %v3218_v24 = vcombine.high %v3185_v42, %v3200_v41 }
 0x6ba   : > { %v2913_v26 = vcombine.low %v2896_v50, %v2904_v18  ;;  %5413 = vmatmul.mubr.msk.f32.vlgmr.msra.gmra.mxu1 %vm1956_vm2, %v2412_v21  ;;  %v2912_v38 = vrot.slane %v2905_v19, %v6445_v20  ;;  %v6741_v42 = vcombine.low %v2862_v39, %v2870_v34 }
 0x6bb   : > { %v3225_v27 = vrot.slane %v3217_v23, %v6445_v20  ;;  %v3232_v28 = vrot.slane %v3218_v24, %v6445_v20  ;;  %v3303_v0 = vcombine.low %v3209_v43, %v3216_v22  ;;  %v5034_v1 = vcombine.high %v3209_v43, %v3216_v22  ;;  %5416 = vmatpush3.msra.mxu1 %v6550_v44 }
 0x6bc   : > { %5417 = vmatprep.subr.mxu1 %v6042_v46  ;;  %v2920_v31 = vrot.slane %v2913_v26, %v6445_v20  ;;  %5419 = vmatprep.mubr.msk.f32.mxu1 %vm6044_vm0, %v6042_v46 }
 0x6bd   : > { %v3310_v4 = vrot.slane %v3303_v0, %v6440_v15  ;;  %v3318_v29 = vrot.slane %v5034_v1, %v6440_v15  ;;  %v3319_v33 = vcombine.low %v3225_v27, %v3232_v28  ;;  %v5035_v5 = vcombine.high %v3225_v27, %v3232_v28  ;;  %5418 = vmatpush3.msra.mxu1 %v6597_v11 }
 0x6be   : > { %v5677_v51 = vpop.eup %5676  ;;  %v6725_v44 = vcombine.low %v2912_v38, %v2920_v31  ;;  %5429 = vmatprep.subr.mxu1 %v6042_v46  ;;  %v6735_v11 = vcombine.high %v2912_v38, %v2920_v31 }
 0x6bf   : > { %v3326_v35 = vrot.slane %v3319_v33, %v6440_v15  ;;  %v3334_v62 = vrot.slane %v5035_v5, %v6440_v15  ;;  %v3335_v36 = vcombine.low %v3310_v4, %v3318_v29  ;;  %v2414_v37 = vmul.f32 %v5677_v51, %v6664_v16 }
 0x6c0   : > { %5423 = vmatpush3.xpose.msk.msra.mxu0 %vm1797_vm1, %v6725_v44 }
 0x6c1   : > { %v3343_v40 = vcombine.low %v3326_v35, %v3334_v62  ;;  %5420 = vmatmul.mubr.msk.f32.vlgmr.msra.gmra.mxu1 %vm1956_vm2, %v2414_v37  ;;  %5424 = vmatprep.subr.mxu0 %v6042_v46  ;;  %v3342_v16 = vrot.slane %v3335_v36, %v6445_v20  ;;  %v1069_v35 = vadd.f32 %v6432_v3, %v1068_v32 }
 0x6c2   : > { %5430 = vmatpush3.xpose.msk.msra.mxu1 %vm1797_vm1, %v6735_v11  ;;  %5433 = vmatprep.mubr.msk.f32.mxu1 %vm6044_vm0, %v6042_v46 }
 0x6c3   : > { %v3350_v54 = vrot.slane %v3343_v40, %v6445_v20  ;;  %5431 = vmatprep.subr.mxu1 %v6042_v46 }
 0x6c4   : > { %5425 = vmatpush3.xpose.msk.msra.mxu0 %vm1797_vm1, %v6741_v42 }
 0x6c5   : > { %v3351_v59 = vcombine.low %v3342_v16, %v3350_v54  ;;  %v3352_v61 = vcombine.high %v3342_v16, %v3350_v54  ;;  %5436 = vmatprep.subr.mxu0 %v6042_v46  ;;  %v2931_v54 = vcombine.high %v1069_v35, %v6042_v46 }
 0x6c6   : > { %5432 = vmatpush3.xpose.msk.msra.mxu1 %vm1797_vm1, %v6750_v55 }
 0x6c7   : > { %5427 = vmatmul.mubr.msk.f32.vlgmr.msra.gmra.mxu0 %vm1797_vm1, %v3351_v59  ;;  %5443 = vmatprep.subr.mxu1 %v6042_v46 }
 0x6c8   : > { %5440 = vmatprep.mubr.msk.f32.mxu0 %vm6044_vm0, %v6042_v46 }
 0x6c9   : > { %5434 = vmatmul.mubr.msk.f32.vlgmr.msra.gmra.mxu1 %vm1797_vm1, %v3352_v61 }
 0x6ca   : > { %5447 = vmatprep.mubr.msk.f32.mxu1 %vm6044_vm0, %v6042_v46 }
 0x77a   : > { %v2484_v6 = vpop.f32.mrf.mxu1 }
 0x77b   : > { %v2561_v9 = vcombine.high %v2484_v6, %v6042_v46  ;;  %v2568_v2 = vrot.slane %v2484_v6, %v6440_v15  ;;  %v2945_v6 = vrot.slane %v2931_v54, %v6440_v15 }
 0x77c   : > { %v5414_v8 = vpop.f32.mrf.mxu1 }
 0x77d   : > { %v2575_v48 = vrot.slane %v2561_v9, %v6440_v15  ;;  %v2938_v8 = vrot.slane %v1069_v35, %v6440_v15 }
 0x781   : > { %v2557_v10 = vpop.f32.mrf.mxu1 }
 0x782   : > { %v2576_v13 = vcombine.high %v2557_v10, %v6042_v46  ;;  %v2583_v60 = vrot.slane %v2557_v10, %v6440_v15 }
 0x783   : > { %v5421_v14 = vpop.f32.mrf.mxu1 }
 0x784   : > { %v2590_v53 = vrot.slane %v2576_v13, %v6440_v15  ;;  %v2591_v17 = vcombine.low %v2568_v2, %v2583_v60  ;;  %v2592_v45 = vcombine.high %v2568_v2, %v2583_v60 }
 0x786   : > { %v2599_v41 = vrot.slane %v2591_v17, %v6445_v20  ;;  %v2606_v49 = vrot.slane %v2592_v45, %v6445_v20  ;;  %v2607_v63 = vcombine.low %v2575_v48, %v2590_v53  ;;  %v2608_v50 = vcombine.high %v2575_v48, %v2590_v53 }
 0x787   : > { %v6770_v18 = vpop.f32.mrf.mxu0  ;;  %v3237_v53 = vcombine.high %v6413_v58, %v6042_v46  ;;  %v2997_v17 = vcombine.high %v6435_v7, %v6042_v46 }
 0x788   : > { %v2615_v19 = vrot.slane %v2607_v63, %v6445_v20  ;;  %v2622_v21 = vrot.slane %v2608_v50, %v6445_v20  ;;  %v2627_v43 = vcombine.low %v2599_v41, %v2606_v49  ;;  %v5024_v22 = vcombine.high %v2599_v41, %v2606_v49 }
 0x789   : > { %v3557_v23 = vpop.f32.mrf.mxu1  ;;  %v5428_v24 = vpop.f32.mrf.mxu0  ;;  %v3561_v3 = vsel %vm1956_vm2, %v6770_v18, -inf  ;;  %v3244_v63 = vrot.slane %v6413_v58, %v6440_v15 }
 0x78a   : > { %v2634_v25 = vrot.slane %v2627_v43, %v6440_v15  ;;  %v2642_v26 = vrot.slane %v5024_v22, %v6440_v15  ;;  %v2643_v27 = vcombine.low %v2615_v19, %v2622_v21  ;;  %v5025_v28 = vcombine.high %v2615_v19, %v2622_v21 }
 0x78b   : > { %v3564_v0 = vsel %vm1956_vm2, %v3557_v23, -inf  ;;  %v5435_v1 = vpop.f32.mrf.mxu1  ;;  %v3251_v21 = vrot.slane %v3237_v53, %v6440_v15  ;;  %v3004_v43 = vrot.slane %v6435_v7, %v6440_v15  ;;  %v3011_v24 = vrot.slane %v2997_v17, %v6440_v15 }
 0x78c   : > { %v2650_v30 = vrot.slane %v2643_v27, %v6440_v15  ;;  %v2658_v38 = vrot.slane %v5025_v28, %v6440_v15  ;;  %3565 = vmax.xlane.f32.xlu1 %v3564_v0  ;;  %v2659_v31 = vcombine.low %v2634_v25, %v2642_v26 }
 0x78e   : > { %v2667_v4 = vcombine.low %v2650_v30, %v2658_v38  ;;  %v6780_v29 = vrot.slane %v2659_v31, %v6445_v20 }
 0x790   : > { %v6783_v33 = vrot.slane %v2667_v4, %v6445_v20 }
 0x792   : > { %v2676_v5 = vcombine.high %v6780_v29, %v6783_v33  ;;  %v2675_v51 = vcombine.low %v6780_v29, %v6783_v33 }
 0x794   : > { %v6792_v34 = vpack.i.bf16 %v2676_v5, %v2240_v56 }
 0x79d   : > { %2925 = vrot.lane.b32.xlu1 %v1069_v35, %s6043_s9 }
 0x7a1   : > { %3167 = vrot.lane.b32.xlu1 %v6413_v58, %s6043_s9 }
 0x815   : > { %v3566_v62 = vpop.xlane.xlu1 %3565 }
 0x816   : > { %v3568_v36 = vsub.f32 %v3557_v23, %v3566_v62 }
 0x818   : > { %v3571_v37 = vmul.f32 1.442695, %v3568_v36 }
 0x819   : > { %v2926_v56 = vpop.permute.xlu1 %2925 }
 0x81a   : > { %5678 = vpow2.f32 %v3571_v37  ;;  %v2946_v16 = vcombine.high %v2926_v56, %v6042_v46  ;;  %v2953_v61 = vrot.slane %v2926_v56, %v6440_v15 }
 0x81c   : > { %v2960_v59 = vrot.slane %v2946_v16, %v6440_v15  ;;  %v2961_v13 = vcombine.low %v2938_v8, %v2953_v61  ;;  %v2962_v60 = vcombine.high %v2938_v8, %v2953_v61 }
 0x81d   : > { %v3168_v9 = vpop.permute.xlu1 %3167 }
 0x81e   : > { %v2977_v10 = vcombine.low %v2945_v6, %v2960_v59  ;;  %v2978_v2 = vcombine.high %v2945_v6, %v2960_v59  ;;  %v3252_v14 = vcombine.high %v3168_v9, %v6042_v46  ;;  %v2969_v41 = vrot.slane %v2961_v13, %v6445_v20 }
 0x81f   : > { %v2976_v49 = vrot.slane %v2962_v60, %v6445_v20  ;;  %v3259_v27 = vrot.slane %v3168_v9, %v6440_v15 }
 0x820   : > { %v2985_v45 = vrot.slane %v2977_v10, %v6445_v20  ;;  %v2992_v32 = vrot.slane %v2978_v2, %v6445_v20  ;;  %v3266_v50 = vrot.slane %v3252_v14, %v6440_v15 }
 0x821   : > { %v3063_v28 = vcombine.low %v2969_v41, %v2976_v49  ;;  %v5030_v30 = vcombine.high %v2969_v41, %v2976_v49  ;;  %v3267_v37 = vcombine.low %v3244_v63, %v3259_v27 }
 0x822   : > { %v3079_v25 = vcombine.low %v2985_v45, %v2992_v32  ;;  %v5031_v26 = vcombine.high %v2985_v45, %v2992_v32  ;;  %v3283_v38 = vcombine.low %v3251_v21, %v3266_v50  ;;  %v3284_v31 = vcombine.high %v3251_v21, %v3266_v50 }
 0x823   : > { %v3070_v59 = vrot.slane %v3063_v28, %v6440_v15  ;;  %v3078_v61 = vrot.slane %v5030_v30, %v6440_v15  ;;  %v3275_v60 = vrot.slane %v3267_v37, %v6445_v20 }
 0x824   : > { %v3086_v62 = vrot.slane %v3079_v25, %v6440_v15  ;;  %v3094_v36 = vrot.slane %v5031_v26, %v6440_v15  ;;  %v3291_v6 = vrot.slane %v3283_v38, %v6445_v20  ;;  %v3298_v8 = vrot.slane %v3284_v31, %v6445_v20 }
 0x826   : > { %v3103_v45 = vcombine.low %v3086_v62, %v3094_v36  ;;  %v3369_v32 = vcombine.low %v3291_v6, %v3298_v8  ;;  %v5037_v41 = vcombine.high %v3291_v6, %v3298_v8 }
 0x827   : > { %v6798_v39 = vpop.eup %5678 }
 0x828   : > { %v3576_v40 = vsel %vm1956_vm2, %v6798_v39, 0.0 }
 0x829   : > { %3577 = vadd.xlane.f32.xlu0 %v3576_v40  ;;  %v3268_v40 = vcombine.high %v3244_v63, %v3259_v27  ;;  %v3095_v63 = vcombine.low %v3070_v59, %v3078_v61 }
 0x82b   : > { %v3282_v14 = vrot.slane %v3268_v40, %v6445_v20  ;;  %v3102_v28 = vrot.slane %v3095_v63, %v6445_v20 }
 0x82d   : > { %v3353_v50 = vcombine.low %v3275_v60, %v3282_v14 }
 0x83f   : > { %2927 = vrot.lane.b32.xlu0 %v6435_v7, %s6043_s9 }
 0x85e   : > { %3562 = vmax.xlane.f32.xlu0 %v3561_v3 }
 0x8b2   : > { %v3578_v48 = vpop.xlane.xlu0 %3577 }
 0x8b3   : > { %5680 = vrcp.f32 %v3578_v48 }
 0x8b6   : > { %v2928_v19 = vpop.permute.xlu0 %2927 }
 0x8b7   : > { %v3012_v22 = vcombine.high %v2928_v19, %v6042_v46  ;;  %v3019_v23 = vrot.slane %v2928_v19, %v6440_v15  ;;  %v5036_v19 = vcombine.high %v3275_v60, %v3282_v14 }
 0x8b9   : > { %v3026_v58 = vrot.slane %v3012_v22, %v6440_v15  ;;  %v3027_v0 = vcombine.low %v3004_v43, %v3019_v23  ;;  %v3028_v1 = vcombine.high %v3004_v43, %v3019_v23  ;;  %v3110_v22 = vrot.slane %v3103_v45, %v6445_v20  ;;  %v4306_v45 = vld [vmem:[#allocation12 + $0x78] sm:$0xff] }
 0x8ba   : > { %v3376_v23 = vrot.slane %v3369_v32, %v6440_v15 }
 0x8bb   : > { %v3035_v7 = vrot.slane %v3027_v0, %v6445_v20  ;;  %v3042_v4 = vrot.slane %v3028_v1, %v6445_v20  ;;  %v3043_v5 = vcombine.low %v3011_v24, %v3026_v58  ;;  %v3044_v35 = vcombine.high %v3011_v24, %v3026_v58 }
 0x8bc   : > { %v3384_v24 = vrot.slane %v5037_v41, %v6440_v15  ;;  %v3360_v58 = vrot.slane %v3353_v50, %v6440_v15  ;;  %v3368_v0 = vrot.slane %v5036_v19, %v6440_v15  ;;  %v6859_v1 = vcombine.low %v3102_v28, %v3110_v22 }
 0x8bd   : > { %v3051_v3 = vrot.slane %v3043_v5, %v6445_v20  ;;  %v3058_v56 = vrot.slane %v3044_v35, %v6445_v20  ;;  %v3113_v16 = vcombine.low %v3035_v7, %v3042_v4  ;;  %v5032_v54 = vcombine.high %v3035_v7, %v3042_v4 }
 0x8be   : > { %v3112_v30 = vcombine.high %v3102_v28, %v3110_v22  ;;  %v3393_v38 = vcombine.low %v3376_v23, %v3384_v24  ;;  %v3385_v7 = vcombine.low %v3360_v58, %v3368_v0  ;;  %v4304_v22 = vld [vmem:[#allocation12 + $0x68] sm:$0xff]  ;;  %v4302_v24 = vld [vmem:[#allocation12 + $0x58] sm:$0xff]  ;;  %v4295_v58 = vld [vmem:[#allocation12 + $0x20] sm:$0xff] }
 0x8bf   : > { %v3120_v9 = vrot.slane %v3113_v16, %v6440_v15  ;;  %v3128_v10 = vrot.slane %v5032_v54, %v6440_v15  ;;  %v3129_v2 = vcombine.low %v3051_v3, %v3058_v56  ;;  %v5033_v13 = vcombine.high %v3051_v3, %v3058_v56  ;;  %v4296_v28 = vld [vmem:[#allocation12 + $0x28] sm:$0xff]  ;;  %v4294_v0 = vld [vmem:[#allocation12 + $0x18] sm:$0xff] }
 0x8c0   : > { %v5681_v25 = vpop.eup %5680  ;;  %v3400_v4 = vrot.slane %v3393_v38, %v6445_v20 }
 0x8c1   : > { %v3136_v48 = vrot.slane %v3129_v2, %v6440_v15  ;;  %v3144_v53 = vrot.slane %v5033_v13, %v6440_v15  ;;  %v3145_v17 = vcombine.low %v3120_v9, %v3128_v10  ;;  %v3582_v31 = vmul.f32 %v5681_v25, %v6798_v39 }
 0x8c2   : > { %v3392_v39 = vrot.slane %v3385_v7, %v6445_v20 }
 0x8c3   : > { %v3153_v49 = vcombine.low %v3136_v48, %v3144_v53  ;;  %v3152_v21 = vrot.slane %v3145_v17, %v6445_v20 }
 0x8c4   : > { %v3401_v5 = vcombine.low %v3392_v39, %v3400_v4 }
 0x8c5   : > { %v3160_v43 = vrot.slane %v3153_v49, %v6445_v20 }
 0x8c7   : > { %v6853_v26 = vcombine.low %v3152_v21, %v3160_v43  ;;  %v3162_v27 = vcombine.high %v3152_v21, %v3160_v43  ;;  %v4305_v21 = vld [vmem:[#allocation12 + $0x70] sm:$0xff] }
 0x8c9   : > { %5437 = vmatpush3.msra.mxu0 %v6853_v26  ;;  %5444 = vmatpush3.msra.mxu1 %v3162_v27 }
 0x8ca   : > { %5438 = vmatprep.subr.mxu0 %v6042_v46  ;;  %5445 = vmatprep.subr.mxu1 %v6042_v46 }
 0x8cb   : > { %5439 = vmatpush3.msra.mxu0 %v6859_v1  ;;  %5446 = vmatpush3.msra.mxu1 %v3112_v30 }
 0x8cc   : > { %5448 = vmatmul.mubr.msk.f32.vlgmr.msra.gmra.mxu1 %vm1956_vm2, %v3582_v31  ;;  %5450 = vmatprep.subr.mxu1 %v6042_v46  ;;  %v4291_v31 = vld [vmem:[#allocation12] sm:$0xff] }
 0x8cd   : > { %5451 = vmatpush3.xpose.msk.msra.mxu1 %vm1797_vm1, %v6725_v44  ;;  %5454 = vmatprep.mubr.msk.f32.mxu1 %vm6044_vm0, %v6042_v46  ;;  %v3402_v44 = vcombine.high %v3392_v39, %v3400_v4 }
 0x8ce   : > { %5452 = vmatprep.subr.mxu1 %v6042_v46  ;;  %5464 = vmatprep.subr.mxu0 %v6042_v46 }
 0x8d1   : > { %5453 = vmatpush3.xpose.msk.msra.mxu1 %vm1797_vm1, %v6741_v42 }
 0x8d2   : > { %5457 = vmatprep.subr.mxu1 %v6042_v46 }
 0x8d4   : > { %5455 = vmatmul.mubr.msk.f32.vlgmr.msra.gmra.mxu1 %vm1797_vm1, %v3401_v5 }
 0x8d5   : > { %5458 = vmatpush3.xpose.msk.msra.mxu1 %vm1797_vm1, %v6735_v11  ;;  %5461 = vmatprep.mubr.msk.f32.mxu1 %vm6044_vm0, %v6042_v46 }
 0x8d6   : > { %5459 = vmatprep.subr.mxu1 %v6042_v46 }
 0x8d9   : > { %5460 = vmatpush3.xpose.msk.msra.mxu1 %vm1797_vm1, %v6750_v55 }
 0x8da   : > { %5471 = vmatprep.subr.mxu1 %v6042_v46 }
 0x8dc   : > { %5462 = vmatmul.mubr.msk.f32.vlgmr.msra.gmra.mxu1 %vm1797_vm1, %v3402_v44 }
 0x8dd   : > { %5472 = vmatpush3.msra.mxu1 %v3162_v27  ;;  %5475 = vmatprep.mubr.msk.f32.mxu1 %vm6044_vm0, %v6042_v46  ;;  %v4297_v27 = vld [vmem:[#allocation12 + $0x30] sm:$0xff] }
 0x8de   : > { %5473 = vmatprep.subr.mxu1 %v6042_v46 }
 0x8df   : > { %5474 = vmatpush3.msra.mxu1 %v3112_v30  ;;  %v4292_v30 = vld [vmem:[#allocation12 + $0x8] sm:$0xff] }
 0x8e7   : > { %v3563_v11 = vpop.xlane.xlu0 %3562 }
 0x8e8   : > { %v3567_v42 = vsub.f32 %v6770_v18, %v3563_v11 }
 0x8ea   : > { %v3569_v62 = vmul.f32 1.442695, %v3567_v42 }
 0x8ec   : > { %5682 = vpow2.f32 %v3569_v62 }
 0x8f9   : > { %v5683_v16 = vpop.eup %5682 }
 0x8fa   : > { %v3573_v59 = vsel %vm1956_vm2, %v5683_v16, 0.0 }
 0x98c   : > { %v6892_v35 = vpop.f32.mrf.mxu1 }
 0x98d   : > { %v3744_v4 = vcombine.high %v6892_v35, %v6042_v46  ;;  %v3751_v5 = vrot.slane %v6892_v35, %v6440_v15 }
 0x98e   : > { %v5449_v36 = vpop.f32.mrf.mxu1 }
 0x98f   : > { %v3758_v62 = vrot.slane %v3744_v4, %v6440_v15 }
 0x994   : > { %v3920_v55 = vpop.f32.mrf.mxu1 }
 0x995   : > { %v3997_v37 = vsel %vm1956_vm2, %v3920_v55, -inf }
 0x996   : > { %3998 = vmax.xlane.f32.xlu1 %v3997_v37  ;;  %v5456_v40 = vpop.f32.mrf.mxu1 }
 0x99c   : > { %v3993_v3 = vpop.f32.mrf.mxu1 }
 0x99d   : > { %v4000_v56 = vsel %vm1956_vm2, %v3993_v3, -inf }
 0x99e   : > { %4001 = vmax.xlane.f32.xlu0 %v4000_v56  ;;  %v5463_v54 = vpop.f32.mrf.mxu1 }
 0x9a2   : > { %3574 = vadd.xlane.f32.xlu0 %v3573_v59 }
 0xa1f   : > { %v3999_v18 = vpop.xlane.xlu1 %3998 }
 0xa20   : > { %v4003_v61 = vsub.f32 %v3920_v55, %v3999_v18 }
 0xa22   : > { %v4005_v6 = vmul.f32 1.442695, %v4003_v61 }
 0xa24   : > { %5684 = vpow2.f32 %v4005_v6 }
 0xa27   : > { %v4002_v8 = vpop.xlane.xlu0 %4001 }
 0xa28   : > { %v4004_v9 = vsub.f32 %v3993_v3, %v4002_v8 }
 0xa2a   : > { %v4007_v10 = vmul.f32 1.442695, %v4004_v9 }
 0xa2b   : > { %v3575_v2 = vpop.xlane.xlu0 %3574 }
 0xa2c   : > { %5686 = vpow2.f32 %v4007_v10 }
 0xa2d   : > { %5688 = vrcp.f32 %v3575_v2 }
 0xa31   : > { %v5685_v13 = vpop.eup %5684 }
 0xa32   : > { %v4009_v60 = vsel %vm1956_vm2, %v5685_v13, 0.0 }
 0xa33   : > { %4010 = vadd.xlane.f32.xlu0 %v4009_v60 }
 0xa39   : > { %v5687_v14 = vpop.eup %5686 }
 0xa3a   : > { %v5689_v48 = vpop.eup %5688  ;;  %v4012_v53 = vsel %vm1956_vm2, %v5687_v14, 0.0 }
 0xa3b   : > { %4013 = vadd.xlane.f32.xlu1 %v4012_v53  ;;  %v3580_v17 = vmul.f32 %v5689_v48, %v5683_v16 }
 0xa3d   : > { %5441 = vmatmul.mubr.msk.f32.vlgmr.msra.gmra.mxu0 %vm1956_vm2, %v3580_v17 }
 0xa3e   : > { %5465 = vmatpush3.msra.mxu0 %v6853_v26  ;;  %5468 = vmatprep.mubr.msk.f32.mxu0 %vm6044_vm0, %v6042_v46  ;;  %v4301_v26 = vld [vmem:[#allocation12 + $0x50] sm:$0xff] }
 0xa3f   : > { %5466 = vmatprep.subr.mxu0 %v6042_v46 }
 0xa40   : > { %5467 = vmatpush3.msra.mxu0 %v6859_v1  ;;  %v4293_v1 = vld [vmem:[#allocation12 + $0x10] sm:$0xff] }
 0xa41   : > { %5478 = vmatprep.subr.mxu0 %v4306_v45 }
 0xa49   : > { %5645 = vrot.lane.b32.xlu0 %v6792_v34, %s6043_s9  ;;  %v4303_v34 = vld [vmem:[#allocation12 + $0x60] sm:$0xff] }
 0xabc   : > { %v4011_v32 = vpop.xlane.xlu0 %4010 }
 0xabd   : > { %5690 = vrcp.f32 %v4011_v32 }
 0xac0   : > { %v5646_v49 = vpop.permute.xlu0 %5645 }
 0xac1   : > { %v5647_v63 = vunpack.i.l.bf16 %v5646_v49  ;;  %v5648_v38 = vunpack.i.h.bf16 %v5646_v49 }
 0xac3   : > { %v2245_v43 = vsel %vm1797_vm1, %v2239_v57, %v5647_v63  ;;  %v4298_v57 = vld [vmem:[#allocation12 + $0x38] sm:$0xff]  ;;  %v2681_v7 = vsel %vm1797_vm1, %v2675_v51, %v5648_v38 }
 0xac4   : > { %v4014_v41 = vpop.xlane.xlu1 %4013 }
 0xac5   : > { %5692 = vrcp.f32 %v4014_v41 }
 0xaca   : > { %v5691_v50 = vpop.eup %5690 }
 0xacb   : > { %v4016_v19 = vmul.f32 %v5691_v50, %v5685_v13 }
 0xacd   : > { %5469 = vmatmul.mubr.msk.f32.vlgmr.msra.gmra.mxu0 %vm1956_vm2, %v4016_v19 }
 0xace   : > { %5479 = vmatpush3.msra.mxu0 %v4306_v45  ;;  %5510 = vmatprep.mubr.f32.mxu0 %v2245_v43 }
 0xacf   : > { %5480 = vmatprep.subr.mxu0 %v4305_v21 }
 0xad0   : > { %5481 = vmatpush3.msra.mxu0 %v4305_v21 }
 0xad1   : > { %5482 = vmatprep.subr.mxu0 %v4304_v22 }
 0xad2   : > { %v5693_v23 = vpop.eup %5692  ;;  %5483 = vmatpush3.msra.mxu0 %v4304_v22 }
 0xad3   : > { %5484 = vmatprep.subr.mxu0 %v4303_v34  ;;  %v4018_v25 = vmul.f32 %v5693_v23, %v5687_v14 }
 0xad4   : > { %5485 = vmatpush3.msra.mxu0 %v4303_v34 }
 0xad5   : > { %5486 = vmatprep.subr.mxu0 %v4302_v24  ;;  %5476 = vmatmul.mubr.msk.f32.vlgmr.msra.gmra.mxu1 %vm1956_vm2, %v4018_v25 }
 0xad6   : > { %5487 = vmatpush3.msra.mxu0 %v4302_v24  ;;  %4589 = vmatprep.mubr.f32.mxu1 %v6042_v46 }
 0xad7   : > { %5488 = vmatprep.subr.mxu0 %v4301_v26 }
 0xad8   : > { %5489 = vmatpush3.msra.mxu0 %v4301_v26 }
 0xad9   : > { %5490 = vmatprep.subr.mxu0 %v4300_v47 }
 0xada   : > { %5491 = vmatpush3.msra.mxu0 %v4300_v47 }
 0xadb   : > { %5492 = vmatprep.subr.mxu0 %v4299_v52 }
 0xadc   : > { %5493 = vmatpush3.msra.mxu0 %v4299_v52 }
 0xadd   : > { %5494 = vmatprep.subr.mxu0 %v4298_v57 }
 0xade   : > { %5495 = vmatpush3.msra.mxu0 %v4298_v57 }
 0xadf   : > { %5496 = vmatprep.subr.mxu0 %v4297_v27 }
 0xae0   : > { %5497 = vmatpush3.msra.mxu0 %v4297_v27 }
 0xae1   : > { %5498 = vmatprep.subr.mxu0 %v4296_v28 }
 0xae2   : > { %5499 = vmatpush3.msra.mxu0 %v4296_v28 }
 0xae3   : > { %5500 = vmatprep.subr.mxu0 %v4295_v58 }
 0xae4   : > { %5501 = vmatpush3.msra.mxu0 %v4295_v58 }
 0xae5   : > { %5502 = vmatprep.subr.mxu0 %v4294_v0 }
 0xae6   : > { %5503 = vmatpush3.msra.mxu0 %v4294_v0 }
 0xae7   : > { %5504 = vmatprep.subr.mxu0 %v4293_v1 }
 0xae8   : > { %5505 = vmatpush3.msra.mxu0 %v4293_v1 }
 0xae9   : > { %5506 = vmatprep.subr.mxu0 %v4292_v30 }
 0xaea   : > { %5507 = vmatpush3.msra.mxu0 %v4292_v30 }
 0xaeb   : > { %5508 = vmatprep.subr.mxu0 %v4291_v31 }
 0xaec   : > { %5509 = vmatpush3.msra.mxu0 %v4291_v31 }
 0xaed   : > { %5511 = vmatmul.mubr.f32.vlgmr.msra.gmra.mxu0 %v2681_v7 }
 0xafd   : > { %v3652_v39 = vpop.f32.mrf.mxu0 }
 0xafe   : > { %v3729_v44 = vcombine.high %v3652_v39, %v6042_v46  ;;  %v3736_v11 = vrot.slane %v3652_v39, %v6440_v15 }
 0xaff   : > { %v5442_v42 = vpop.f32.mrf.mxu0 }
 0xb00   : > { %v3743_v36 = vrot.slane %v3729_v44, %v6440_v15  ;;  %v3759_v29 = vcombine.low %v3736_v11, %v3751_v5  ;;  %v3760_v33 = vcombine.high %v3736_v11, %v3751_v5 }
 0xb02   : > { %v3767_v51 = vrot.slane %v3759_v29, %v6445_v20  ;;  %v3774_v55 = vrot.slane %v3760_v33, %v6445_v20  ;;  %v3775_v37 = vcombine.low %v3743_v36, %v3758_v62  ;;  %v3776_v40 = vcombine.high %v3743_v36, %v3758_v62  ;;  %v5735_v33 = vld [vmem:[%s6340_s1 + $0x8] sm:$0xff] }
 0xb04   : > { %v3783_v3 = vrot.slane %v3775_v37, %v6445_v20  ;;  %v3790_v35 = vrot.slane %v3776_v40, %v6445_v20  ;;  %v3795_v56 = vcombine.low %v3767_v51, %v3774_v55  ;;  %v5046_v16 = vcombine.high %v3767_v51, %v3774_v55  ;;  %v4512_v55 = vld [vmem:[#allocation14 + $0xf8] sm:$0xff]  ;;  %v4511_v37 = vld [vmem:[#allocation14 + $0xf0] sm:$0xff] }
 0xb05   : > { %4525 = vmatprep.subr.mxu1 %v4512_v55 }
 0xb06   : > { %v3802_v54 = vrot.slane %v3795_v56, %v6440_v15  ;;  %v3810_v59 = vrot.slane %v5046_v16, %v6440_v15  ;;  %v3811_v18 = vcombine.low %v3783_v3, %v3790_v35  ;;  %v5047_v61 = vcombine.high %v3783_v3, %v3790_v35  ;;  %4526 = vmatpush1.msra.mxu1 %v4511_v37  ;;  %v4510_v3 = vld [vmem:[#allocation14 + $0xe8] sm:$0xff]  ;;  %v4509_v35 = vld [vmem:[#allocation14 + $0xe0] sm:$0xff]  ;;  %v4508_v56 = vld [vmem:[#allocation14 + $0xd8] sm:$0xff] }
 0xb07   : > { %4527 = vmatprep.subr.mxu1 %v4510_v3  ;;  %v4507_v16 = vld [vmem:[#allocation14 + $0xd0] sm:$0xff]  ;;  %v7006_v37 = vld [vmem:[%s7135_s12] ss:$0 sm:$0xff] }
 0xb08   : > { %v3818_v6 = vrot.slane %v3811_v18, %v6440_v15  ;;  %v3826_v8 = vrot.slane %v5047_v61, %v6440_v15  ;;  %v3827_v9 = vcombine.low %v3802_v54, %v3810_v59  ;;  %4528 = vmatpush1.msra.mxu1 %v4509_v35  ;;  %v4506_v54 = vld [vmem:[#allocation14 + $0xc8] sm:$0xff]  ;;  %v4505_v59 = vld [vmem:[#allocation14 + $0xc0] sm:$0xff]  ;;  %v4504_v18 = vld [vmem:[#allocation14 + $0xb8] sm:$0xff] }
 0xb09   : > { %4529 = vmatprep.subr.mxu1 %v4508_v56  ;;  %v4503_v61 = vld [vmem:[#allocation14 + $0xb0] sm:$0xff] }
 0xb0a   : > { %v3835_v10 = vcombine.low %v3818_v6, %v3826_v8  ;;  %v6935_v2 = vrot.slane %v3827_v9, %v6445_v20  ;;  %4530 = vmatpush1.msra.mxu1 %v4507_v16  ;;  %v4502_v6 = vld [vmem:[#allocation14 + $0xa8] sm:$0xff]  ;;  %v4501_v8 = vld [vmem:[#allocation14 + $0xa0] sm:$0xff]  ;;  %v4500_v9 = vld [vmem:[#allocation14 + $0x98] sm:$0xff] }
 0xb0b   : > { %4531 = vmatprep.subr.mxu1 %v4506_v54  ;;  %v4709_v54 = vld [vmem:[#allocation15 + $0xf8] sm:$0xff] }
 0xb0c   : > { %v6938_v13 = vrot.slane %v3835_v10, %v6445_v20  ;;  %4532 = vmatpush1.msra.mxu1 %v4505_v59  ;;  %v4499_v10 = vld [vmem:[#allocation14 + $0x90] sm:$0xff]  ;;  %5208 = vmatprep.subr.mxu0 %v4709_v54  ;;  %v4693_v59 = vld [vmem:[#allocation15 + $0x78] sm:$0xff] }
 0xb0d   : > { %4533 = vmatprep.subr.mxu1 %v4504_v18  ;;  %5209 = vmatpush3.msra.mxu0 %v4693_v59  ;;  %v4708_v18 = vld [vmem:[#allocation15 + $0xf0] sm:$0xff] }
 0xb0e   : > { %v3844_v60 = vcombine.high %v6935_v2, %v6938_v13  ;;  %v3843_v14 = vcombine.low %v6935_v2, %v6938_v13  ;;  %4534 = vmatpush1.msra.mxu1 %v4503_v61  ;;  %5210 = vmatprep.subr.mxu0 %v4708_v18  ;;  %v4692_v61 = vld [vmem:[#allocation15 + $0x70] sm:$0xff] }
 0xb0f   : > { %4535 = vmatprep.subr.mxu1 %v4502_v6  ;;  %5211 = vmatpush3.msra.mxu0 %v4692_v61  ;;  %v4707_v6 = vld [vmem:[#allocation15 + $0xe8] sm:$0xff] }
 0xb10   : > { %4536 = vmatpush1.msra.mxu1 %v4501_v8  ;;  %5212 = vmatprep.subr.mxu0 %v4707_v6  ;;  %v4691_v8 = vld [vmem:[#allocation15 + $0x68] sm:$0xff] }
 0xb11   : > { %4537 = vmatprep.subr.mxu1 %v4500_v9  ;;  %5213 = vmatpush3.msra.mxu0 %v4691_v8  ;;  %v4706_v9 = vld [vmem:[#allocation15 + $0xe0] sm:$0xff] }
 0xb12   : > { %4538 = vmatpush1.msra.mxu1 %v4499_v10  ;;  %5214 = vmatprep.subr.mxu0 %v4706_v9  ;;  %v4690_v10 = vld [vmem:[#allocation15 + $0x60] sm:$0xff] }
 0xb13   : > { %5215 = vmatpush3.msra.mxu0 %v4690_v10 }
 0xb8d   : > { %v4088_v48 = vpop.f32.mrf.mxu0 }
 0xb8e   : > { %v4165_v17 = vcombine.high %v4088_v48, %v6042_v46  ;;  %v4172_v32 = vrot.slane %v4088_v48, %v6440_v15  ;;  %v4497_v48 = vld [vmem:[#allocation14 + $0x80] sm:$0xff] }
 0xb8f   : > { %v5470_v53 = vpop.f32.mrf.mxu0 }
 0xb90   : > { %v4179_v50 = vrot.slane %v4165_v17, %v6440_v15  ;;  %v4496_v53 = vld [vmem:[#allocation14 + $0x78] sm:$0xff]  ;;  %v4495_v17 = vld [vmem:[#allocation14 + $0x70] sm:$0xff] }
 0xb95   : > { %v4161_v45 = vpop.f32.mrf.mxu1 }
 0xb96   : > { %v4180_v41 = vcombine.high %v4161_v45, %v6042_v46  ;;  %v4187_v49 = vrot.slane %v4161_v45, %v6440_v15  ;;  %v4494_v45 = vld [vmem:[#allocation14 + $0x68] sm:$0xff] }
 0xb97   : > { %v5477_v63 = vpop.f32.mrf.mxu1 }
 0xb98   : > { %v4194_v19 = vrot.slane %v4180_v41, %v6440_v15  ;;  %v4195_v21 = vcombine.low %v4172_v32, %v4187_v49  ;;  %v4196_v43 = vcombine.high %v4172_v32, %v4187_v49  ;;  %v4493_v32 = vld [vmem:[#allocation14 + $0x60] sm:$0xff]  ;;  %v4492_v41 = vld [vmem:[#allocation14 + $0x58] sm:$0xff]  ;;  %v4491_v49 = vld [vmem:[#allocation14 + $0x50] sm:$0xff] }
 0xb99   : > { %v4490_v63 = vld [vmem:[#allocation14 + $0x48] sm:$0xff] }
 0xb9a   : > { %v4203_v22 = vrot.slane %v4195_v21, %v6445_v20  ;;  %v4210_v34 = vrot.slane %v4196_v43, %v6445_v20  ;;  %v4211_v23 = vcombine.low %v4179_v50, %v4194_v19  ;;  %v4212_v24 = vcombine.high %v4179_v50, %v4194_v19  ;;  %v4489_v50 = vld [vmem:[#allocation14 + $0x40] sm:$0xff]  ;;  %v4488_v19 = vld [vmem:[#allocation14 + $0x38] sm:$0xff]  ;;  %v4487_v21 = vld [vmem:[#allocation14 + $0x30] sm:$0xff] }
 0xb9b   : > { %v4486_v43 = vld [vmem:[#allocation14 + $0x28] sm:$0xff] }
 0xb9c   : > { %v4219_v25 = vrot.slane %v4211_v23, %v6445_v20  ;;  %v4226_v26 = vrot.slane %v4212_v24, %v6445_v20  ;;  %v4231_v47 = vcombine.low %v4203_v22, %v4210_v34  ;;  %v5056_v52 = vcombine.high %v4203_v22, %v4210_v34  ;;  %v4485_v22 = vld [vmem:[#allocation14 + $0x20] sm:$0xff]  ;;  %v4484_v34 = vld [vmem:[#allocation14 + $0x18] sm:$0xff]  ;;  %v4483_v23 = vld [vmem:[#allocation14 + $0x10] sm:$0xff] }
 0xb9d   : > { %v4482_v24 = vld [vmem:[#allocation14 + $0x8] sm:$0xff] }
 0xb9e   : > { %v4238_v57 = vrot.slane %v4231_v47, %v6440_v15  ;;  %v4246_v27 = vrot.slane %v5056_v52, %v6440_v15  ;;  %v4247_v28 = vcombine.low %v4219_v25, %v4226_v26  ;;  %v5057_v58 = vcombine.high %v4219_v25, %v4226_v26  ;;  %v4481_v25 = vld [vmem:[#allocation14] sm:$0xff] }
 0xba0   : > { %v4254_v0 = vrot.slane %v4247_v28, %v6440_v15  ;;  %v4262_v1 = vrot.slane %v5057_v58, %v6440_v15  ;;  %v4263_v30 = vcombine.low %v4238_v57, %v4246_v27  ;;  %v6972_v15 = vld [vmem:[%s7133_s10] ss:$0 sm:$0xff] }
 0xba2   : > { %v4271_v38 = vcombine.low %v4254_v0, %v4262_v1  ;;  %v6959_v31 = vrot.slane %v4263_v30, %v6445_v20 }
 0xba4   : > { %v6962_v7 = vrot.slane %v4271_v38, %v6445_v20  ;;  %v5734_v20 = vld [vmem:[%s6340_s1] sm:$0xff] }
 0xba6   : > { %v4280_v4 = vcombine.high %v6959_v31, %v6962_v7  ;;  %v4279_v39 = vcombine.low %v6959_v31, %v6962_v7 }
 0xba8   : > { %v5649_v5 = vpack.i.bf16 %v4280_v4, %v3844_v60  ;;  %v4498_v60 = vld [vmem:[#allocation14 + $0x88] sm:$0xff] }
 0xba9   : > { %4539 = vmatprep.subr.mxu1 %v4498_v60  ;;  %v4705_v60 = vld [vmem:[#allocation15 + $0xd8] sm:$0xff] }
 0xbaa   : > { %5650 = vrot.lane.b32.xlu1 %v5649_v5, %s6043_s9  ;;  %4540 = vmatpush1.msra.mxu1 %v4497_v48  ;;  %v4689_v48 = vld [vmem:[#allocation15 + $0x58] sm:$0xff]  ;;  %s5079_s9 = sshll.u32 %s6161_s0, 9  ;;  %s6047_s0 = smov [#allocation17]  }
 0xbab   : > { %4541 = vmatprep.subr.mxu1 %v4496_v53  ;;  %5216 = vmatprep.subr.mxu0 %v4705_v60  ;;  %v4704_v53 = vld [vmem:[#allocation15 + $0xd0] sm:$0xff]  ;;  %s7078_s2 = scalar_lea.hbm %s7194_s28, %s5079_s9  ;;  %s5952_s13 = sshll.u32 %s6047_s0, 4  ;;  %s5953_s13 = int_to_ptr.vmem [resolvable:$false] %s5952_s13 }
 0xbac   : > { %4542 = vmatpush1.msra.mxu1 %v4495_v17  ;;  %5217 = vmatpush3.msra.mxu0 %v4689_v48  ;;  %v4688_v17 = vld [vmem:[#allocation15 + $0x50] sm:$0xff]  ;;  %s5954_s15 = scalar_lea.vmem %s5953_s13, 1024  ;;  %p5955_p1 = scmp.lt.s32.totalorder %s7071_s22, %s5953_s13 }
 0xbad   : > { %v5512_v44 = vpop.f32.mrf.mxu0  ;;  %4543 = vmatprep.subr.mxu1 %v4494_v45  ;;  %5218 = vmatprep.subr.mxu0 %v4704_v53  ;;  %v4703_v45 = vld [vmem:[#allocation15 + $0xc8] sm:$0xff]  ;;  %p5956_p3 = scmp.lt.s32.totalorder %s5954_s15, %s5948_s7 }
 0xbae   : > { %v4386_v36 = vadd.f32 %v5512_v44, %v6972_v15  ;;  %4544 = vmatpush1.msra.mxu1 %v4493_v32  ;;  %5219 = vmatpush3.msra.mxu0 %v4688_v17  ;;  %v4687_v32 = vld [vmem:[#allocation15 + $0x48] sm:$0xff] }
 0xbaf   : > { %v4380_v11 = vpop.f32.mrf.mxu0  ;;  %4545 = vmatprep.subr.mxu1 %v4492_v41  ;;  %5220 = vmatprep.subr.mxu0 %v4703_v45  ;;  %v4702_v41 = vld [vmem:[#allocation15 + $0xc0] sm:$0xff]  ;;  %p5957_p4 = por %p5956_p3, %p5955_p1 }
 0xbb0   : > { %v4381_v42 = vadd.f32 %v6972_v15, %v4380_v11  ;;  %v6982_v51 = vadd.f32 %v5735_v33, %v4386_v36  ;;  %4546 = vmatpush1.msra.mxu1 %v4491_v49  ;;  %v7000_v36 = vld [vmem:[%s7134_s11] ss:$0 sm:$0xff]  ;;  %5221 = vmatpush3.msra.mxu0 %v4687_v32  ;;  %v4686_v49 = vld [vmem:[#allocation15 + $0x40] sm:$0xff] }
 0xbb1   : > { %4547 = vmatprep.subr.mxu1 %v4490_v63  ;;  %5222 = vmatprep.subr.mxu0 %v4702_v41  ;;  %v4701_v63 = vld [vmem:[#allocation15 + $0xb8] sm:$0xff]  ;;  %p5958_p8 = pnand %p5957_p4, %p5951_p13 }
 0xbb2   : > { %v6976_v62 = vadd.f32 %v5734_v20, %v4381_v42  ;;  %v4418_v40 = vmul.f32 %v6982_v51, %v6982_v51  ;;  %4548 = vmatpush1.msra.mxu1 %v4489_v50  ;;  %5223 = vmatpush3.msra.mxu0 %v4686_v49  ;;  %v4685_v50 = vld [vmem:[#allocation15 + $0x38] sm:$0xff] }
 0xbb3   : > { %4549 = vmatprep.subr.mxu1 %v4488_v19  ;;  %5224 = vmatprep.subr.mxu0 %v4701_v63  ;;  %v4700_v19 = vld [vmem:[#allocation15 + $0xb0] sm:$0xff] }
 0xbb4   : > { %v4417_v29 = vmul.f32 %v6976_v62, %v6976_v62  ;;  %4550 = vmatpush1.msra.mxu1 %v4487_v21  ;;  %5225 = vmatpush3.msra.mxu0 %v4685_v50  ;;  %v4684_v21 = vld [vmem:[#allocation15 + $0x30] sm:$0xff] }
 0xbb5   : > { %4551 = vmatprep.subr.mxu1 %v4486_v43  ;;  %5226 = vmatprep.subr.mxu0 %v4700_v19  ;;  %v4699_v43 = vld [vmem:[#allocation15 + $0xa8] sm:$0xff] }
 0xbb6   : > { %4421 = vadd.xlane.f32.xlu0 %v4417_v29  ;;  %4552 = vmatpush1.msra.mxu1 %v4485_v22  ;;  %v4683_v22 = vld [vmem:[#allocation15 + $0x28] sm:$0xff] }
 0xbb7   : > { %4553 = vmatprep.subr.mxu1 %v4484_v34  ;;  %5227 = vmatpush3.msra.mxu0 %v4684_v21  ;;  %v4698_v34 = vld [vmem:[#allocation15 + $0xa0] sm:$0xff] }
 0xbb8   : > { %4554 = vmatpush1.msra.mxu1 %v4483_v23  ;;  %5228 = vmatprep.subr.mxu0 %v4699_v43  ;;  %v4682_v23 = vld [vmem:[#allocation15 + $0x20] sm:$0xff] }
 0xbb9   : > { %4555 = vmatprep.subr.mxu1 %v4482_v24  ;;  %5229 = vmatpush3.msra.mxu0 %v4683_v22  ;;  %v4697_v24 = vld [vmem:[#allocation15 + $0x98] sm:$0xff] }
 0xbba   : > { %4407 = vadd.xlane.f32.xlu0 %v6982_v51  ;;  %4556 = vmatpush1.msra.mxu1 %v4481_v25  ;;  %v4681_v25 = vld [vmem:[#allocation15 + $0x18] sm:$0xff] }
 0xbbb   : > { %5230 = vmatprep.subr.mxu0 %v4698_v34 }
 0xbbc   : > { %5231 = vmatpush3.msra.mxu0 %v4682_v23 }
 0xbbd   : > { %5232 = vmatprep.subr.mxu0 %v4697_v24 }
 0xbbe   : > { %5233 = vmatpush3.msra.mxu0 %v4681_v25 }
 0xbce   : > { %4405 = vadd.xlane.f32.xlu1 %v6976_v62 }
 0xbd2   : > { %4423 = vadd.xlane.f32.xlu1 %v4418_v40 }
 0xc1c   : > { %v5651_v26 = vpop.permute.xlu1 %5650 }
 0xc1d   : > { %v5653_v47 = vunpack.i.h.bf16 %v5651_v26  ;;  %v5652_v52 = vunpack.i.l.bf16 %v5651_v26  ;;  %v4696_v26 = vld [vmem:[#allocation15 + $0x90] sm:$0xff] }
 0xc1e   : > { %5234 = vmatprep.subr.mxu0 %v4696_v26 }
 0xc1f   : > { %v3849_v57 = vsel %vm1797_vm1, %v3843_v14, %v5652_v52  ;;  %v4285_v27 = vsel %vm1797_vm1, %v4279_v39, %v5653_v47  ;;  %v4680_v47 = vld [vmem:[#allocation15 + $0x10] sm:$0xff]  ;;  %v4695_v52 = vld [vmem:[#allocation15 + $0x88] sm:$0xff] }
 0xc20   : > { %5513 = vmatprep.mubr.f32.mxu0 %v3849_v57  ;;  %5235 = vmatpush3.msra.mxu0 %v4680_v47  ;;  %v4679_v57 = vld [vmem:[#allocation15 + $0x8] sm:$0xff] }
 0xc21   : > { %5514 = vmatmul.mubr.f32.gmra.mxu0 %v4285_v27  ;;  %5236 = vmatprep.subr.mxu0 %v4695_v52  ;;  %v4694_v27 = vld [vmem:[#allocation15 + $0x80] sm:$0xff] }
 0xc22   : > { %5237 = vmatpush3.msra.mxu0 %v4679_v57 }
 0xc23   : > { %5238 = vmatprep.subr.mxu0 %v4694_v27 }
 0xc3f   : > { %v4422_v28 = vpop.xlane.xlu0 %4421 }
 0xc40   : > { %v4429_v38 = vmul.f32 0.0078125, %v4422_v28  ;;  %v4678_v28 = vld [vmem:[#allocation15] sm:$0xff] }
 0xc41   : > { %5239 = vmatpush3.msra.mxu0 %v4678_v28 }
 0xc43   : > { %v4408_v58 = vpop.xlane.xlu0 %4407 }
 0xc44   : > { %v4414_v1 = vmul.f32 0.0078125, %v4408_v58 }
 0xc46   : > { %v4434_v44 = vmul.f32 %v4414_v1, %v4414_v1  ;;  %v4446_v29 = vsub.f32 %v6982_v51, %v4414_v1 }
 0xc57   : > { %v4406_v0 = vpop.xlane.xlu1 %4405 }
 0xc58   : > { %v4413_v30 = vmul.f32 0.0078125, %v4406_v0 }
 0xc5a   : > { %v4433_v4 = vmul.f32 %v4413_v30, %v4413_v30  ;;  %v4445_v7 = vsub.f32 %v6976_v62, %v4413_v30 }
 0xc5b   : > { %v4424_v5 = vpop.xlane.xlu1 %4423 }
 0xc5c   : > { %v4437_v11 = vsub.f32 %v4429_v38, %v4433_v4  ;;  %v4430_v2 = vmul.f32 0.0078125, %v4424_v5  ;;  %v5736_v38 = vld [vmem:[%s6340_s1 + $0x10] sm:$0xff]  ;;  %v5737_v5 = vld [vmem:[%s6340_s1 + $0x18] sm:$0xff] }
 0xc5e   : > { %v4441_v13 = vmax.f32 %v4437_v11, 0.0  ;;  %v4438_v14 = vsub.f32 %v4430_v2, %v4434_v44 }
 0xc60   : > { %v4449_v42 = vadd.f32 1e-05, %v4441_v13  ;;  %v4442_v20 = vmax.f32 %v4438_v14, 0.0  ;;  %v4513_v13 = vld [vmem:[%s7137_s14] sm:$0x3]  ;;  %v4521_v14 = vsub.s32 1, %v6437_v12 }
 0xc62   : > { %5694 = vrsqrt.f32 %v4449_v42  ;;  %v4450_v31 = vadd.f32 1e-05, %v4442_v20  ;;  %v7035_v20 = vrot.slane %v4513_v13, %v4521_v14 }
 0xc64   : > { %5696 = vrsqrt.f32 %v4450_v31 }
 0xc6f   : > { %v5695_v39 = vpop.eup %5694 }
 0xc70   : > { %v4457_v33 = vmul.f32 %v5695_v39, %v4445_v7 }
 0xc71   : > { %v5697_v55 = vpop.eup %5696 }
 0xc72   : > { %v4467_v40 = vmul.f32 %v7000_v36, %v4457_v33  ;;  %v4458_v3 = vmul.f32 %v5697_v55, %v4446_v29 }
 0xc74   : > { %v4477_v35 = vadd.f32 %v7006_v37, %v4467_v40  ;;  %v4468_v56 = vmul.f32 %v7000_v36, %v4458_v3 }
 0xc76   : > { %4590 = vmatmul.mubr.f32.vlgmr.msra.gmra.mxu1 %v4477_v35  ;;  %v4478_v16 = vadd.f32 %v7006_v37, %v4468_v56 }
 0xc77   : > { %4595 = vmatprep.mubr.f32.mxu1 %v6042_v46 }
 0xc7a   : > { %4596 = vmatmul.mubr.f32.gmra.mxu1 %v4478_v16 }
 0xc7b   : > { %4601 = vmatprep.mubr.f32.mxu1 %v6042_v46 }
 0xce1   : > { %v5515_v58 = vpop.f32.mrf.mxu0 }
 0xce2   : > { %v4396_v1 = vadd.f32 %v5515_v58, %v6972_v15 }
 0xce3   : > { %v4390_v0 = vpop.f32.mrf.mxu0 }
 0xce4   : > { %v4391_v30 = vadd.f32 %v6972_v15, %v4390_v0  ;;  %v7020_v44 = vadd.f32 %v5737_v5, %v4396_v1  ;;  %v4517_v15 = vsub.s32 0, %v6437_v12 }
 0xce6   : > { %v7017_v4 = vadd.f32 %v5736_v38, %v4391_v30  ;;  %v4420_v2 = vmul.f32 %v7020_v44, %v7020_v44  ;;  %v7033_v42 = vrot.slane %v4513_v13, %v4517_v15 }
 0xce8   : > { %4409 = vadd.xlane.f32.xlu0 %v7017_v4  ;;  %v4419_v11 = vmul.f32 %v7017_v4, %v7017_v4 }
 0xcea   : > { %4425 = vadd.xlane.f32.xlu1 %v4419_v11 }
 0xcec   : > { %4411 = vadd.xlane.f32.xlu0 %v7020_v44 }
 0xcee   : > { %4427 = vadd.xlane.f32.xlu1 %v4420_v2 }
 0xd36   : > { %v4591_v31 = vpop.f32.mrf.mxu1 }
 0xd37   : > { %v4592_v7 = vadd.f32 %v4591_v31, %v7033_v42 }
 0xd38   : > { %v4593_v39 = vpop.f32.mrf.mxu1 }
 0xd39   : > { %v5061_v29 = vmul.f32 -1.702, %v4592_v7  ;;  %v4594_v33 = vadd.f32 %v4593_v39, %v7035_v20 }
 0xd3a   : > { %v4597_v55 = vpop.f32.mrf.mxu1 }
 0xd3b   : > { %v4630_v40 = vmul.f32 1.442695, %v5061_v29  ;;  %v5062_v3 = vmul.f32 -1.702, %v4594_v33  ;;  %v4598_v35 = vadd.f32 %v4597_v55, %v7033_v42 }
 0xd3c   : > { %v4599_v56 = vpop.f32.mrf.mxu1 }
 0xd3d   : > { %5698 = vpow2.f32 %v4630_v40  ;;  %v4632_v16 = vmul.f32 1.442695, %v5062_v3  ;;  %v5063_v12 = vmul.f32 -1.702, %v4598_v35  ;;  %v4600_v54 = vadd.f32 %v4599_v56, %v7035_v20 }
 0xd3f   : > { %5700 = vpow2.f32 %v4632_v16  ;;  %v4634_v59 = vmul.f32 1.442695, %v5063_v12  ;;  %v5064_v18 = vmul.f32 -1.702, %v4600_v54 }
 0xd41   : > { %5702 = vpow2.f32 %v4634_v59  ;;  %v4636_v61 = vmul.f32 1.442695, %v5064_v18 }
 0xd43   : > { %5704 = vpow2.f32 %v4636_v61 }
 0xd4a   : > { %v5699_v6 = vpop.eup %5698 }
 0xd4b   : > { %v4646_v8 = vadd.f32 1.0, %v5699_v6 }
 0xd4c   : > { %v5701_v9 = vpop.eup %5700 }
 0xd4d   : > { %v4647_v10 = vadd.f32 1.0, %v5701_v9  ;;  %5706 = vrcp.f32 %v4646_v8 }
 0xd4e   : > { %v5703_v60 = vpop.eup %5702 }
 0xd4f   : > { %5708 = vrcp.f32 %v4647_v10  ;;  %v4648_v48 = vadd.f32 1.0, %v5703_v60 }
 0xd50   : > { %v5705_v53 = vpop.eup %5704 }
 0xd51   : > { %v4649_v17 = vadd.f32 1.0, %v5705_v53  ;;  %5710 = vrcp.f32 %v4648_v48 }
 0xd53   : > { %5712 = vrcp.f32 %v4649_v17 }
 0xd5a   : > { %v5707_v45 = vpop.eup %5706 }
 0xd5b   : > { %v4670_v49 = vmul.f32 %v5707_v45, %v4592_v7 }
 0xd5c   : > { %v5709_v32 = vpop.eup %5708 }
 0xd5d   : > { %v4671_v41 = vmul.f32 %v5709_v32, %v4594_v33  ;;  %v7051_v33 = vld [vmem:[%s7139_s16] ss:$0 sm:$0xff] }
 0xd5e   : > { %v5711_v63 = vpop.eup %5710 }
 0xd5f   : > { %4781 = vmatprep.mubr.f32.mxu0 %v4671_v41  ;;  %v4672_v21 = vmul.f32 %v5711_v63, %v4598_v35 }
 0xd60   : > { %v5713_v50 = vpop.eup %5712  ;;  %4782 = vmatmul.mubr.f32.vlgmr.msra.gmra.mxu0 %v4670_v49 }
 0xd61   : > { %v4673_v19 = vmul.f32 %v5713_v50, %v4600_v54 }
 0xd63   : > { %4786 = vmatprep.mubr.f32.mxu0 %v4673_v19 }
 0xd64   : > { %4787 = vmatmul.mubr.f32.gmra.mxu0 %v4672_v21 }
 0xd71   : > { %v4410_v43 = vpop.xlane.xlu0 %4409 }
 0xd72   : > { %v4415_v22 = vmul.f32 0.0078125, %v4410_v43 }
 0xd73   : > { %v4426_v34 = vpop.xlane.xlu1 %4425 }
 0xd74   : > { %v4435_v23 = vmul.f32 %v4415_v22, %v4415_v22  ;;  %v4431_v24 = vmul.f32 0.0078125, %v4426_v34  ;;  %v4447_v38 = vsub.f32 %v7017_v4, %v4415_v22 }
 0xd75   : > { %v4412_v25 = vpop.xlane.xlu0 %4411 }
 0xd76   : > { %v4439_v26 = vsub.f32 %v4431_v24, %v4435_v23  ;;  %v4416_v47 = vmul.f32 0.0078125, %v4412_v25 }
 0xd77   : > { %v4428_v52 = vpop.xlane.xlu1 %4427 }
 0xd78   : > { %v4443_v57 = vmax.f32 %v4439_v26, 0.0  ;;  %v4436_v27 = vmul.f32 %v4416_v47, %v4416_v47  ;;  %v4432_v28 = vmul.f32 0.0078125, %v4428_v52  ;;  %v4448_v2 = vsub.f32 %v7020_v44, %v4416_v47 }
 0xd7a   : > { %v4451_v58 = vadd.f32 1e-05, %v4443_v57  ;;  %v4440_v0 = vsub.f32 %v4432_v28, %v4436_v27 }
 0xd7c   : > { %5714 = vrsqrt.f32 %v4451_v58  ;;  %v4444_v1 = vmax.f32 %v4440_v0, 0.0 }
 0xd7e   : > { %v4452_v30 = vadd.f32 1e-05, %v4444_v1 }
 0xd80   : > { %5716 = vrsqrt.f32 %v4452_v30 }
 0xd89   : > { %v5715_v5 = vpop.eup %5714 }
 0xd8a   : > { %v4459_v11 = vmul.f32 %v5715_v5, %v4447_v38 }
 0xd8c   : > { %v4469_v15 = vmul.f32 %v7000_v36, %v4459_v11 }
 0xd8d   : > { %v5717_v13 = vpop.eup %5716 }
 0xd8e   : > { %v4479_v14 = vadd.f32 %v7006_v37, %v4469_v15  ;;  %v4460_v31 = vmul.f32 %v5717_v13, %v4448_v2 }
 0xd90   : > { %4602 = vmatmul.mubr.f32.gmra.mxu1 %v4479_v14  ;;  %v4470_v7 = vmul.f32 %v7000_v36, %v4460_v31 }
 0xd91   : > { %4607 = vmatprep.mubr.f32.mxu1 %v6042_v46 }
 0xd92   : > { %v4480_v39 = vadd.f32 %v7006_v37, %v4470_v7 }
 0xd94   : > { %4608 = vmatmul.mubr.f32.gmra.mxu1 %v4480_v39 }
 0xe20   : > { %v5240_v29 = vpop.f32.mrf.mxu0 }
 0xe22   : > { %v5241_v55 = vpop.f32.mrf.mxu0 }
 0xe23   : > { %v5242_v40 = vadd.f32 %v5241_v55, %v5240_v29 }
 0xe24   : > { %v5243_v3 = vpop.f32.mrf.mxu0 }
 0xe25   : > { %v4784_v35 = vadd.f32 %v5242_v40, %v7051_v33 }
 0xe26   : > { %v5244_v56 = vpop.f32.mrf.mxu0 }
 0xe27   : > { %v4802_v16 = vadd.f32 %v4784_v35, %v6976_v62  ;;  %v5245_v36 = vadd.f32 %v5244_v56, %v5243_v3 }
 0xe29   : > { %4806 = vst [vmem:[%s7057_s17] sm:$0xff] %v4802_v16  ;;  %v4789_v46 = vadd.f32 %v5245_v36, %v7051_v33 }
 0xe2b   : > { %v4803_v37 = vadd.f32 %v4789_v46, %v6982_v51 }
 0xe2d   : > { %4807 = vst [vmem:[%s7057_s17 + $0x8] sm:$0xff] %v4803_v37 }
 0xe50   : > { %v4603_v12 = vpop.f32.mrf.mxu1 }
 0xe51   : > { %v4604_v54 = vadd.f32 %v4603_v12, %v7033_v42 }
 0xe52   : > { %v4605_v59 = vpop.f32.mrf.mxu1 }
 0xe53   : > { %v5065_v18 = vmul.f32 -1.702, %v4604_v54  ;;  %v4606_v61 = vadd.f32 %v4605_v59, %v7035_v20 }
 0xe54   : > { %v4609_v62 = vpop.f32.mrf.mxu1 }
 0xe55   : > { %v4638_v6 = vmul.f32 1.442695, %v5065_v18  ;;  %v5066_v8 = vmul.f32 -1.702, %v4606_v61  ;;  %v4610_v9 = vadd.f32 %v4609_v62, %v7033_v42 }
 0xe56   : > { %v4611_v10 = vpop.f32.mrf.mxu1 }
 0xe57   : > { %5718 = vpow2.f32 %v4638_v6  ;;  %v4640_v60 = vmul.f32 1.442695, %v5066_v8  ;;  %v5067_v48 = vmul.f32 -1.702, %v4610_v9  ;;  %v4612_v53 = vadd.f32 %v4611_v10, %v7035_v20 }
 0xe59   : > { %5720 = vpow2.f32 %v4640_v60  ;;  %v4642_v51 = vmul.f32 1.442695, %v5067_v48  ;;  %v5068_v17 = vmul.f32 -1.702, %v4612_v53 }
 0xe5b   : > { %5722 = vpow2.f32 %v4642_v51  ;;  %v4644_v45 = vmul.f32 1.442695, %v5068_v17 }
 0xe5d   : > { %5724 = vpow2.f32 %v4644_v45 }
 0xe64   : > { %v5719_v32 = vpop.eup %5718 }
 0xe65   : > { %v4650_v41 = vadd.f32 1.0, %v5719_v32 }
 0xe66   : > { %v5721_v49 = vpop.eup %5720 }
 0xe67   : > { %v4651_v63 = vadd.f32 1.0, %v5721_v49  ;;  %5726 = vrcp.f32 %v4650_v41 }
 0xe68   : > { %v5723_v50 = vpop.eup %5722 }
 0xe69   : > { %5728 = vrcp.f32 %v4651_v63  ;;  %v4652_v42 = vadd.f32 1.0, %v5723_v50 }
 0xe6a   : > { %v5725_v19 = vpop.eup %5724 }
 0xe6b   : > { %v4653_v21 = vadd.f32 1.0, %v5725_v19  ;;  %5730 = vrcp.f32 %v4652_v42 }
 0xe6d   : > { %5732 = vrcp.f32 %v4653_v21 }
 0xe74   : > { %v5727_v43 = vpop.eup %5726 }
 0xe75   : > { %v4674_v34 = vmul.f32 %v5727_v43, %v4604_v54 }
 0xe76   : > { %v5729_v20 = vpop.eup %5728 }
 0xe77   : > { %v4675_v22 = vmul.f32 %v5729_v20, %v4606_v61 }
 0xe78   : > { %v5731_v23 = vpop.eup %5730 }
 0xe79   : > { %4791 = vmatprep.mubr.f32.mxu0 %v4675_v22  ;;  %v4676_v26 = vmul.f32 %v5731_v23, %v4610_v9 }
 0xe7a   : > { %v5733_v24 = vpop.eup %5732  ;;  %4792 = vmatmul.mubr.f32.gmra.mxu0 %v4674_v34 }
 0xe7b   : > { %v4677_v25 = vmul.f32 %v5733_v24, %v4612_v53 }
 0xe7d   : > { %4796 = vmatprep.mubr.f32.mxu0 %v4677_v25 }
 0xe7e   : > { %4797 = vmatmul.mubr.f32.gmra.mxu0 %v4676_v26 }
 0xf3a   : > { %v5246_v47 = vpop.f32.mrf.mxu0 }
 0xf3c   : > { %v5247_v52 = vpop.f32.mrf.mxu0 }
 0xf3d   : > { %v5248_v57 = vadd.f32 %v5247_v52, %v5246_v47 }
 0xf3e   : > { %v5249_v27 = vpop.f32.mrf.mxu0 }
 0xf3f   : > { %v4794_v28 = vadd.f32 %v5248_v57, %v7051_v33 }
 0xf40   : > { %v5250_v58 = vpop.f32.mrf.mxu0 }
 0xf41   : > { %v4804_v0 = vadd.f32 %v4794_v28, %v7017_v4  ;;  %v5251_v1 = vadd.f32 %v5250_v58, %v5249_v27 }
 0xf43   : > { %4808 = vst [vmem:[%s7057_s17 + $0x10] sm:$0xff] %v4804_v0  ;;  %v4799_v30 = vadd.f32 %v5251_v1, %v7051_v33 }
 0xf45   : > { %v4805_v38 = vadd.f32 %v4799_v30, %v7020_v44 }
 0xf47   : > { %4809 = vst [vmem:[%s7057_s17 + $0x18] sm:$0xff] %v4805_v38 }
 0xf48   : > { %5961 = shalt.err (!%p5958_p8)
}
 0xf49   : > { %s5962_s30 = scalar_lea.hbm %s7078_s2, 512  ;;  %s5966_s5 = scalar_lea.hbm %s7194_s28, 1024 }
 0xf4a   : > { %p5963_p6 = scmp.ne.s32.totalorder %s7078_s2, %s5962_s30  ;;  %p5967_p0 = scmp.lt.s32.totalorder %s7078_s2, %s7194_s28 }
 0xf4b   : > { %p5968_p2 = scmp.lt.s32.totalorder %s5966_s5, %s5962_s30 }
 0xf4c   : > { %p5964_p10 = pnand %p5963_p6, %p7195_p11 }
 0xf4d   : > { %p5969_p5 = por %p5968_p2, %p5967_p0 }
 0xf4e   : > { %p5965_p7 = pneg %p5964_p10 }
 0xf50   : > { %p5970_p9 = pnand %p5969_p5, %p5965_p7 }
 0xf52   : > { %5973 = shalt.err (!%p5970_p9)
}
 0xf53   : > { %s6048_s20 = smov 128   ;;  %s6049_s18 = smov 8  }
 0xf54   : > { %5546 = dma.vmem_to_hbm [thread:$0]  (%p7195_p11), %s7071_s22, 512, %s7078_s2, %s4811_s23, %s6048_s20, %s6048_s20, %s6049_s18  }
 0xf55 PF: > { %s4840_s7 = sand.u32 1, %s6016_s24   ;;  %p7196_p12 = scmp.ne.s32.totalorder %s7179_s29, 0 }
 0xf56   : > { %p7197_p13 = scmp.ge.s32.totalorder %s6028_s27, 2  ;;  %s4841_s0 = scalar_lea.sflag [#allocation5], %s4840_s7 }
 0xf58   : > { %p5575_p1 = pnand %p7197_p13, %p7196_p12 }
 0xf5a   : > { %p5576_p3 = pneg %p5575_p1 }
 0xf5c   : > { %6011 = dma.done.wait (%p5576_p3), %s4841_s0, 512  }
 0xf5d   : > { %6013 = vsyncadd (%p5576_p3), %s4841_s0, 4294966784  ;;  %s7198_s27 = sld [smem:[#allocation25_spill]]  ;;  %s7201_s24 = smov %s6020_s25 }
 0xf5e   : > { %s7199_s13 = sld [smem:[#allocation24_spill]] }
 0xf5f   : > { %s7200_s26 = sld [smem:[#allocation26_spill]] }
 0xf63   : > { %p34_p4 = scmp.ge.s32.totalorder %s7198_s27, 4  }
 0xf64   : > { %s7202_s25 = smov %s7199_s13 }
 0xf65   :  { %36 = sbr.rel (!%p34_p4) target bundleno = 20 (0x14), region = 161 }
 0xf6a   :  { %4846 = vsyncpa [#allocation4], 1 }
 0xf6b   :  { %4848 = vsyncpa [#allocation4 + $0x1], 1 }
 0xf6c   :  { %4849 = vsyncpa [#allocation7], 1 }
 0xf6d   :  { %4850 = vsyncpa [#allocation10], 1 }
 0xf6e   :  { %4851 = vsyncpa [#allocation13], 1 }
 0xf6f   :  { %4852 = vsyncpa [#allocation16], 1 }
 0xf70   :  { %4853 = vsyncpa [#allocation5], 1 }
 0xf71   :  { %4855 = vsyncpa [#allocation5 + $0x1], 1 }

</bundles_post_ra>
